<compile_context>
chip_gen: v7x
topology: tpu7x:2x2x1
jax: 0.10.0
libtpu: 0.0.40
codegen_flags: <defaults>
</compile_context>

<pallas_src>
import functools
import math

import jax
import jax.numpy as jnp
from jax.experimental import pallas as pl
from jax.experimental.pallas import tpu as pltpu

_SQRT2 = math.sqrt(2.0)


def _gelu_exact(x):
    # matches torch F.gelu (erf-based, approximate='none')
    return 0.5 * x * (1.0 + jax.lax.erf(x / _SQRT2))


@functools.lru_cache(maxsize=1)
def _device_caps():
    """Generation-aware tile caps / VMEM budget (v5e/v6e: 128 MiB, v7x: 64 MiB)."""
    try:
        vmem_phys = int(getattr(pltpu.get_tpu_info(), "vmem_capacity_bytes",
                                64 * 1024 * 1024))
    except Exception:
        vmem_phys = 64 * 1024 * 1024
    if vmem_phys >= 100 * 1024 * 1024:      # v5e / v6e (128 MiB physical VMEM)
        return dict(vmem_limit=96 * 1024 * 1024, tm_cap=512, tn_cap=1024,
                    tk_cap=1024, tq_cap=512, tkv_cap=512)
    # v7x (64 MiB per TensorCore) or unknown: stay conservative
    return dict(vmem_limit=44 * 1024 * 1024, tm_cap=256, tn_cap=512,
                tk_cap=512, tq_cap=256, tkv_cap=512)


def _pick_tile(dim, cap, mult):
    """Largest tile <= cap dividing `dim`; prefers 2*mult (256-wide MXU) alignment,
    then mult; falls back to the full dim (always a legal block size).
    TODO(synk): pad awkward dims to a tile multiple instead of the full-dim fallback."""
    if dim <= cap:
        return dim
    for m in (2 * mult, mult):
        t = (cap // m) * m
        while t >= m:
            if dim % t == 0:
                return t
            t -= m
    return dim


# ---------------------------------------------------------------------------
# Tiled GEMM kernel with fused epilogues (bias / GELU / y-combine / add+LayerNorm)
# ---------------------------------------------------------------------------
def _matmul_kernel(x_ref, w_ref, b_ref, *rest, epilogue):
    *extra, o_ref, acc_ref = rest
    k_idx = pl.program_id(2)

    @pl.when(k_idx == 0)
    def _():
        acc_ref[...] = jnp.zeros_like(acc_ref)

    # MXU matmul; activations are cast to the (possibly bf16) weight dtype.
    acc_ref[...] += jnp.dot(x_ref[...].astype(w_ref.dtype), w_ref[...],
                            preferred_element_type=jnp.float32)

    @pl.when(k_idx == pl.num_programs(2) - 1)
    def _():
        y = acc_ref[...] + b_ref[...].astype(jnp.float32)
        if epilogue == "gelu":
            y = _gelu_exact(y)
        elif epilogue == "combine":
            # fused rank-1 y-encoder: src = x_emb + mask*(y*yenc_w + yenc_b)
            # (my = mask*y precomputed; mask multiplies the y-encoder bias)
            my_ref, mk_ref, yw_ref, yb_ref = extra
            y = (y + my_ref[...].astype(jnp.float32) * yw_ref[...]
                   + mk_ref[...].astype(jnp.float32) * yb_ref[...])
        elif epilogue == "add_ln":
            # residual add + LayerNorm (eps matches torch default 1e-5)
            res_ref, g_ref, bt_ref = extra
            y = res_ref[...].astype(jnp.float32) + y
            mu = jnp.mean(y, axis=-1, keepdims=True)
            var = jnp.mean(jnp.square(y - mu), axis=-1, keepdims=True)
            y = (y - mu) * jax.lax.rsqrt(var + 1e-5)
            y = y * g_ref[...] + bt_ref[...]
        o_ref[...] = y.astype(o_ref.dtype)


def linear(x, w, b, *, epilogue=None, extras=(), out_dtype=jnp.float32):
    """y = epilogue(x @ w + b); x:(M,K), w:(K,N) pre-transposed / pre-cast, b:(N,) f32."""
    M, K = x.shape
    Kw, N = w.shape
    assert K == Kw
    caps = _device_caps()

    tm = _pick_tile(M, caps["tm_cap"], 8)
    # "add_ln" needs the full output row resident to compute LayerNorm stats.
    tn = N if epilogue == "add_ln" else _pick_tile(N, caps["tn_cap"], 128)
    tk = _pick_tile(K, caps["tk_cap"], 128)
    grid = (M // tm, N // tn, K // tk)

    in_specs = [
        pl.BlockSpec((tm, tk), lambda i, j, k: (i, k)),
        pl.BlockSpec((tk, tn), lambda i, j, k: (k, j)),
        pl.BlockSpec((1, tn), lambda i, j, k: (0, j)),
    ]
    extra_args = []
    if epilogue == "combine":
        my, mask, yw_row, yb_row = extras
        in_specs += [pl.BlockSpec((tm, 1), lambda i, j, k: (i, 0)),
                     pl.BlockSpec((tm, 1), lambda i, j, k: (i, 0)),
                     pl.BlockSpec((1, tn), lambda i, j, k: (0, j)),
                     pl.BlockSpec((1, tn), lambda i, j, k: (0, j))]
        extra_args = [my, mask, yw_row, yb_row]
    elif epilogue == "add_ln":
        res, gamma, beta = extras
        in_specs += [pl.BlockSpec((tm, tn), lambda i, j, k: (i, j)),
                     pl.BlockSpec((1, tn), lambda i, j, k: (0, j)),
                     pl.BlockSpec((1, tn), lambda i, j, k: (0, j))]
        extra_args = [res, gamma.reshape(1, N), beta.reshape(1, N)]

    flops = 2 * M * K * N
    transcendentals = M * N if epilogue == "gelu" else 0
    bytes_accessed = int(
        M * K * x.dtype.itemsize + K * N * w.dtype.itemsize
        + M * N * jnp.dtype(out_dtype).itemsize
        + sum(int(a.size) * a.dtype.itemsize for a in extra_args))

    return pl.pallas_call(
        functools.partial(_matmul_kernel, epilogue=epilogue),
        out_shape=jax.ShapeDtypeStruct((M, N), out_dtype),
        grid=grid,
        in_specs=in_specs,
        out_specs=pl.BlockSpec((tm, tn), lambda i, j, k: (i, j)),
        scratch_shapes=[pltpu.VMEM((tm, tn), jnp.float32)],
        compiler_params=pltpu.CompilerParams(
            dimension_semantics=("parallel", "parallel", "arbitrary"),
            vmem_limit_bytes=caps["vmem_limit"]),
        cost_estimate=pl.CostEstimate(flops=flops,
                                      transcendentals=transcendentals,
                                      bytes_accessed=bytes_accessed),
    )(x, w, b.reshape(1, N), *extra_args)


# ---------------------------------------------------------------------------
# Multi-head self-attention: per-batch lane-dense (S, E) blocks, flash-style
# online softmax over KV tiles, D_q mask generated in-kernel.
# ---------------------------------------------------------------------------
def _attn_kernel(q_ref, k_ref, v_ref, o_ref, m_ref, l_ref, acc_ref,
                 *, nhead, sep, tq, tkv, compute_dtype):
    qi = pl.program_id(1)
    ki = pl.program_id(2)
    E = o_ref.shape[-1]
    hd = E // nhead

    @pl.when(ki == 0)
    def _():
        # finite "minus infinity" so fully-masked KV tiles never create NaNs
        m_ref[...] = jnp.full_like(m_ref, -1e30)
        l_ref[...] = jnp.zeros_like(l_ref)
        acc_ref[...] = jnp.zeros_like(acc_ref)

    # D_q mask from global row/col indices (no (S,S) HBM mask DMA):
    # key allowed iff it is a train position (col < sep) or the query itself.
    rows = qi * tq + jax.lax.broadcasted_iota(jnp.int32, (tq, tkv), 0)
    cols = ki * tkv + jax.lax.broadcasted_iota(jnp.int32, (tq, tkv), 1)
    allowed = (cols < sep) | (cols == rows)

    q = q_ref[...]          # 1/sqrt(hd) already folded into the q-projection weights
    k = k_ref[...]
    v = v_ref[...]
    acc_prev = acc_ref[...]

    acc_new = []
    for h in range(nhead):
        sl = slice(h * hd, (h + 1) * hd)
        s = jax.lax.dot_general(q[:, sl].astype(compute_dtype),
                                k[:, sl].astype(compute_dtype),
                                (((1,), (1,)), ((), ())),
                                preferred_element_type=jnp.float32)
        s = jnp.where(allowed, s, -jnp.inf)
        m_prev = m_ref[h]
        m_new = jnp.maximum(m_prev, jnp.max(s, axis=-1, keepdims=True))
        alpha = jnp.exp(m_prev - m_new)
        p = jnp.exp(s - m_new)
        l_ref[h] = alpha * l_ref[h] + jnp.sum(p, axis=-1, keepdims=True)
        pv = jnp.dot(p.astype(compute_dtype), v[:, sl].astype(compute_dtype),
                     preferred_element_type=jnp.float32)
        acc_new.append(alpha * acc_prev[:, sl] + pv)
        m_ref[h] = m_new
    # single lane-dense (tq, E) store instead of per-head partial-lane writes
    acc_ref[...] = jnp.concatenate(acc_new, axis=-1)

    @pl.when(ki == pl.num_programs(2) - 1)
    def _():
        inv = [jnp.broadcast_to(pl.reciprocal(l_ref[h], approx=True), (tq, hd))
               for h in range(nhead)]                          # EUP slot, ~free
        o_ref[...] = (acc_ref[...] * jnp.concatenate(inv, axis=-1)).astype(o_ref.dtype)


def attention(qkv, *, ninp, nbatch, seqlen, nhead, sep, out_dtype):
    """qkv: (nbatch*seqlen, 3*ninp) batch-major packed q|k|v projection output."""
    M, three_e = qkv.shape
    E = ninp
    assert three_e == 3 * E and M == nbatch * seqlen and E % nhead == 0
    S = seqlen
    # TODO(synk): pad ragged sequence lengths; kernel assumes S % 8 == 0.
    assert S % 8 == 0
    caps = _device_caps()

    tq = _pick_tile(S, caps["tq_cap"], 8)
    tkv = _pick_tile(S, caps["tkv_cap"], 128)
    nq = S // tq
    nkv = S // tkv
    grid = (nbatch, nq, nkv)

    kernel = functools.partial(_attn_kernel, nhead=nhead, sep=sep, tq=tq, tkv=tkv,
                               compute_dtype=qkv.dtype)

    if E % 128 == 0:
        # packed path: q/k/v read straight from the fused projection output via
        # column-offset BlockSpecs (no extra HBM slice copies)
        in_specs = [pl.BlockSpec((tq, E), lambda b, qi, ki: (b * nq + qi, 0)),
                    pl.BlockSpec((tkv, E), lambda b, qi, ki: (b * nkv + ki, 1)),
                    pl.BlockSpec((tkv, E), lambda b, qi, ki: (b * nkv + ki, 2))]
        args = (qkv, qkv, qkv)
    else:
        # lane-unaligned E: fall back to cheap last-dim slices in JAX
        q, k, v = qkv[:, :E], qkv[:, E:2 * E], qkv[:, 2 * E:]
        in_specs = [pl.BlockSpec((tq, E), lambda b, qi, ki: (b * nq + qi, 0)),
                    pl.BlockSpec((tkv, E), lambda b, qi, ki: (b * nkv + ki, 0)),
                    pl.BlockSpec((tkv, E), lambda b, qi, ki: (b * nkv + ki, 0))]
        args = (q, k, v)

    return pl.pallas_call(
        kernel,
        out_shape=jax.ShapeDtypeStruct((M, E), out_dtype),
        grid=grid,
        in_specs=in_specs,
        out_specs=pl.BlockSpec((tq, E), lambda b, qi, ki: (b * nq + qi, 0)),
        scratch_shapes=[
            pltpu.VMEM((nhead, tq, 1), jnp.float32),  # running max per head
            pltpu.VMEM((nhead, tq, 1), jnp.float32),  # running denom per head
            pltpu.VMEM((tq, E), jnp.float32),         # unnormalized output acc
        ],
        compiler_params=pltpu.CompilerParams(
            dimension_semantics=("parallel", "parallel", "arbitrary"),
            vmem_limit_bytes=caps["vmem_limit"]),
    )(*args)


# ---------------------------------------------------------------------------
# Model (JAX glue orchestrating the kernels)
# ---------------------------------------------------------------------------
def generate_D_q_matrix(sz, query_size):
    train_size = sz - query_size
    allowed = jnp.ones((sz, sz), dtype=bool)
    allowed = allowed.at[:, train_size:].set(False)
    allowed = allowed | jnp.eye(sz, dtype=bool)
    return jnp.where(allowed, 0.0, -jnp.inf).astype(jnp.float32)


def transformer_encoder_layer(src, lp, nbatch, seqlen, sep, nhead, act_dtype):
    E = src.shape[-1]
    # fused QKV projection: src read once, one launch, N = 3E tile
    qkv = linear(src, lp["qkv_w"], lp["qkv_b"], out_dtype=act_dtype)
    attn = attention(qkv, ninp=E, nbatch=nbatch, seqlen=seqlen, nhead=nhead,
                     sep=sep, out_dtype=act_dtype)
    # out_proj GEMM with fused residual-add + LayerNorm epilogue
    src = linear(attn, lp["out_w"], lp["out_b"], epilogue="add_ln",
                 extras=(src, lp["ln1_w"], lp["ln1_b"]), out_dtype=act_dtype)
    # FFN: linear1 + GELU fused; linear2 with fused residual-add + LayerNorm
    h = linear(src, lp["lin1_w"], lp["lin1_b"], epilogue="gelu", out_dtype=act_dtype)
    src = linear(h, lp["lin2_w"], lp["lin2_b"], epilogue="add_ln",
                 extras=(src, lp["ln2_w"], lp["ln2_b"]), out_dtype=act_dtype)
    return src


def single_forward(x2d, my, train_mask, prep, nbatch, seqlen, sep, n_out, nhead):
    act_dtype = prep["enc_w"].dtype
    # x-encoder GEMM with the rank-1 y-encoder + train/eval combine fused as epilogue
    src = linear(x2d, prep["enc_w"], prep["enc_b"], epilogue="combine",
                 extras=(my, train_mask, prep["yenc_w_row"], prep["yenc_b_row"]),
                 out_dtype=act_dtype)
    for lp in prep["layers"]:
        src = transformer_encoder_layer(src, lp, nbatch, seqlen, sep, nhead, act_dtype)
    E = src.shape[-1]
    n_eval = seqlen - sep
    # TODO(synk): drive the decoder GEMM's x BlockSpec with a per-batch row offset
    # (scalar-prefetch index_map) instead of materializing this eval-position slice.
    src_eval = src.reshape(nbatch, seqlen, E)[:, sep:, :].reshape(nbatch * n_eval, E)
    h = linear(src_eval, prep["dec_w1"], prep["dec_b1"], epilogue="gelu",
               out_dtype=act_dtype)
    out = linear(h, prep["dec_w2"], prep["dec_b2"], out_dtype=jnp.float32)
    return out[:, :n_out].reshape(nbatch, n_eval, n_out)


def model_forward(prep, x, y, aug_key, *, single_eval_pos, n_out, nhead):
    """x: (B, S, F) batch-first, y: (B, S).  Returns (out1, out2), each
    (B, S - single_eval_pos, n_out) — matches PyTorch forward's transpose(0,1)."""
    B, S, F = x.shape
    # data_augment=True branch: deterministic stand-in for torch.rand displacement
    displacement = (jax.random.uniform(aug_key, (B, S, F), jnp.float32) - 0.5) / 2.0
    # run both augmented passes as one batched forward (B -> 2B): weights read once
    xb = jnp.concatenate([x, x + displacement], axis=0)
    yb = jnp.concatenate([y, y], axis=0)
    Bt = 2 * B
    x2d = xb.reshape(Bt * S, F)
    y2d = yb.reshape(Bt * S, 1)
    train_mask = (jnp.arange(S) < single_eval_pos).astype(jnp.float32)
    train_mask = jnp.tile(train_mask, (Bt,)).reshape(Bt * S, 1)
    my = train_mask * y2d
    out = single_forward(x2d, my, train_mask, prep, Bt, S, single_eval_pos,
                         n_out, nhead)
    return out[:B], out[B:]


# ---------------------------------------------------------------------------
# Parameter init (PyTorch layout) + one-time kernel-friendly preparation
# ---------------------------------------------------------------------------
def init_params(key, num_features, ninp, nhead, nhid, nlayers, n_out):
    def lin_init(k, out_dim, in_dim):
        bound = 1.0 / math.sqrt(in_dim)
        kw, kb = jax.random.split(k)
        w = jax.random.uniform(kw, (out_dim, in_dim), jnp.float32, -bound, bound)
        b = jax.random.uniform(kb, (out_dim,), jnp.float32, -bound, bound)
        return w, b

    ks = jax.random.split(key, 4 + nlayers)
    params = {}
    params["enc_w"], params["enc_b"] = lin_init(ks[0], ninp, num_features)
    params["yenc_w"], params["yenc_b"] = lin_init(ks[1], ninp, 1)
    params["dec_w1"], params["dec_b1"] = lin_init(ks[2], nhid, ninp)
    params["dec_w2"], params["dec_b2"] = lin_init(ks[3], n_out, nhid)
    layers = []
    for l in range(nlayers):
        k0, k1 = jax.random.split(ks[4 + l])
        in_w, in_b = lin_init(k0, 3 * ninp, ninp)
        lin1_w, lin1_b = lin_init(k1, nhid, ninp)
        layers.append(dict(
            in_proj_w=in_w, in_proj_b=in_b,
            # init_weights(): out_proj and linear2 zeroed
            out_proj_w=jnp.zeros((ninp, ninp), jnp.float32),
            out_proj_b=jnp.zeros((ninp,), jnp.float32),
            lin1_w=lin1_w, lin1_b=lin1_b,
            lin2_w=jnp.zeros((ninp, nhid), jnp.float32),
            lin2_b=jnp.zeros((ninp,), jnp.float32),
            ln1_w=jnp.ones((ninp,), jnp.float32), ln1_b=jnp.zeros((ninp,), jnp.float32),
            ln2_w=jnp.ones((ninp,), jnp.float32), ln2_b=jnp.zeros((ninp,), jnp.float32),
        ))
    params["layers"] = layers
    return params


def prepare_params(params, *, nhead, compute_dtype=jnp.float32):
    """One-time weight prep: (out,in)->(K,N) transpose, optional bf16 cast, fused
    in_proj with 1/sqrt(hd) folded into q, lane-dense padded decoder output."""
    cd = compute_dtype
    E = params["enc_w"].shape[0]
    hd = E // nhead
    scale = 1.0 / math.sqrt(hd)

    prep = {
        "enc_w": params["enc_w"].T.astype(cd),
        "enc_b": params["enc_b"].astype(jnp.float32),
        "yenc_w_row": params["yenc_w"].reshape(1, E).astype(jnp.float32),
        "yenc_b_row": params["yenc_b"].reshape(1, E).astype(jnp.float32),
        "dec_w1": params["dec_w1"].T.astype(cd),
        "dec_b1": params["dec_b1"].astype(jnp.float32),
    }
    n_out, nhid = params["dec_w2"].shape
    n_pad = max(128, ((n_out + 127) // 128) * 128)   # lane-dense final GEMM output
    w2 = jnp.zeros((nhid, n_pad), jnp.float32).at[:, :n_out].set(params["dec_w2"].T)
    b2 = jnp.zeros((n_pad,), jnp.float32).at[:n_out].set(params["dec_b2"])
    prep["dec_w2"] = w2.astype(cd)
    prep["dec_b2"] = b2

    qscale = jnp.concatenate([jnp.full((E,), scale, jnp.float32),
                              jnp.ones((2 * E,), jnp.float32)])
    layers = []
    for lp in params["layers"]:
        layers.append(dict(
            qkv_w=(lp["in_proj_w"] * qscale[:, None]).T.astype(cd),   # (E, 3E)
            qkv_b=(lp["in_proj_b"] * qscale).astype(jnp.float32),
            out_w=lp["out_proj_w"].T.astype(cd),
            out_b=lp["out_proj_b"].astype(jnp.float32),
            lin1_w=lp["lin1_w"].T.astype(cd), lin1_b=lp["lin1_b"].astype(jnp.float32),
            lin2_w=lp["lin2_w"].T.astype(cd), lin2_b=lp["lin2_b"].astype(jnp.float32),
            ln1_w=lp["ln1_w"].astype(jnp.float32), ln1_b=lp["ln1_b"].astype(jnp.float32),
            ln2_w=lp["ln2_w"].astype(jnp.float32), ln2_b=lp["ln2_b"].astype(jnp.float32),
        ))
    prep["layers"] = layers
    return prep


# ---------------------------------------------------------------------------
# Pure-JAX reference (same math, no Pallas) for sanity checks
# ---------------------------------------------------------------------------
def _ref_single(x_src, y_src, mask, params, sep, n_out, H):
    def lin(x, w, b):
        return x @ w.T + b

    S, B, _ = x_src.shape
    xe = lin(x_src, params["enc_w"], params["enc_b"])
    ye = lin(y_src, params["yenc_w"], params["yenc_b"])
    src = jnp.concatenate([xe[:sep] + ye[:sep], xe[sep:]], axis=0)
    E = src.shape[-1]
    hd = E // H

    def ln(x, g, bta):
        mu = x.mean(-1, keepdims=True)
        var = ((x - mu) ** 2).mean(-1, keepdims=True)
        return (x - mu) / jnp.sqrt(var + 1e-5) * g + bta

    for p in params["layers"]:
        qkv = lin(src, p["in_proj_w"], p["in_proj_b"])
        q, k, v = jnp.split(qkv, 3, axis=-1)
        heads = lambda t: jnp.transpose(t.reshape(S, B, H, hd), (1, 2, 0, 3))
        q, k, v = heads(q), heads(k), heads(v)
        s = jnp.einsum("bhsd,bhtd->bhst", q, k) / math.sqrt(hd) + mask
        a = jax.nn.softmax(s, axis=-1)
        o = jnp.einsum("bhst,bhtd->bhsd", a, v)
        o = jnp.transpose(o, (2, 0, 1, 3)).reshape(S, B, E)
        src = ln(src + lin(o, p["out_proj_w"], p["out_proj_b"]), p["ln1_w"], p["ln1_b"])
        f = lin(_gelu_exact(lin(src, p["lin1_w"], p["lin1_b"])),
                p["lin2_w"], p["lin2_b"])
        src = ln(src + f, p["ln2_w"], p["ln2_b"])
    h = _gelu_exact(lin(src, params["dec_w1"], params["dec_b1"]))
    out = lin(h, params["dec_w2"], params["dec_b2"])
    return out[sep:]


if __name__ == "__main__":
    B, S, F = 2, 16, 4
    ninp, nhead, nhid, nlayers, n_out = 32, 4, 64, 2, 3
    single_eval_pos = 8

    key = jax.random.PRNGKey(0)
    kx, ky, kp, ka, kr = jax.random.split(key, 5)
    x = jax.random.normal(kx, (B, S, F), jnp.float32)
    y = jax.random.normal(ky, (B, S), jnp.float32)
    params = init_params(kp, F, ninp, nhead, nhid, nlayers, n_out)

    fwd = jax.jit(functools.partial(model_forward, single_eval_pos=single_eval_pos,
                                    n_out=n_out, nhead=nhead))

    prep_f32 = prepare_params(params, nhead=nhead, compute_dtype=jnp.float32)
    out1, out2 = fwd(prep_f32, x, y, ka)
    jax.block_until_ready((out1, out2))
    assert out1.shape == (B, S - single_eval_pos, n_out)
    assert out2.shape == (B, S - single_eval_pos, n_out)

    # --- pure-JAX reference check (module weights: out_proj / linear2 zeroed) ---
    x_src = jnp.transpose(x, (1, 0, 2))
    y_src = jnp.transpose(y, (1, 0))[..., None]
    mask = generate_D_q_matrix(S, S - single_eval_pos)
    displacement = (jax.random.uniform(ka, (B, S, F), jnp.float32) - 0.5) / 2.0
    x_src2 = jnp.transpose(x + displacement, (1, 0, 2))
    ref1 = jnp.transpose(_ref_single(x_src, y_src, mask, params,
                                     single_eval_pos, n_out, nhead), (1, 0, 2))
    ref2 = jnp.transpose(_ref_single(x_src2, y_src, mask, params,
                                     single_eval_pos, n_out, nhead), (1, 0, 2))
    assert jnp.allclose(out1, ref1, rtol=1e-2, atol=1e-3), "out1 mismatch vs reference"
    assert jnp.allclose(out2, ref2, rtol=1e-2, atol=1e-3), "out2 mismatch vs reference"

    # --- randomized out_proj / linear2 so attention + FFN paths are exercised ---
    def _with_random_residual_weights(p, rk):
        new = dict(p)
        layers = []
        for lp in p["layers"]:
            rk, k1, k2 = jax.random.split(rk, 3)
            lp = dict(lp)
            lp["out_proj_w"] = 0.05 * jax.random.normal(k1, lp["out_proj_w"].shape,
                                                        jnp.float32)
            lp["lin2_w"] = 0.05 * jax.random.normal(k2, lp["lin2_w"].shape,
                                                    jnp.float32)
            layers.append(lp)
        new["layers"] = layers
        return new

    params_r = _with_random_residual_weights(params, kr)
    prep_r = prepare_params(params_r, nhead=nhead, compute_dtype=jnp.float32)
    out1_r, _ = fwd(prep_r, x, y, ka)
    ref1_r = jnp.transpose(_ref_single(x_src, y_src, mask, params_r,
                                       single_eval_pos, n_out, nhead), (1, 0, 2))
    assert jnp.allclose(out1_r, ref1_r, rtol=5e-2, atol=1e-2), \
        "mismatch vs reference (attention/FFN path)"

    # --- bf16 MXU path (v5e/v6e/v7x): bf16 weights + inter-kernel activations;
    #     LayerNorm / softmax statistics and accumulators stay f32 in-kernel ---
    prep_bf16 = prepare_params(params, nhead=nhead, compute_dtype=jnp.bfloat16)
    out1_bf, out2_bf = fwd(prep_bf16, x, y, ka)
    jax.block_until_ready((out1_bf, out2_bf))
    assert jnp.allclose(out1_bf, ref1, rtol=1e-1, atol=1e-1), "bf16 path diverged"

    print("KERNEL_OK")
</pallas_src>

<mosaic_0001>
module attributes {stable_mosaic.version = 11 : i64} {
  func.func @_attn_kernel(%arg0: i32, %arg1: i32, %arg2: i32, %arg3: memref<16x32xf32, #tpu.memory_space<vmem>>, %arg4: memref<16x32xf32, #tpu.memory_space<vmem>>, %arg5: memref<16x32xf32, #tpu.memory_space<vmem>>, %arg6: memref<16x32xf32, #tpu.memory_space<vmem>>, %arg7: memref<4x16x1xf32, #tpu.memory_space<vmem>>, %arg8: memref<4x16x1xf32, #tpu.memory_space<vmem>>, %arg9: memref<16x32xf32, #tpu.memory_space<vmem>>) attributes {dimension_semantics = [#tpu.dimension_semantics<parallel>, #tpu.dimension_semantics<parallel>, #tpu.dimension_semantics<arbitrary>], iteration_bounds = array<i64: 4, 1, 1>, scalar_prefetch = 0 : i64, scratch_operands = 3 : i64, tpu.core_type = #tpu.core_type<tc>, window_params = [{transform_indices = @transform_0, window_bounds = array<i64: 16, 32>}, {transform_indices = @transform_1, window_bounds = array<i64: 16, 32>}, {transform_indices = @transform_2, window_bounds = array<i64: 16, 32>}, {transform_indices = @transform_3, window_bounds = array<i64: 16, 32>}]} {
    %c0_i32 = arith.constant 0 : i32
    %0 = arith.cmpi eq, %arg2, %c0_i32 : i32
    %1 = arith.extui %0 : i1 to i32
    %c0_i32_0 = arith.constant 0 : i32
    %2 = arith.cmpi ne, %1, %c0_i32_0 : i32
    scf.if %2 {
      %cst_77 = arith.constant -1.000000e+30 : f32
      %156 = vector.broadcast %cst_77 : f32 to vector<4x16x1xf32>
      %c0_78 = arith.constant 0 : index
      %c0_79 = arith.constant 0 : index
      %c0_80 = arith.constant 0 : index
      %157 = vector.load %arg7[%c0_78, %c0_79, %c0_80] : memref<4x16x1xf32, #tpu.memory_space<vmem>>, vector<4x16x1xf32>
      tpu.vector_store %arg7[%c0_78, %c0_79, %c0_80], %156 {strides = array<i32>} : memref<4x16x1xf32, #tpu.memory_space<vmem>>, vector<4x16x1xf32>,
      %cst_81 = arith.constant 0.000000e+00 : f32
      %158 = vector.broadcast %cst_81 : f32 to vector<4x16x1xf32>
      %c0_82 = arith.constant 0 : index
      %c0_83 = arith.constant 0 : index
      %c0_84 = arith.constant 0 : index
      %159 = vector.load %arg8[%c0_82, %c0_83, %c0_84] : memref<4x16x1xf32, #tpu.memory_space<vmem>>, vector<4x16x1xf32>
      tpu.vector_store %arg8[%c0_82, %c0_83, %c0_84], %158 {strides = array<i32>} : memref<4x16x1xf32, #tpu.memory_space<vmem>>, vector<4x16x1xf32>,
      %cst_85 = arith.constant 0.000000e+00 : f32
      %160 = vector.broadcast %cst_85 : f32 to vector<16x32xf32>
      %c0_86 = arith.constant 0 : index
      %c0_87 = arith.constant 0 : index
      %161 = vector.load %arg9[%c0_86, %c0_87] : memref<16x32xf32, #tpu.memory_space<vmem>>, vector<16x32xf32>
      tpu.vector_store %arg9[%c0_86, %c0_87], %160 {strides = array<i32>} : memref<16x32xf32, #tpu.memory_space<vmem>>, vector<16x32xf32>,
    } else {
    }
    %c16_i32 = arith.constant 16 : i32
    %3 = arith.muli %arg1, %c16_i32 : i32
    %4 = tpu.iota {dimensions = array<i32: 0>} : vector<16x16xi32>
    %5 = vector.broadcast %3 : i32 to vector<16x16xi32>
    %6 = arith.addi %5, %4 : vector<16x16xi32>
    %c16_i32_1 = arith.constant 16 : i32
    %7 = arith.muli %arg2, %c16_i32_1 : i32
    %8 = tpu.iota {dimensions = array<i32: 1>} : vector<16x16xi32>
    %9 = vector.broadcast %7 : i32 to vector<16x16xi32>
    %10 = arith.addi %9, %8 : vector<16x16xi32>
    %c8_i32 = arith.constant 8 : i32
    %11 = vector.broadcast %c8_i32 : i32 to vector<16x16xi32>
    %12 = arith.cmpi slt, %10, %11 : vector<16x16xi32>
    %13 = arith.cmpi eq, %10, %6 : vector<16x16xi32>
    %14 = arith.ori %12, %13 : vector<16x16xi1>
    %c0 = arith.constant 0 : index
    %c0_2 = arith.constant 0 : index
    %15 = vector.load %arg3[%c0, %c0_2] : memref<16x32xf32, #tpu.memory_space<vmem>>, vector<16x32xf32>
    %c0_3 = arith.constant 0 : index
    %c0_4 = arith.constant 0 : index
    %16 = vector.load %arg4[%c0_3, %c0_4] : memref<16x32xf32, #tpu.memory_space<vmem>>, vector<16x32xf32>
    %c0_5 = arith.constant 0 : index
    %c0_6 = arith.constant 0 : index
    %17 = vector.load %arg5[%c0_5, %c0_6] : memref<16x32xf32, #tpu.memory_space<vmem>>, vector<16x32xf32>
    %c0_7 = arith.constant 0 : index
    %c0_8 = arith.constant 0 : index
    %18 = vector.load %arg9[%c0_7, %c0_8] : memref<16x32xf32, #tpu.memory_space<vmem>>, vector<16x32xf32>
    %19 = vector.extract_strided_slice %15 {offsets = [0, 0], sizes = [16, 8], strides = [1, 1]} : vector<16x32xf32> to vector<16x8xf32>
    %20 = vector.extract_strided_slice %16 {offsets = [0, 0], sizes = [16, 8], strides = [1, 1]} : vector<16x32xf32> to vector<16x8xf32>
    %cst = arith.constant dense<0.000000e+00> : vector<16x16xf32>
    %21 = tpu.matmul %19, %20, %cst {dimension_numbers = #tpu.dot_dimension_numbers<[1], [1], [0], [0], [0, 0, 1, 0], [], []>} : vector<16x8xf32>, vector<16x8xf32>, vector<16x16xf32> -> vector<16x16xf32>
    %cst_9 = arith.constant 0xFF800000 : f32
    %22 = vector.broadcast %cst_9 : f32 to vector<16x16xf32>
    %23 = arith.select %14, %21, %22 : vector<16x16xi1>, vector<16x16xf32>
    %c0_10 = arith.constant 0 : index
    %c0_11 = arith.constant 0 : index
    %c0_12 = arith.constant 0 : index
    %24 = vector.load %arg7[%c0_10, %c0_11, %c0_12] : memref<4x16x1xf32, #tpu.memory_space<vmem>>, vector<1x16x1xf32>
    %25 = vector.shape_cast %24 : vector<1x16x1xf32> to vector<16x1xf32>
    %cst_13 = arith.constant dense<0xFF800000> : vector<16xf32>
    %26 = vector.multi_reduction <maximumf>, %23, %cst_13 [1] : vector<16x16xf32> to vector<16xf32>
    %27 = vector.shape_cast %26 : vector<16xf32> to vector<16x1xf32>
    %28 = arith.maximumf %25, %27 : vector<16x1xf32>
    %29 = arith.subf %25, %28 : vector<16x1xf32>
    %30 = math.exp %29 : vector<16x1xf32>
    %31 = vector.broadcast %28 : vector<16x1xf32> to vector<16x16xf32>
    %32 = arith.subf %23, %31 : vector<16x16xf32>
    %33 = math.exp %32 : vector<16x16xf32>
    %c0_14 = arith.constant 0 : index
    %c0_15 = arith.constant 0 : index
    %c0_16 = arith.constant 0 : index
    %34 = vector.load %arg8[%c0_14, %c0_15, %c0_16] : memref<4x16x1xf32, #tpu.memory_space<vmem>>, vector<1x16x1xf32>
    %35 = vector.shape_cast %34 : vector<1x16x1xf32> to vector<16x1xf32>
    %36 = arith.mulf %30, %35 : vector<16x1xf32>
    %cst_17 = arith.constant dense<0.000000e+00> : vector<16xf32>
    %37 = vector.multi_reduction <add>, %33, %cst_17 [1] : vector<16x16xf32> to vector<16xf32>
    %38 = vector.shape_cast %37 : vector<16xf32> to vector<16x1xf32>
    %39 = arith.addf %36, %38 : vector<16x1xf32>
    %c0_18 = arith.constant 0 : index
    %c0_19 = arith.constant 0 : index
    %c0_20 = arith.constant 0 : index
    %40 = vector.load %arg8[%c0_18, %c0_19, %c0_20] : memref<4x16x1xf32, #tpu.memory_space<vmem>>, vector<1x16x1xf32>
    %41 = vector.shape_cast %40 : vector<1x16x1xf32> to vector<16x1xf32>
    %42 = vector.shape_cast %39 : vector<16x1xf32> to vector<1x16x1xf32>
    tpu.vector_store %arg8[%c0_18, %c0_19, %c0_20], %42 {strides = array<i32>} : memref<4x16x1xf32, #tpu.memory_space<vmem>>, vector<1x16x1xf32>,
    %43 = vector.extract_strided_slice %17 {offsets = [0, 0], sizes = [16, 8], strides = [1, 1]} : vector<16x32xf32> to vector<16x8xf32>
    %cst_21 = arith.constant dense<0.000000e+00> : vector<16x8xf32>
    %44 = tpu.matmul %33, %43, %cst_21 {dimension_numbers = #tpu.dot_dimension_numbers<[1], [0], [0], [1], [0, 0, 1, 1], [], []>} : vector<16x16xf32>, vector<16x8xf32>, vector<16x8xf32> -> vector<16x8xf32>
    %45 = vector.extract_strided_slice %18 {offsets = [0, 0], sizes = [16, 8], strides = [1, 1]} : vector<16x32xf32> to vector<16x8xf32>
    %46 = vector.broadcast %30 : vector<16x1xf32> to vector<16x8xf32>
    %47 = arith.mulf %46, %45 : vector<16x8xf32>
    %48 = arith.addf %47, %44 : vector<16x8xf32>
    %c0_22 = arith.constant 0 : index
    %c0_23 = arith.constant 0 : index
    %c0_24 = arith.constant 0 : index
    %49 = vector.load %arg7[%c0_22, %c0_23, %c0_24] : memref<4x16x1xf32, #tpu.memory_space<vmem>>, vector<1x16x1xf32>
    %50 = vector.shape_cast %49 : vector<1x16x1xf32> to vector<16x1xf32>
    %51 = vector.shape_cast %28 : vector<16x1xf32> to vector<1x16x1xf32>
    tpu.vector_store %arg7[%c0_22, %c0_23, %c0_24], %51 {strides = array<i32>} : memref<4x16x1xf32, #tpu.memory_space<vmem>>, vector<1x16x1xf32>,
    %52 = vector.extract_strided_slice %15 {offsets = [0, 8], sizes = [16, 8], strides = [1, 1]} : vector<16x32xf32> to vector<16x8xf32>
    %53 = vector.extract_strided_slice %16 {offsets = [0, 8], sizes = [16, 8], strides = [1, 1]} : vector<16x32xf32> to vector<16x8xf32>
    %cst_25 = arith.constant dense<0.000000e+00> : vector<16x16xf32>
    %54 = tpu.matmul %52, %53, %cst_25 {dimension_numbers = #tpu.dot_dimension_numbers<[1], [1], [0], [0], [0, 0, 1, 0], [], []>} : vector<16x8xf32>, vector<16x8xf32>, vector<16x16xf32> -> vector<16x16xf32>
    %cst_26 = arith.constant 0xFF800000 : f32
    %55 = vector.broadcast %cst_26 : f32 to vector<16x16xf32>
    %56 = arith.select %14, %54, %55 : vector<16x16xi1>, vector<16x16xf32>
    %c1 = arith.constant 1 : index
    %c0_27 = arith.constant 0 : index
    %c0_28 = arith.constant 0 : index
    %57 = vector.load %arg7[%c1, %c0_27, %c0_28] : memref<4x16x1xf32, #tpu.memory_space<vmem>>, vector<1x16x1xf32>
    %58 = vector.shape_cast %57 : vector<1x16x1xf32> to vector<16x1xf32>
    %cst_29 = arith.constant dense<0xFF800000> : vector<16xf32>
    %59 = vector.multi_reduction <maximumf>, %56, %cst_29 [1] : vector<16x16xf32> to vector<16xf32>
    %60 = vector.shape_cast %59 : vector<16xf32> to vector<16x1xf32>
    %61 = arith.maximumf %58, %60 : vector<16x1xf32>
    %62 = arith.subf %58, %61 : vector<16x1xf32>
    %63 = math.exp %62 : vector<16x1xf32>
    %64 = vector.broadcast %61 : vector<16x1xf32> to vector<16x16xf32>
    %65 = arith.subf %56, %64 : vector<16x16xf32>
    %66 = math.exp %65 : vector<16x16xf32>
    %c1_30 = arith.constant 1 : index
    %c0_31 = arith.constant 0 : index
    %c0_32 = arith.constant 0 : index
    %67 = vector.load %arg8[%c1_30, %c0_31, %c0_32] : memref<4x16x1xf32, #tpu.memory_space<vmem>>, vector<1x16x1xf32>
    %68 = vector.shape_cast %67 : vector<1x16x1xf32> to vector<16x1xf32>
    %69 = arith.mulf %63, %68 : vector<16x1xf32>
    %cst_33 = arith.constant dense<0.000000e+00> : vector<16xf32>
    %70 = vector.multi_reduction <add>, %66, %cst_33 [1] : vector<16x16xf32> to vector<16xf32>
    %71 = vector.shape_cast %70 : vector<16xf32> to vector<16x1xf32>
    %72 = arith.addf %69, %71 : vector<16x1xf32>
    %c1_34 = arith.constant 1 : index
    %c0_35 = arith.constant 0 : index
    %c0_36 = arith.constant 0 : index
    %73 = vector.load %arg8[%c1_34, %c0_35, %c0_36] : memref<4x16x1xf32, #tpu.memory_space<vmem>>, vector<1x16x1xf32>
    %74 = vector.shape_cast %73 : vector<1x16x1xf32> to vector<16x1xf32>
    %75 = vector.shape_cast %72 : vector<16x1xf32> to vector<1x16x1xf32>
    tpu.vector_store %arg8[%c1_34, %c0_35, %c0_36], %75 {strides = array<i32>} : memref<4x16x1xf32, #tpu.memory_space<vmem>>, vector<1x16x1xf32>,
    %76 = vector.extract_strided_slice %17 {offsets = [0, 8], sizes = [16, 8], strides = [1, 1]} : vector<16x32xf32> to vector<16x8xf32>
    %cst_37 = arith.constant dense<0.000000e+00> : vector<16x8xf32>
    %77 = tpu.matmul %66, %76, %cst_37 {dimension_numbers = #tpu.dot_dimension_numbers<[1], [0], [0], [1], [0, 0, 1, 1], [], []>} : vector<16x16xf32>, vector<16x8xf32>, vector<16x8xf32> -> vector<16x8xf32>
    %78 = vector.extract_strided_slice %18 {offsets = [0, 8], sizes = [16, 8], strides = [1, 1]} : vector<16x32xf32> to vector<16x8xf32>
    %79 = vector.broadcast %63 : vector<16x1xf32> to vector<16x8xf32>
    %80 = arith.mulf %79, %78 : vector<16x8xf32>
    %81 = arith.addf %80, %77 : vector<16x8xf32>
    %c1_38 = arith.constant 1 : index
    %c0_39 = arith.constant 0 : index
    %c0_40 = arith.constant 0 : index
    %82 = vector.load %arg7[%c1_38, %c0_39, %c0_40] : memref<4x16x1xf32, #tpu.memory_space<vmem>>, vector<1x16x1xf32>
    %83 = vector.shape_cast %82 : vector<1x16x1xf32> to vector<16x1xf32>
    %84 = vector.shape_cast %61 : vector<16x1xf32> to vector<1x16x1xf32>
    tpu.vector_store %arg7[%c1_38, %c0_39, %c0_40], %84 {strides = array<i32>} : memref<4x16x1xf32, #tpu.memory_space<vmem>>, vector<1x16x1xf32>,
    %85 = vector.extract_strided_slice %15 {offsets = [0, 16], sizes = [16, 8], strides = [1, 1]} : vector<16x32xf32> to vector<16x8xf32>
    %86 = vector.extract_strided_slice %16 {offsets = [0, 16], sizes = [16, 8], strides = [1, 1]} : vector<16x32xf32> to vector<16x8xf32>
    %cst_41 = arith.constant dense<0.000000e+00> : vector<16x16xf32>
    %87 = tpu.matmul %85, %86, %cst_41 {dimension_numbers = #tpu.dot_dimension_numbers<[1], [1], [0], [0], [0, 0, 1, 0], [], []>} : vector<16x8xf32>, vector<16x8xf32>, vector<16x16xf32> -> vector<16x16xf32>
    %cst_42 = arith.constant 0xFF800000 : f32
    %88 = vector.broadcast %cst_42 : f32 to vector<16x16xf32>
    %89 = arith.select %14, %87, %88 : vector<16x16xi1>, vector<16x16xf32>
    %c2 = arith.constant 2 : index
    %c0_43 = arith.constant 0 : index
    %c0_44 = arith.constant 0 : index
    %90 = vector.load %arg7[%c2, %c0_43, %c0_44] : memref<4x16x1xf32, #tpu.memory_space<vmem>>, vector<1x16x1xf32>
    %91 = vector.shape_cast %90 : vector<1x16x1xf32> to vector<16x1xf32>
    %cst_45 = arith.constant dense<0xFF800000> : vector<16xf32>
    %92 = vector.multi_reduction <maximumf>, %89, %cst_45 [1] : vector<16x16xf32> to vector<16xf32>
    %93 = vector.shape_cast %92 : vector<16xf32> to vector<16x1xf32>
    %94 = arith.maximumf %91, %93 : vector<16x1xf32>
    %95 = arith.subf %91, %94 : vector<16x1xf32>
    %96 = math.exp %95 : vector<16x1xf32>
    %97 = vector.broadcast %94 : vector<16x1xf32> to vector<16x16xf32>
    %98 = arith.subf %89, %97 : vector<16x16xf32>
    %99 = math.exp %98 : vector<16x16xf32>
    %c2_46 = arith.constant 2 : index
    %c0_47 = arith.constant 0 : index
    %c0_48 = arith.constant 0 : index
    %100 = vector.load %arg8[%c2_46, %c0_47, %c0_48] : memref<4x16x1xf32, #tpu.memory_space<vmem>>, vector<1x16x1xf32>
    %101 = vector.shape_cast %100 : vector<1x16x1xf32> to vector<16x1xf32>
    %102 = arith.mulf %96, %101 : vector<16x1xf32>
    %cst_49 = arith.constant dense<0.000000e+00> : vector<16xf32>
    %103 = vector.multi_reduction <add>, %99, %cst_49 [1] : vector<16x16xf32> to vector<16xf32>
    %104 = vector.shape_cast %103 : vector<16xf32> to vector<16x1xf32>
    %105 = arith.addf %102, %104 : vector<16x1xf32>
    %c2_50 = arith.constant 2 : index
    %c0_51 = arith.constant 0 : index
    %c0_52 = arith.constant 0 : index
    %106 = vector.load %arg8[%c2_50, %c0_51, %c0_52] : memref<4x16x1xf32, #tpu.memory_space<vmem>>, vector<1x16x1xf32>
    %107 = vector.shape_cast %106 : vector<1x16x1xf32> to vector<16x1xf32>
    %108 = vector.shape_cast %105 : vector<16x1xf32> to vector<1x16x1xf32>
    tpu.vector_store %arg8[%c2_50, %c0_51, %c0_52], %108 {strides = array<i32>} : memref<4x16x1xf32, #tpu.memory_space<vmem>>, vector<1x16x1xf32>,
    %109 = vector.extract_strided_slice %17 {offsets = [0, 16], sizes = [16, 8], strides = [1, 1]} : vector<16x32xf32> to vector<16x8xf32>
    %cst_53 = arith.constant dense<0.000000e+00> : vector<16x8xf32>
    %110 = tpu.matmul %99, %109, %cst_53 {dimension_numbers = #tpu.dot_dimension_numbers<[1], [0], [0], [1], [0, 0, 1, 1], [], []>} : vector<16x16xf32>, vector<16x8xf32>, vector<16x8xf32> -> vector<16x8xf32>
    %111 = vector.extract_strided_slice %18 {offsets = [0, 16], sizes = [16, 8], strides = [1, 1]} : vector<16x32xf32> to vector<16x8xf32>
    %112 = vector.broadcast %96 : vector<16x1xf32> to vector<16x8xf32>
    %113 = arith.mulf %112, %111 : vector<16x8xf32>
    %114 = arith.addf %113, %110 : vector<16x8xf32>
    %c2_54 = arith.constant 2 : index
    %c0_55 = arith.constant 0 : index
    %c0_56 = arith.constant 0 : index
    %115 = vector.load %arg7[%c2_54, %c0_55, %c0_56] : memref<4x16x1xf32, #tpu.memory_space<vmem>>, vector<1x16x1xf32>
    %116 = vector.shape_cast %115 : vector<1x16x1xf32> to vector<16x1xf32>
    %117 = vector.shape_cast %94 : vector<16x1xf32> to vector<1x16x1xf32>
    tpu.vector_store %arg7[%c2_54, %c0_55, %c0_56], %117 {strides = array<i32>} : memref<4x16x1xf32, #tpu.memory_space<vmem>>, vector<1x16x1xf32>,
    %118 = vector.extract_strided_slice %15 {offsets = [0, 24], sizes = [16, 8], strides = [1, 1]} : vector<16x32xf32> to vector<16x8xf32>
    %119 = vector.extract_strided_slice %16 {offsets = [0, 24], sizes = [16, 8], strides = [1, 1]} : vector<16x32xf32> to vector<16x8xf32>
    %cst_57 = arith.constant dense<0.000000e+00> : vector<16x16xf32>
    %120 = tpu.matmul %118, %119, %cst_57 {dimension_numbers = #tpu.dot_dimension_numbers<[1], [1], [0], [0], [0, 0, 1, 0], [], []>} : vector<16x8xf32>, vector<16x8xf32>, vector<16x16xf32> -> vector<16x16xf32>
    %cst_58 = arith.constant 0xFF800000 : f32
    %121 = vector.broadcast %cst_58 : f32 to vector<16x16xf32>
    %122 = arith.select %14, %120, %121 : vector<16x16xi1>, vector<16x16xf32>
    %c3 = arith.constant 3 : index
    %c0_59 = arith.constant 0 : index
    %c0_60 = arith.constant 0 : index
    %123 = vector.load %arg7[%c3, %c0_59, %c0_60] : memref<4x16x1xf32, #tpu.memory_space<vmem>>, vector<1x16x1xf32>
    %124 = vector.shape_cast %123 : vector<1x16x1xf32> to vector<16x1xf32>
    %cst_61 = arith.constant dense<0xFF800000> : vector<16xf32>
    %125 = vector.multi_reduction <maximumf>, %122, %cst_61 [1] : vector<16x16xf32> to vector<16xf32>
    %126 = vector.shape_cast %125 : vector<16xf32> to vector<16x1xf32>
    %127 = arith.maximumf %124, %126 : vector<16x1xf32>
    %128 = arith.subf %124, %127 : vector<16x1xf32>
    %129 = math.exp %128 : vector<16x1xf32>
    %130 = vector.broadcast %127 : vector<16x1xf32> to vector<16x16xf32>
    %131 = arith.subf %122, %130 : vector<16x16xf32>
    %132 = math.exp %131 : vector<16x16xf32>
    %c3_62 = arith.constant 3 : index
    %c0_63 = arith.constant 0 : index
    %c0_64 = arith.constant 0 : index
    %133 = vector.load %arg8[%c3_62, %c0_63, %c0_64] : memref<4x16x1xf32, #tpu.memory_space<vmem>>, vector<1x16x1xf32>
    %134 = vector.shape_cast %133 : vector<1x16x1xf32> to vector<16x1xf32>
    %135 = arith.mulf %129, %134 : vector<16x1xf32>
    %cst_65 = arith.constant dense<0.000000e+00> : vector<16xf32>
    %136 = vector.multi_reduction <add>, %132, %cst_65 [1] : vector<16x16xf32> to vector<16xf32>
    %137 = vector.shape_cast %136 : vector<16xf32> to vector<16x1xf32>
    %138 = arith.addf %135, %137 : vector<16x1xf32>
    %c3_66 = arith.constant 3 : index
    %c0_67 = arith.constant 0 : index
    %c0_68 = arith.constant 0 : index
    %139 = vector.load %arg8[%c3_66, %c0_67, %c0_68] : memref<4x16x1xf32, #tpu.memory_space<vmem>>, vector<1x16x1xf32>
    %140 = vector.shape_cast %139 : vector<1x16x1xf32> to vector<16x1xf32>
    %141 = vector.shape_cast %138 : vector<16x1xf32> to vector<1x16x1xf32>
    tpu.vector_store %arg8[%c3_66, %c0_67, %c0_68], %141 {strides = array<i32>} : memref<4x16x1xf32, #tpu.memory_space<vmem>>, vector<1x16x1xf32>,
    %142 = vector.extract_strided_slice %17 {offsets = [0, 24], sizes = [16, 8], strides = [1, 1]} : vector<16x32xf32> to vector<16x8xf32>
    %cst_69 = arith.constant dense<0.000000e+00> : vector<16x8xf32>
    %143 = tpu.matmul %132, %142, %cst_69 {dimension_numbers = #tpu.dot_dimension_numbers<[1], [0], [0], [1], [0, 0, 1, 1], [], []>} : vector<16x16xf32>, vector<16x8xf32>, vector<16x8xf32> -> vector<16x8xf32>
    %144 = vector.extract_strided_slice %18 {offsets = [0, 24], sizes = [16, 8], strides = [1, 1]} : vector<16x32xf32> to vector<16x8xf32>
    %145 = vector.broadcast %129 : vector<16x1xf32> to vector<16x8xf32>
    %146 = arith.mulf %145, %144 : vector<16x8xf32>
    %147 = arith.addf %146, %143 : vector<16x8xf32>
    %c3_70 = arith.constant 3 : index
    %c0_71 = arith.constant 0 : index
    %c0_72 = arith.constant 0 : index
    %148 = vector.load %arg7[%c3_70, %c0_71, %c0_72] : memref<4x16x1xf32, #tpu.memory_space<vmem>>, vector<1x16x1xf32>
    %149 = vector.shape_cast %148 : vector<1x16x1xf32> to vector<16x1xf32>
    %150 = vector.shape_cast %127 : vector<16x1xf32> to vector<1x16x1xf32>
    tpu.vector_store %arg7[%c3_70, %c0_71, %c0_72], %150 {strides = array<i32>} : memref<4x16x1xf32, #tpu.memory_space<vmem>>, vector<1x16x1xf32>,
    %151 = tpu.concatenate %48, %81, %114, %147 in 1 : vector<16x8xf32>, vector<16x8xf32>, vector<16x8xf32>, vector<16x8xf32> -> vector<16x32xf32>
    %c0_73 = arith.constant 0 : index
    %c0_74 = arith.constant 0 : index
    %152 = vector.load %arg9[%c0_73, %c0_74] : memref<16x32xf32, #tpu.memory_space<vmem>>, vector<16x32xf32>
    tpu.vector_store %arg9[%c0_73, %c0_74], %151 {strides = array<i32>} : memref<16x32xf32, #tpu.memory_space<vmem>>, vector<16x32xf32>,
    %c0_i32_75 = arith.constant 0 : i32
    %153 = arith.cmpi eq, %arg2, %c0_i32_75 : i32
    %154 = arith.extui %153 : i1 to i32
    %c0_i32_76 = arith.constant 0 : i32
    %155 = arith.cmpi ne, %154, %c0_i32_76 : i32
    scf.if %155 {
      %c0_77 = arith.constant 0 : index
      %c0_78 = arith.constant 0 : index
      %c0_79 = arith.constant 0 : index
      %156 = vector.load %arg8[%c0_77, %c0_78, %c0_79] : memref<4x16x1xf32, #tpu.memory_space<vmem>>, vector<1x16x1xf32>
      %157 = vector.shape_cast %156 : vector<1x16x1xf32> to vector<16x1xf32>
      %158 = tpu.reciprocal %157 {approx = true} : vector<16x1xf32> -> vector<16x1xf32>
      %159 = vector.shape_cast %158 : vector<16x1xf32> to vector<16x1xf32>
      %160 = vector.broadcast %159 : vector<16x1xf32> to vector<16x8xf32>
      %c1_80 = arith.constant 1 : index
      %c0_81 = arith.constant 0 : index
      %c0_82 = arith.constant 0 : index
      %161 = vector.load %arg8[%c1_80, %c0_81, %c0_82] : memref<4x16x1xf32, #tpu.memory_space<vmem>>, vector<1x16x1xf32>
      %162 = vector.shape_cast %161 : vector<1x16x1xf32> to vector<16x1xf32>
      %163 = tpu.reciprocal %162 {approx = true} : vector<16x1xf32> -> vector<16x1xf32>
      %164 = vector.shape_cast %163 : vector<16x1xf32> to vector<16x1xf32>
      %165 = vector.broadcast %164 : vector<16x1xf32> to vector<16x8xf32>
      %c2_83 = arith.constant 2 : index
      %c0_84 = arith.constant 0 : index
      %c0_85 = arith.constant 0 : index
      %166 = vector.load %arg8[%c2_83, %c0_84, %c0_85] : memref<4x16x1xf32, #tpu.memory_space<vmem>>, vector<1x16x1xf32>
      %167 = vector.shape_cast %166 : vector<1x16x1xf32> to vector<16x1xf32>
      %168 = tpu.reciprocal %167 {approx = true} : vector<16x1xf32> -> vector<16x1xf32>
      %169 = vector.shape_cast %168 : vector<16x1xf32> to vector<16x1xf32>
      %170 = vector.broadcast %169 : vector<16x1xf32> to vector<16x8xf32>
      %c3_86 = arith.constant 3 : index
      %c0_87 = arith.constant 0 : index
      %c0_88 = arith.constant 0 : index
      %171 = vector.load %arg8[%c3_86, %c0_87, %c0_88] : memref<4x16x1xf32, #tpu.memory_space<vmem>>, vector<1x16x1xf32>
      %172 = vector.shape_cast %171 : vector<1x16x1xf32> to vector<16x1xf32>
      %173 = tpu.reciprocal %172 {approx = true} : vector<16x1xf32> -> vector<16x1xf32>
      %174 = vector.shape_cast %173 : vector<16x1xf32> to vector<16x1xf32>
      %175 = vector.broadcast %174 : vector<16x1xf32> to vector<16x8xf32>
      %c0_89 = arith.constant 0 : index
      %c0_90 = arith.constant 0 : index
      %176 = vector.load %arg9[%c0_89, %c0_90] : memref<16x32xf32, #tpu.memory_space<vmem>>, vector<16x32xf32>
      %177 = tpu.concatenate %160, %165, %170, %175 in 1 : vector<16x8xf32>, vector<16x8xf32>, vector<16x8xf32>, vector<16x8xf32> -> vector<16x32xf32>
      %178 = arith.mulf %176, %177 : vector<16x32xf32>
      %c0_91 = arith.constant 0 : index
      %c0_92 = arith.constant 0 : index
      %179 = vector.load %arg6[%c0_91, %c0_92] : memref<16x32xf32, #tpu.memory_space<vmem>>, vector<16x32xf32>
      tpu.vector_store %arg6[%c0_91, %c0_92], %178 {strides = array<i32>} : memref<16x32xf32, #tpu.memory_space<vmem>>, vector<16x32xf32>,
    } else {
    }
    return
  }
  func.func @transform_0(%arg0: i32, %arg1: i32, %arg2: i32) -> (i32, i32) {
    %c1_i32 = arith.constant 1 : i32
    %0 = arith.muli %arg0, %c1_i32 : i32
    %1 = arith.addi %0, %arg1 : i32
    %c0_i32 = arith.constant 0 : i32
    %c0_i32_0 = arith.constant 0 : i32
    return %1, %c0_i32 : i32, i32
  }
  func.func @transform_1(%arg0: i32, %arg1: i32, %arg2: i32) -> (i32, i32) {
    %c1_i32 = arith.constant 1 : i32
    %0 = arith.muli %arg0, %c1_i32 : i32
    %1 = arith.addi %0, %arg2 : i32
    %c0_i32 = arith.constant 0 : i32
    %c0_i32_0 = arith.constant 0 : i32
    return %1, %c0_i32 : i32, i32
  }
  func.func @transform_2(%arg0: i32, %arg1: i32, %arg2: i32) -> (i32, i32) {
    %c1_i32 = arith.constant 1 : i32
    %0 = arith.muli %arg0, %c1_i32 : i32
    %1 = arith.addi %0, %arg2 : i32
    %c0_i32 = arith.constant 0 : i32
    %c0_i32_0 = arith.constant 0 : i32
    return %1, %c0_i32 : i32, i32
  }
  func.func @transform_3(%arg0: i32, %arg1: i32, %arg2: i32) -> (i32, i32) {
    %c1_i32 = arith.constant 1 : i32
    %0 = arith.muli %arg0, %c1_i32 : i32
    %1 = arith.addi %0, %arg1 : i32
    %c0_i32 = arith.constant 0 : i32
    %c0_i32_0 = arith.constant 0 : i32
    return %1, %c0_i32 : i32, i32
  }
}

module attributes {stable_mosaic.version = 11 : i64} {
  func.func @_matmul_kernel(%arg0: i32, %arg1: i32, %arg2: i32, %arg3: memref<64x4xf32, #tpu.memory_space<vmem>>, %arg4: memref<4x32xf32, #tpu.memory_space<vmem>>, %arg5: memref<1x32xf32, #tpu.memory_space<vmem>>, %arg6: memref<64x1xf32, #tpu.memory_space<vmem>>, %arg7: memref<64x1xf32, #tpu.memory_space<vmem>>, %arg8: memref<1x32xf32, #tpu.memory_space<vmem>>, %arg9: memref<1x32xf32, #tpu.memory_space<vmem>>, %arg10: memref<64x32xf32, #tpu.memory_space<vmem>>, %arg11: memref<64x32xf32, #tpu.memory_space<vmem>>) attributes {dimension_semantics = [#tpu.dimension_semantics<parallel>, #tpu.dimension_semantics<parallel>, #tpu.dimension_semantics<arbitrary>], iteration_bounds = array<i64: 1, 1, 1>, scalar_prefetch = 0 : i64, scratch_operands = 1 : i64, tpu.core_type = #tpu.core_type<tc>, window_params = [{transform_indices = @transform_0, window_bounds = array<i64: 64, 4>}, {transform_indices = @transform_1, window_bounds = array<i64: 4, 32>}, {transform_indices = @transform_2, window_bounds = array<i64: 1, 32>}, {transform_indices = @transform_3, window_bounds = array<i64: 64, 1>}, {transform_indices = @transform_4, window_bounds = array<i64: 64, 1>}, {transform_indices = @transform_5, window_bounds = array<i64: 1, 32>}, {transform_indices = @transform_6, window_bounds = array<i64: 1, 32>}, {transform_indices = @transform_7, window_bounds = array<i64: 64, 32>}]} {
    %c0_i32 = arith.constant 0 : i32
    %0 = arith.cmpi eq, %arg2, %c0_i32 : i32
    %1 = arith.extui %0 : i1 to i32
    %c0_i32_0 = arith.constant 0 : i32
    %2 = arith.cmpi ne, %1, %c0_i32_0 : i32
    scf.if %2 {
      %cst_10 = arith.constant 0.000000e+00 : f32
      %12 = vector.broadcast %cst_10 : f32 to vector<64x32xf32>
      %c0_11 = arith.constant 0 : index
      %c0_12 = arith.constant 0 : index
      %13 = vector.load %arg11[%c0_11, %c0_12] : memref<64x32xf32, #tpu.memory_space<vmem>>, vector<64x32xf32>
      tpu.vector_store %arg11[%c0_11, %c0_12], %12 {strides = array<i32>} : memref<64x32xf32, #tpu.memory_space<vmem>>, vector<64x32xf32>,
    } else {
    }
    %c0 = arith.constant 0 : index
    %c0_1 = arith.constant 0 : index
    %3 = vector.load %arg11[%c0, %c0_1] : memref<64x32xf32, #tpu.memory_space<vmem>>, vector<64x32xf32>
    %c0_2 = arith.constant 0 : index
    %c0_3 = arith.constant 0 : index
    %4 = vector.load %arg3[%c0_2, %c0_3] : memref<64x4xf32, #tpu.memory_space<vmem>>, vector<64x4xf32>
    %c0_4 = arith.constant 0 : index
    %c0_5 = arith.constant 0 : index
    %5 = vector.load %arg4[%c0_4, %c0_5] : memref<4x32xf32, #tpu.memory_space<vmem>>, vector<4x32xf32>
    %cst = arith.constant dense<0.000000e+00> : vector<64x32xf32>
    %6 = tpu.matmul %4, %5, %cst {dimension_numbers = #tpu.dot_dimension_numbers<[1], [0], [0], [1], [0, 0, 1, 1], [], []>} : vector<64x4xf32>, vector<4x32xf32>, vector<64x32xf32> -> vector<64x32xf32>
    %7 = arith.addf %3, %6 : vector<64x32xf32>
    %c0_6 = arith.constant 0 : index
    %c0_7 = arith.constant 0 : index
    %8 = vector.load %arg11[%c0_6, %c0_7] : memref<64x32xf32, #tpu.memory_space<vmem>>, vector<64x32xf32>
    tpu.vector_store %arg11[%c0_6, %c0_7], %7 {strides = array<i32>} : memref<64x32xf32, #tpu.memory_space<vmem>>, vector<64x32xf32>,
    %c0_i32_8 = arith.constant 0 : i32
    %9 = arith.cmpi eq, %arg2, %c0_i32_8 : i32
    %10 = arith.extui %9 : i1 to i32
    %c0_i32_9 = arith.constant 0 : i32
    %11 = arith.cmpi ne, %10, %c0_i32_9 : i32
    scf.if %11 {
      %c0_10 = arith.constant 0 : index
      %c0_11 = arith.constant 0 : index
      %12 = vector.load %arg11[%c0_10, %c0_11] : memref<64x32xf32, #tpu.memory_space<vmem>>, vector<64x32xf32>
      %c0_12 = arith.constant 0 : index
      %c0_13 = arith.constant 0 : index
      %13 = vector.load %arg5[%c0_12, %c0_13] : memref<1x32xf32, #tpu.memory_space<vmem>>, vector<1x32xf32>
      %14 = vector.broadcast %13 : vector<1x32xf32> to vector<64x32xf32>
      %15 = arith.addf %12, %14 : vector<64x32xf32>
      %c0_14 = arith.constant 0 : index
      %c0_15 = arith.constant 0 : index
      %16 = vector.load %arg6[%c0_14, %c0_15] : memref<64x1xf32, #tpu.memory_space<vmem>>, vector<64x1xf32>
      %c0_16 = arith.constant 0 : index
      %c0_17 = arith.constant 0 : index
      %17 = vector.load %arg8[%c0_16, %c0_17] : memref<1x32xf32, #tpu.memory_space<vmem>>, vector<1x32xf32>
      %18 = vector.broadcast %16 : vector<64x1xf32> to vector<64x32xf32>
      %19 = vector.broadcast %17 : vector<1x32xf32> to vector<64x32xf32>
      %20 = arith.mulf %18, %19 : vector<64x32xf32>
      %21 = arith.addf %15, %20 : vector<64x32xf32>
      %c0_18 = arith.constant 0 : index
      %c0_19 = arith.constant 0 : index
      %22 = vector.load %arg7[%c0_18, %c0_19] : memref<64x1xf32, #tpu.memory_space<vmem>>, vector<64x1xf32>
      %c0_20 = arith.constant 0 : index
      %c0_21 = arith.constant 0 : index
      %23 = vector.load %arg9[%c0_20, %c0_21] : memref<1x32xf32, #tpu.memory_space<vmem>>, vector<1x32xf32>
      %24 = vector.broadcast %22 : vector<64x1xf32> to vector<64x32xf32>
      %25 = vector.broadcast %23 : vector<1x32xf32> to vector<64x32xf32>
      %26 = arith.mulf %24, %25 : vector<64x32xf32>
      %27 = arith.addf %21, %26 : vector<64x32xf32>
      %c0_22 = arith.constant 0 : index
      %c0_23 = arith.constant 0 : index
      %28 = vector.load %arg10[%c0_22, %c0_23] : memref<64x32xf32, #tpu.memory_space<vmem>>, vector<64x32xf32>
      tpu.vector_store %arg10[%c0_22, %c0_23], %27 {strides = array<i32>} : memref<64x32xf32, #tpu.memory_space<vmem>>, vector<64x32xf32>,
    } else {
    }
    return
  }
  func.func @transform_0(%arg0: i32, %arg1: i32, %arg2: i32) -> (i32, i32) {
    %c0_i32 = arith.constant 0 : i32
    return %arg0, %arg2 : i32, i32
  }
  func.func @transform_1(%arg0: i32, %arg1: i32, %arg2: i32) -> (i32, i32) {
    %c0_i32 = arith.constant 0 : i32
    return %arg2, %arg1 : i32, i32
  }
  func.func @transform_2(%arg0: i32, %arg1: i32, %arg2: i32) -> (i32, i32) {
    %c0_i32 = arith.constant 0 : i32
    %c0_i32_0 = arith.constant 0 : i32
    return %c0_i32, %arg1 : i32, i32
  }
  func.func @transform_3(%arg0: i32, %arg1: i32, %arg2: i32) -> (i32, i32) {
    %c0_i32 = arith.constant 0 : i32
    %c0_i32_0 = arith.constant 0 : i32
    return %arg0, %c0_i32 : i32, i32
  }
  func.func @transform_4(%arg0: i32, %arg1: i32, %arg2: i32) -> (i32, i32) {
    %c0_i32 = arith.constant 0 : i32
    %c0_i32_0 = arith.constant 0 : i32
    return %arg0, %c0_i32 : i32, i32
  }
  func.func @transform_5(%arg0: i32, %arg1: i32, %arg2: i32) -> (i32, i32) {
    %c0_i32 = arith.constant 0 : i32
    %c0_i32_0 = arith.constant 0 : i32
    return %c0_i32, %arg1 : i32, i32
  }
  func.func @transform_6(%arg0: i32, %arg1: i32, %arg2: i32) -> (i32, i32) {
    %c0_i32 = arith.constant 0 : i32
    %c0_i32_0 = arith.constant 0 : i32
    return %c0_i32, %arg1 : i32, i32
  }
  func.func @transform_7(%arg0: i32, %arg1: i32, %arg2: i32) -> (i32, i32) {
    %c0_i32 = arith.constant 0 : i32
    return %arg0, %arg1 : i32, i32
  }
}

module attributes {stable_mosaic.version = 11 : i64} {
  func.func @_matmul_kernel(%arg0: i32, %arg1: i32, %arg2: i32, %arg3: memref<64x32xf32, #tpu.memory_space<vmem>>, %arg4: memref<32x96xf32, #tpu.memory_space<vmem>>, %arg5: memref<1x96xf32, #tpu.memory_space<vmem>>, %arg6: memref<64x96xf32, #tpu.memory_space<vmem>>, %arg7: memref<64x96xf32, #tpu.memory_space<vmem>>) attributes {dimension_semantics = [#tpu.dimension_semantics<parallel>, #tpu.dimension_semantics<parallel>, #tpu.dimension_semantics<arbitrary>], iteration_bounds = array<i64: 1, 1, 1>, scalar_prefetch = 0 : i64, scratch_operands = 1 : i64, tpu.core_type = #tpu.core_type<tc>, window_params = [{transform_indices = @transform_0, window_bounds = array<i64: 64, 32>}, {transform_indices = @transform_1, window_bounds = array<i64: 32, 96>}, {transform_indices = @transform_2, window_bounds = array<i64: 1, 96>}, {transform_indices = @transform_3, window_bounds = array<i64: 64, 96>}]} {
    %c0_i32 = arith.constant 0 : i32
    %0 = arith.cmpi eq, %arg2, %c0_i32 : i32
    %1 = arith.extui %0 : i1 to i32
    %c0_i32_0 = arith.constant 0 : i32
    %2 = arith.cmpi ne, %1, %c0_i32_0 : i32
    scf.if %2 {
      %cst_10 = arith.constant 0.000000e+00 : f32
      %12 = vector.broadcast %cst_10 : f32 to vector<64x96xf32>
      %c0_11 = arith.constant 0 : index
      %c0_12 = arith.constant 0 : index
      %13 = vector.load %arg7[%c0_11, %c0_12] : memref<64x96xf32, #tpu.memory_space<vmem>>, vector<64x96xf32>
      tpu.vector_store %arg7[%c0_11, %c0_12], %12 {strides = array<i32>} : memref<64x96xf32, #tpu.memory_space<vmem>>, vector<64x96xf32>,
    } else {
    }
    %c0 = arith.constant 0 : index
    %c0_1 = arith.constant 0 : index
    %3 = vector.load %arg7[%c0, %c0_1] : memref<64x96xf32, #tpu.memory_space<vmem>>, vector<64x96xf32>
    %c0_2 = arith.constant 0 : index
    %c0_3 = arith.constant 0 : index
    %4 = vector.load %arg3[%c0_2, %c0_3] : memref<64x32xf32, #tpu.memory_space<vmem>>, vector<64x32xf32>
    %c0_4 = arith.constant 0 : index
    %c0_5 = arith.constant 0 : index
    %5 = vector.load %arg4[%c0_4, %c0_5] : memref<32x96xf32, #tpu.memory_space<vmem>>, vector<32x96xf32>
    %cst = arith.constant dense<0.000000e+00> : vector<64x96xf32>
    %6 = tpu.matmul %4, %5, %cst {dimension_numbers = #tpu.dot_dimension_numbers<[1], [0], [0], [1], [0, 0, 1, 1], [], []>} : vector<64x32xf32>, vector<32x96xf32>, vector<64x96xf32> -> vector<64x96xf32>
    %7 = arith.addf %3, %6 : vector<64x96xf32>
    %c0_6 = arith.constant 0 : index
    %c0_7 = arith.constant 0 : index
    %8 = vector.load %arg7[%c0_6, %c0_7] : memref<64x96xf32, #tpu.memory_space<vmem>>, vector<64x96xf32>
    tpu.vector_store %arg7[%c0_6, %c0_7], %7 {strides = array<i32>} : memref<64x96xf32, #tpu.memory_space<vmem>>, vector<64x96xf32>,
    %c0_i32_8 = arith.constant 0 : i32
    %9 = arith.cmpi eq, %arg2, %c0_i32_8 : i32
    %10 = arith.extui %9 : i1 to i32
    %c0_i32_9 = arith.constant 0 : i32
    %11 = arith.cmpi ne, %10, %c0_i32_9 : i32
    scf.if %11 {
      %c0_10 = arith.constant 0 : index
      %c0_11 = arith.constant 0 : index
      %12 = vector.load %arg7[%c0_10, %c0_11] : memref<64x96xf32, #tpu.memory_space<vmem>>, vector<64x96xf32>
      %c0_12 = arith.constant 0 : index
      %c0_13 = arith.constant 0 : index
      %13 = vector.load %arg5[%c0_12, %c0_13] : memref<1x96xf32, #tpu.memory_space<vmem>>, vector<1x96xf32>
      %14 = vector.broadcast %13 : vector<1x96xf32> to vector<64x96xf32>
      %15 = arith.addf %12, %14 : vector<64x96xf32>
      %c0_14 = arith.constant 0 : index
      %c0_15 = arith.constant 0 : index
      %16 = vector.load %arg6[%c0_14, %c0_15] : memref<64x96xf32, #tpu.memory_space<vmem>>, vector<64x96xf32>
      tpu.vector_store %arg6[%c0_14, %c0_15], %15 {strides = array<i32>} : memref<64x96xf32, #tpu.memory_space<vmem>>, vector<64x96xf32>,
    } else {
    }
    return
  }
  func.func @transform_0(%arg0: i32, %arg1: i32, %arg2: i32) -> (i32, i32) {
    %c0_i32 = arith.constant 0 : i32
    return %arg0, %arg2 : i32, i32
  }
  func.func @transform_1(%arg0: i32, %arg1: i32, %arg2: i32) -> (i32, i32) {
    %c0_i32 = arith.constant 0 : i32
    return %arg2, %arg1 : i32, i32
  }
  func.func @transform_2(%arg0: i32, %arg1: i32, %arg2: i32) -> (i32, i32) {
    %c0_i32 = arith.constant 0 : i32
    %c0_i32_0 = arith.constant 0 : i32
    return %c0_i32, %arg1 : i32, i32
  }
  func.func @transform_3(%arg0: i32, %arg1: i32, %arg2: i32) -> (i32, i32) {
    %c0_i32 = arith.constant 0 : i32
    return %arg0, %arg1 : i32, i32
  }
}

module attributes {stable_mosaic.version = 11 : i64} {
  func.func @_matmul_kernel(%arg0: i32, %arg1: i32, %arg2: i32, %arg3: memref<64x32xf32, #tpu.memory_space<vmem>>, %arg4: memref<32x32xf32, #tpu.memory_space<vmem>>, %arg5: memref<1x32xf32, #tpu.memory_space<vmem>>, %arg6: memref<64x32xf32, #tpu.memory_space<vmem>>, %arg7: memref<1x32xf32, #tpu.memory_space<vmem>>, %arg8: memref<1x32xf32, #tpu.memory_space<vmem>>, %arg9: memref<64x32xf32, #tpu.memory_space<vmem>>, %arg10: memref<64x32xf32, #tpu.memory_space<vmem>>) attributes {dimension_semantics = [#tpu.dimension_semantics<parallel>, #tpu.dimension_semantics<parallel>, #tpu.dimension_semantics<arbitrary>], iteration_bounds = array<i64: 1, 1, 1>, scalar_prefetch = 0 : i64, scratch_operands = 1 : i64, tpu.core_type = #tpu.core_type<tc>, window_params = [{transform_indices = @transform_0, window_bounds = array<i64: 64, 32>}, {transform_indices = @transform_1, window_bounds = array<i64: 32, 32>}, {transform_indices = @transform_2, window_bounds = array<i64: 1, 32>}, {transform_indices = @transform_3, window_bounds = array<i64: 64, 32>}, {transform_indices = @transform_4, window_bounds = array<i64: 1, 32>}, {transform_indices = @transform_5, window_bounds = array<i64: 1, 32>}, {transform_indices = @transform_6, window_bounds = array<i64: 64, 32>}]} {
    %c0_i32 = arith.constant 0 : i32
    %0 = arith.cmpi eq, %arg2, %c0_i32 : i32
    %1 = arith.extui %0 : i1 to i32
    %c0_i32_0 = arith.constant 0 : i32
    %2 = arith.cmpi ne, %1, %c0_i32_0 : i32
    scf.if %2 {
      %cst_10 = arith.constant 0.000000e+00 : f32
      %12 = vector.broadcast %cst_10 : f32 to vector<64x32xf32>
      %c0_11 = arith.constant 0 : index
      %c0_12 = arith.constant 0 : index
      %13 = vector.load %arg10[%c0_11, %c0_12] : memref<64x32xf32, #tpu.memory_space<vmem>>, vector<64x32xf32>
      tpu.vector_store %arg10[%c0_11, %c0_12], %12 {strides = array<i32>} : memref<64x32xf32, #tpu.memory_space<vmem>>, vector<64x32xf32>,
    } else {
    }
    %c0 = arith.constant 0 : index
    %c0_1 = arith.constant 0 : index
    %3 = vector.load %arg10[%c0, %c0_1] : memref<64x32xf32, #tpu.memory_space<vmem>>, vector<64x32xf32>
    %c0_2 = arith.constant 0 : index
    %c0_3 = arith.constant 0 : index
    %4 = vector.load %arg3[%c0_2, %c0_3] : memref<64x32xf32, #tpu.memory_space<vmem>>, vector<64x32xf32>
    %c0_4 = arith.constant 0 : index
    %c0_5 = arith.constant 0 : index
    %5 = vector.load %arg4[%c0_4, %c0_5] : memref<32x32xf32, #tpu.memory_space<vmem>>, vector<32x32xf32>
    %cst = arith.constant dense<0.000000e+00> : vector<64x32xf32>
    %6 = tpu.matmul %4, %5, %cst {dimension_numbers = #tpu.dot_dimension_numbers<[1], [0], [0], [1], [0, 0, 1, 1], [], []>} : vector<64x32xf32>, vector<32x32xf32>, vector<64x32xf32> -> vector<64x32xf32>
    %7 = arith.addf %3, %6 : vector<64x32xf32>
    %c0_6 = arith.constant 0 : index
    %c0_7 = arith.constant 0 : index
    %8 = vector.load %arg10[%c0_6, %c0_7] : memref<64x32xf32, #tpu.memory_space<vmem>>, vector<64x32xf32>
    tpu.vector_store %arg10[%c0_6, %c0_7], %7 {strides = array<i32>} : memref<64x32xf32, #tpu.memory_space<vmem>>, vector<64x32xf32>,
    %c0_i32_8 = arith.constant 0 : i32
    %9 = arith.cmpi eq, %arg2, %c0_i32_8 : i32
    %10 = arith.extui %9 : i1 to i32
    %c0_i32_9 = arith.constant 0 : i32
    %11 = arith.cmpi ne, %10, %c0_i32_9 : i32
    scf.if %11 {
      %c0_10 = arith.constant 0 : index
      %c0_11 = arith.constant 0 : index
      %12 = vector.load %arg10[%c0_10, %c0_11] : memref<64x32xf32, #tpu.memory_space<vmem>>, vector<64x32xf32>
      %c0_12 = arith.constant 0 : index
      %c0_13 = arith.constant 0 : index
      %13 = vector.load %arg5[%c0_12, %c0_13] : memref<1x32xf32, #tpu.memory_space<vmem>>, vector<1x32xf32>
      %14 = vector.broadcast %13 : vector<1x32xf32> to vector<64x32xf32>
      %15 = arith.addf %12, %14 : vector<64x32xf32>
      %c0_14 = arith.constant 0 : index
      %c0_15 = arith.constant 0 : index
      %16 = vector.load %arg6[%c0_14, %c0_15] : memref<64x32xf32, #tpu.memory_space<vmem>>, vector<64x32xf32>
      %17 = arith.addf %16, %15 : vector<64x32xf32>
      %cst_16 = arith.constant dense<0.000000e+00> : vector<64xf32>
      %18 = vector.multi_reduction <add>, %17, %cst_16 [1] : vector<64x32xf32> to vector<64xf32>
      %19 = vector.shape_cast %18 : vector<64xf32> to vector<64x1xf32>
      %cst_17 = arith.constant 3.200000e+01 : f32
      %20 = vector.broadcast %cst_17 : f32 to vector<64x1xf32>
      %21 = arith.divf %19, %20 : vector<64x1xf32>
      %22 = vector.broadcast %21 : vector<64x1xf32> to vector<64x32xf32>
      %23 = arith.subf %17, %22 : vector<64x32xf32>
      %24 = arith.mulf %23, %23 : vector<64x32xf32>
      %cst_18 = arith.constant dense<0.000000e+00> : vector<64xf32>
      %25 = vector.multi_reduction <add>, %24, %cst_18 [1] : vector<64x32xf32> to vector<64xf32>
      %26 = vector.shape_cast %25 : vector<64xf32> to vector<64x1xf32>
      %cst_19 = arith.constant 3.200000e+01 : f32
      %27 = vector.broadcast %cst_19 : f32 to vector<64x1xf32>
      %28 = arith.divf %26, %27 : vector<64x1xf32>
      %29 = vector.broadcast %21 : vector<64x1xf32> to vector<64x32xf32>
      %30 = arith.subf %17, %29 : vector<64x32xf32>
      %cst_20 = arith.constant 9.99999974E-6 : f32
      %31 = vector.broadcast %cst_20 : f32 to vector<64x1xf32>
      %32 = arith.addf %28, %31 : vector<64x1xf32>
      %33 = math.rsqrt %32 : vector<64x1xf32>
      %34 = vector.broadcast %33 : vector<64x1xf32> to vector<64x32xf32>
      %35 = arith.mulf %30, %34 : vector<64x32xf32>
      %c0_21 = arith.constant 0 : index
      %c0_22 = arith.constant 0 : index
      %36 = vector.load %arg7[%c0_21, %c0_22] : memref<1x32xf32, #tpu.memory_space<vmem>>, vector<1x32xf32>
      %37 = vector.broadcast %36 : vector<1x32xf32> to vector<64x32xf32>
      %38 = arith.mulf %35, %37 : vector<64x32xf32>
      %c0_23 = arith.constant 0 : index
      %c0_24 = arith.constant 0 : index
      %39 = vector.load %arg8[%c0_23, %c0_24] : memref<1x32xf32, #tpu.memory_space<vmem>>, vector<1x32xf32>
      %40 = vector.broadcast %39 : vector<1x32xf32> to vector<64x32xf32>
      %41 = arith.addf %38, %40 : vector<64x32xf32>
      %c0_25 = arith.constant 0 : index
      %c0_26 = arith.constant 0 : index
      %42 = vector.load %arg9[%c0_25, %c0_26] : memref<64x32xf32, #tpu.memory_space<vmem>>, vector<64x32xf32>
      tpu.vector_store %arg9[%c0_25, %c0_26], %41 {strides = array<i32>} : memref<64x32xf32, #tpu.memory_space<vmem>>, vector<64x32xf32>,
    } else {
    }
    return
  }
  func.func @transform_0(%arg0: i32, %arg1: i32, %arg2: i32) -> (i32, i32) {
    %c0_i32 = arith.constant 0 : i32
    return %arg0, %arg2 : i32, i32
  }
  func.func @transform_1(%arg0: i32, %arg1: i32, %arg2: i32) -> (i32, i32) {
    %c0_i32 = arith.constant 0 : i32
    return %arg2, %arg1 : i32, i32
  }
  func.func @transform_2(%arg0: i32, %arg1: i32, %arg2: i32) -> (i32, i32) {
    %c0_i32 = arith.constant 0 : i32
    %c0_i32_0 = arith.constant 0 : i32
    return %c0_i32, %arg1 : i32, i32
  }
  func.func @transform_3(%arg0: i32, %arg1: i32, %arg2: i32) -> (i32, i32) {
    %c0_i32 = arith.constant 0 : i32
    return %arg0, %arg1 : i32, i32
  }
  func.func @transform_4(%arg0: i32, %arg1: i32, %arg2: i32) -> (i32, i32) {
    %c0_i32 = arith.constant 0 : i32
    %c0_i32_0 = arith.constant 0 : i32
    return %c0_i32, %arg1 : i32, i32
  }
  func.func @transform_5(%arg0: i32, %arg1: i32, %arg2: i32) -> (i32, i32) {
    %c0_i32 = arith.constant 0 : i32
    %c0_i32_0 = arith.constant 0 : i32
    return %c0_i32, %arg1 : i32, i32
  }
  func.func @transform_6(%arg0: i32, %arg1: i32, %arg2: i32) -> (i32, i32) {
    %c0_i32 = arith.constant 0 : i32
    return %arg0, %arg1 : i32, i32
  }
}

module attributes {stable_mosaic.version = 11 : i64} {
  func.func @_matmul_kernel(%arg0: i32, %arg1: i32, %arg2: i32, %arg3: memref<64x32xf32, #tpu.memory_space<vmem>>, %arg4: memref<32x64xf32, #tpu.memory_space<vmem>>, %arg5: memref<1x64xf32, #tpu.memory_space<vmem>>, %arg6: memref<64x64xf32, #tpu.memory_space<vmem>>, %arg7: memref<64x64xf32, #tpu.memory_space<vmem>>) attributes {dimension_semantics = [#tpu.dimension_semantics<parallel>, #tpu.dimension_semantics<parallel>, #tpu.dimension_semantics<arbitrary>], iteration_bounds = array<i64: 1, 1, 1>, scalar_prefetch = 0 : i64, scratch_operands = 1 : i64, tpu.core_type = #tpu.core_type<tc>, window_params = [{transform_indices = @transform_0, window_bounds = array<i64: 64, 32>}, {transform_indices = @transform_1, window_bounds = array<i64: 32, 64>}, {transform_indices = @transform_2, window_bounds = array<i64: 1, 64>}, {transform_indices = @transform_3, window_bounds = array<i64: 64, 64>}]} {
    %c0_i32 = arith.constant 0 : i32
    %0 = arith.cmpi eq, %arg2, %c0_i32 : i32
    %1 = arith.extui %0 : i1 to i32
    %c0_i32_0 = arith.constant 0 : i32
    %2 = arith.cmpi ne, %1, %c0_i32_0 : i32
    scf.if %2 {
      %cst_10 = arith.constant 0.000000e+00 : f32
      %12 = vector.broadcast %cst_10 : f32 to vector<64x64xf32>
      %c0_11 = arith.constant 0 : index
      %c0_12 = arith.constant 0 : index
      %13 = vector.load %arg7[%c0_11, %c0_12] : memref<64x64xf32, #tpu.memory_space<vmem>>, vector<64x64xf32>
      tpu.vector_store %arg7[%c0_11, %c0_12], %12 {strides = array<i32>} : memref<64x64xf32, #tpu.memory_space<vmem>>, vector<64x64xf32>,
    } else {
    }
    %c0 = arith.constant 0 : index
    %c0_1 = arith.constant 0 : index
    %3 = vector.load %arg7[%c0, %c0_1] : memref<64x64xf32, #tpu.memory_space<vmem>>, vector<64x64xf32>
    %c0_2 = arith.constant 0 : index
    %c0_3 = arith.constant 0 : index
    %4 = vector.load %arg3[%c0_2, %c0_3] : memref<64x32xf32, #tpu.memory_space<vmem>>, vector<64x32xf32>
    %c0_4 = arith.constant 0 : index
    %c0_5 = arith.constant 0 : index
    %5 = vector.load %arg4[%c0_4, %c0_5] : memref<32x64xf32, #tpu.memory_space<vmem>>, vector<32x64xf32>
    %cst = arith.constant dense<0.000000e+00> : vector<64x64xf32>
    %6 = tpu.matmul %4, %5, %cst {dimension_numbers = #tpu.dot_dimension_numbers<[1], [0], [0], [1], [0, 0, 1, 1], [], []>} : vector<64x32xf32>, vector<32x64xf32>, vector<64x64xf32> -> vector<64x64xf32>
    %7 = arith.addf %3, %6 : vector<64x64xf32>
    %c0_6 = arith.constant 0 : index
    %c0_7 = arith.constant 0 : index
    %8 = vector.load %arg7[%c0_6, %c0_7] : memref<64x64xf32, #tpu.memory_space<vmem>>, vector<64x64xf32>
    tpu.vector_store %arg7[%c0_6, %c0_7], %7 {strides = array<i32>} : memref<64x64xf32, #tpu.memory_space<vmem>>, vector<64x64xf32>,
    %c0_i32_8 = arith.constant 0 : i32
    %9 = arith.cmpi eq, %arg2, %c0_i32_8 : i32
    %10 = arith.extui %9 : i1 to i32
    %c0_i32_9 = arith.constant 0 : i32
    %11 = arith.cmpi ne, %10, %c0_i32_9 : i32
    scf.if %11 {
      %c0_10 = arith.constant 0 : index
      %c0_11 = arith.constant 0 : index
      %12 = vector.load %arg7[%c0_10, %c0_11] : memref<64x64xf32, #tpu.memory_space<vmem>>, vector<64x64xf32>
      %c0_12 = arith.constant 0 : index
      %c0_13 = arith.constant 0 : index
      %13 = vector.load %arg5[%c0_12, %c0_13] : memref<1x64xf32, #tpu.memory_space<vmem>>, vector<1x64xf32>
      %14 = vector.broadcast %13 : vector<1x64xf32> to vector<64x64xf32>
      %15 = arith.addf %12, %14 : vector<64x64xf32>
      %cst_14 = arith.constant 5.000000e-01 : f32
      %16 = vector.broadcast %cst_14 : f32 to vector<64x64xf32>
      %17 = arith.mulf %16, %15 : vector<64x64xf32>
      %cst_15 = arith.constant 1.41421354 : f32
      %18 = vector.broadcast %cst_15 : f32 to vector<64x64xf32>
      %19 = arith.divf %15, %18 : vector<64x64xf32>
      %20 = math.erf %19 : vector<64x64xf32>
      %cst_16 = arith.constant 1.000000e+00 : f32
      %21 = vector.broadcast %cst_16 : f32 to vector<64x64xf32>
      %22 = arith.addf %21, %20 : vector<64x64xf32>
      %23 = arith.mulf %17, %22 : vector<64x64xf32>
      %c0_17 = arith.constant 0 : index
      %c0_18 = arith.constant 0 : index
      %24 = vector.load %arg6[%c0_17, %c0_18] : memref<64x64xf32, #tpu.memory_space<vmem>>, vector<64x64xf32>
      tpu.vector_store %arg6[%c0_17, %c0_18], %23 {strides = array<i32>} : memref<64x64xf32, #tpu.memory_space<vmem>>, vector<64x64xf32>,
    } else {
    }
    return
  }
  func.func @transform_0(%arg0: i32, %arg1: i32, %arg2: i32) -> (i32, i32) {
    %c0_i32 = arith.constant 0 : i32
    return %arg0, %arg2 : i32, i32
  }
  func.func @transform_1(%arg0: i32, %arg1: i32, %arg2: i32) -> (i32, i32) {
    %c0_i32 = arith.constant 0 : i32
    return %arg2, %arg1 : i32, i32
  }
  func.func @transform_2(%arg0: i32, %arg1: i32, %arg2: i32) -> (i32, i32) {
    %c0_i32 = arith.constant 0 : i32
    %c0_i32_0 = arith.constant 0 : i32
    return %c0_i32, %arg1 : i32, i32
  }
  func.func @transform_3(%arg0: i32, %arg1: i32, %arg2: i32) -> (i32, i32) {
    %c0_i32 = arith.constant 0 : i32
    return %arg0, %arg1 : i32, i32
  }
}

module attributes {stable_mosaic.version = 11 : i64} {
  func.func @_matmul_kernel(%arg0: i32, %arg1: i32, %arg2: i32, %arg3: memref<64x64xf32, #tpu.memory_space<vmem>>, %arg4: memref<64x32xf32, #tpu.memory_space<vmem>>, %arg5: memref<1x32xf32, #tpu.memory_space<vmem>>, %arg6: memref<64x32xf32, #tpu.memory_space<vmem>>, %arg7: memref<1x32xf32, #tpu.memory_space<vmem>>, %arg8: memref<1x32xf32, #tpu.memory_space<vmem>>, %arg9: memref<64x32xf32, #tpu.memory_space<vmem>>, %arg10: memref<64x32xf32, #tpu.memory_space<vmem>>) attributes {dimension_semantics = [#tpu.dimension_semantics<parallel>, #tpu.dimension_semantics<parallel>, #tpu.dimension_semantics<arbitrary>], iteration_bounds = array<i64: 1, 1, 1>, scalar_prefetch = 0 : i64, scratch_operands = 1 : i64, tpu.core_type = #tpu.core_type<tc>, window_params = [{transform_indices = @transform_0, window_bounds = array<i64: 64, 64>}, {transform_indices = @transform_1, window_bounds = array<i64: 64, 32>}, {transform_indices = @transform_2, window_bounds = array<i64: 1, 32>}, {transform_indices = @transform_3, window_bounds = array<i64: 64, 32>}, {transform_indices = @transform_4, window_bounds = array<i64: 1, 32>}, {transform_indices = @transform_5, window_bounds = array<i64: 1, 32>}, {transform_indices = @transform_6, window_bounds = array<i64: 64, 32>}]} {
    %c0_i32 = arith.constant 0 : i32
    %0 = arith.cmpi eq, %arg2, %c0_i32 : i32
    %1 = arith.extui %0 : i1 to i32
    %c0_i32_0 = arith.constant 0 : i32
    %2 = arith.cmpi ne, %1, %c0_i32_0 : i32
    scf.if %2 {
      %cst_10 = arith.constant 0.000000e+00 : f32
      %12 = vector.broadcast %cst_10 : f32 to vector<64x32xf32>
      %c0_11 = arith.constant 0 : index
      %c0_12 = arith.constant 0 : index
      %13 = vector.load %arg10[%c0_11, %c0_12] : memref<64x32xf32, #tpu.memory_space<vmem>>, vector<64x32xf32>
      tpu.vector_store %arg10[%c0_11, %c0_12], %12 {strides = array<i32>} : memref<64x32xf32, #tpu.memory_space<vmem>>, vector<64x32xf32>,
    } else {
    }
    %c0 = arith.constant 0 : index
    %c0_1 = arith.constant 0 : index
    %3 = vector.load %arg10[%c0, %c0_1] : memref<64x32xf32, #tpu.memory_space<vmem>>, vector<64x32xf32>
    %c0_2 = arith.constant 0 : index
    %c0_3 = arith.constant 0 : index
    %4 = vector.load %arg3[%c0_2, %c0_3] : memref<64x64xf32, #tpu.memory_space<vmem>>, vector<64x64xf32>
    %c0_4 = arith.constant 0 : index
    %c0_5 = arith.constant 0 : index
    %5 = vector.load %arg4[%c0_4, %c0_5] : memref<64x32xf32, #tpu.memory_space<vmem>>, vector<64x32xf32>
    %cst = arith.constant dense<0.000000e+00> : vector<64x32xf32>
    %6 = tpu.matmul %4, %5, %cst {dimension_numbers = #tpu.dot_dimension_numbers<[1], [0], [0], [1], [0, 0, 1, 1], [], []>} : vector<64x64xf32>, vector<64x32xf32>, vector<64x32xf32> -> vector<64x32xf32>
    %7 = arith.addf %3, %6 : vector<64x32xf32>
    %c0_6 = arith.constant 0 : index
    %c0_7 = arith.constant 0 : index
    %8 = vector.load %arg10[%c0_6, %c0_7] : memref<64x32xf32, #tpu.memory_space<vmem>>, vector<64x32xf32>
    tpu.vector_store %arg10[%c0_6, %c0_7], %7 {strides = array<i32>} : memref<64x32xf32, #tpu.memory_space<vmem>>, vector<64x32xf32>,
    %c0_i32_8 = arith.constant 0 : i32
    %9 = arith.cmpi eq, %arg2, %c0_i32_8 : i32
    %10 = arith.extui %9 : i1 to i32
    %c0_i32_9 = arith.constant 0 : i32
    %11 = arith.cmpi ne, %10, %c0_i32_9 : i32
    scf.if %11 {
      %c0_10 = arith.constant 0 : index
      %c0_11 = arith.constant 0 : index
      %12 = vector.load %arg10[%c0_10, %c0_11] : memref<64x32xf32, #tpu.memory_space<vmem>>, vector<64x32xf32>
      %c0_12 = arith.constant 0 : index
      %c0_13 = arith.constant 0 : index
      %13 = vector.load %arg5[%c0_12, %c0_13] : memref<1x32xf32, #tpu.memory_space<vmem>>, vector<1x32xf32>
      %14 = vector.broadcast %13 : vector<1x32xf32> to vector<64x32xf32>
      %15 = arith.addf %12, %14 : vector<64x32xf32>
      %c0_14 = arith.constant 0 : index
      %c0_15 = arith.constant 0 : index
      %16 = vector.load %arg6[%c0_14, %c0_15] : memref<64x32xf32, #tpu.memory_space<vmem>>, vector<64x32xf32>
      %17 = arith.addf %16, %15 : vector<64x32xf32>
      %cst_16 = arith.constant dense<0.000000e+00> : vector<64xf32>
      %18 = vector.multi_reduction <add>, %17, %cst_16 [1] : vector<64x32xf32> to vector<64xf32>
      %19 = vector.shape_cast %18 : vector<64xf32> to vector<64x1xf32>
      %cst_17 = arith.constant 3.200000e+01 : f32
      %20 = vector.broadcast %cst_17 : f32 to vector<64x1xf32>
      %21 = arith.divf %19, %20 : vector<64x1xf32>
      %22 = vector.broadcast %21 : vector<64x1xf32> to vector<64x32xf32>
      %23 = arith.subf %17, %22 : vector<64x32xf32>
      %24 = arith.mulf %23, %23 : vector<64x32xf32>
      %cst_18 = arith.constant dense<0.000000e+00> : vector<64xf32>
      %25 = vector.multi_reduction <add>, %24, %cst_18 [1] : vector<64x32xf32> to vector<64xf32>
      %26 = vector.shape_cast %25 : vector<64xf32> to vector<64x1xf32>
      %cst_19 = arith.constant 3.200000e+01 : f32
      %27 = vector.broadcast %cst_19 : f32 to vector<64x1xf32>
      %28 = arith.divf %26, %27 : vector<64x1xf32>
      %29 = vector.broadcast %21 : vector<64x1xf32> to vector<64x32xf32>
      %30 = arith.subf %17, %29 : vector<64x32xf32>
      %cst_20 = arith.constant 9.99999974E-6 : f32
      %31 = vector.broadcast %cst_20 : f32 to vector<64x1xf32>
      %32 = arith.addf %28, %31 : vector<64x1xf32>
      %33 = math.rsqrt %32 : vector<64x1xf32>
      %34 = vector.broadcast %33 : vector<64x1xf32> to vector<64x32xf32>
      %35 = arith.mulf %30, %34 : vector<64x32xf32>
      %c0_21 = arith.constant 0 : index
      %c0_22 = arith.constant 0 : index
      %36 = vector.load %arg7[%c0_21, %c0_22] : memref<1x32xf32, #tpu.memory_space<vmem>>, vector<1x32xf32>
      %37 = vector.broadcast %36 : vector<1x32xf32> to vector<64x32xf32>
      %38 = arith.mulf %35, %37 : vector<64x32xf32>
      %c0_23 = arith.constant 0 : index
      %c0_24 = arith.constant 0 : index
      %39 = vector.load %arg8[%c0_23, %c0_24] : memref<1x32xf32, #tpu.memory_space<vmem>>, vector<1x32xf32>
      %40 = vector.broadcast %39 : vector<1x32xf32> to vector<64x32xf32>
      %41 = arith.addf %38, %40 : vector<64x32xf32>
      %c0_25 = arith.constant 0 : index
      %c0_26 = arith.constant 0 : index
      %42 = vector.load %arg9[%c0_25, %c0_26] : memref<64x32xf32, #tpu.memory_space<vmem>>, vector<64x32xf32>
      tpu.vector_store %arg9[%c0_25, %c0_26], %41 {strides = array<i32>} : memref<64x32xf32, #tpu.memory_space<vmem>>, vector<64x32xf32>,
    } else {
    }
    return
  }
  func.func @transform_0(%arg0: i32, %arg1: i32, %arg2: i32) -> (i32, i32) {
    %c0_i32 = arith.constant 0 : i32
    return %arg0, %arg2 : i32, i32
  }
  func.func @transform_1(%arg0: i32, %arg1: i32, %arg2: i32) -> (i32, i32) {
    %c0_i32 = arith.constant 0 : i32
    return %arg2, %arg1 : i32, i32
  }
  func.func @transform_2(%arg0: i32, %arg1: i32, %arg2: i32) -> (i32, i32) {
    %c0_i32 = arith.constant 0 : i32
    %c0_i32_0 = arith.constant 0 : i32
    return %c0_i32, %arg1 : i32, i32
  }
  func.func @transform_3(%arg0: i32, %arg1: i32, %arg2: i32) -> (i32, i32) {
    %c0_i32 = arith.constant 0 : i32
    return %arg0, %arg1 : i32, i32
  }
  func.func @transform_4(%arg0: i32, %arg1: i32, %arg2: i32) -> (i32, i32) {
    %c0_i32 = arith.constant 0 : i32
    %c0_i32_0 = arith.constant 0 : i32
    return %c0_i32, %arg1 : i32, i32
  }
  func.func @transform_5(%arg0: i32, %arg1: i32, %arg2: i32) -> (i32, i32) {
    %c0_i32 = arith.constant 0 : i32
    %c0_i32_0 = arith.constant 0 : i32
    return %c0_i32, %arg1 : i32, i32
  }
  func.func @transform_6(%arg0: i32, %arg1: i32, %arg2: i32) -> (i32, i32) {
    %c0_i32 = arith.constant 0 : i32
    return %arg0, %arg1 : i32, i32
  }
}

module attributes {stable_mosaic.version = 11 : i64} {
  func.func @_matmul_kernel(%arg0: i32, %arg1: i32, %arg2: i32, %arg3: memref<32x32xf32, #tpu.memory_space<vmem>>, %arg4: memref<32x64xf32, #tpu.memory_space<vmem>>, %arg5: memref<1x64xf32, #tpu.memory_space<vmem>>, %arg6: memref<32x64xf32, #tpu.memory_space<vmem>>, %arg7: memref<32x64xf32, #tpu.memory_space<vmem>>) attributes {dimension_semantics = [#tpu.dimension_semantics<parallel>, #tpu.dimension_semantics<parallel>, #tpu.dimension_semantics<arbitrary>], iteration_bounds = array<i64: 1, 1, 1>, scalar_prefetch = 0 : i64, scratch_operands = 1 : i64, tpu.core_type = #tpu.core_type<tc>, window_params = [{transform_indices = @transform_0, window_bounds = array<i64: 32, 32>}, {transform_indices = @transform_1, window_bounds = array<i64: 32, 64>}, {transform_indices = @transform_2, window_bounds = array<i64: 1, 64>}, {transform_indices = @transform_3, window_bounds = array<i64: 32, 64>}]} {
    %c0_i32 = arith.constant 0 : i32
    %0 = arith.cmpi eq, %arg2, %c0_i32 : i32
    %1 = arith.extui %0 : i1 to i32
    %c0_i32_0 = arith.constant 0 : i32
    %2 = arith.cmpi ne, %1, %c0_i32_0 : i32
    scf.if %2 {
      %cst_10 = arith.constant 0.000000e+00 : f32
      %12 = vector.broadcast %cst_10 : f32 to vector<32x64xf32>
      %c0_11 = arith.constant 0 : index
      %c0_12 = arith.constant 0 : index
      %13 = vector.load %arg7[%c0_11, %c0_12] : memref<32x64xf32, #tpu.memory_space<vmem>>, vector<32x64xf32>
      tpu.vector_store %arg7[%c0_11, %c0_12], %12 {strides = array<i32>} : memref<32x64xf32, #tpu.memory_space<vmem>>, vector<32x64xf32>,
    } else {
    }
    %c0 = arith.constant 0 : index
    %c0_1 = arith.constant 0 : index
    %3 = vector.load %arg7[%c0, %c0_1] : memref<32x64xf32, #tpu.memory_space<vmem>>, vector<32x64xf32>
    %c0_2 = arith.constant 0 : index
    %c0_3 = arith.constant 0 : index
    %4 = vector.load %arg3[%c0_2, %c0_3] : memref<32x32xf32, #tpu.memory_space<vmem>>, vector<32x32xf32>
    %c0_4 = arith.constant 0 : index
    %c0_5 = arith.constant 0 : index
    %5 = vector.load %arg4[%c0_4, %c0_5] : memref<32x64xf32, #tpu.memory_space<vmem>>, vector<32x64xf32>
    %cst = arith.constant dense<0.000000e+00> : vector<32x64xf32>
    %6 = tpu.matmul %4, %5, %cst {dimension_numbers = #tpu.dot_dimension_numbers<[1], [0], [0], [1], [0, 0, 1, 1], [], []>} : vector<32x32xf32>, vector<32x64xf32>, vector<32x64xf32> -> vector<32x64xf32>
    %7 = arith.addf %3, %6 : vector<32x64xf32>
    %c0_6 = arith.constant 0 : index
    %c0_7 = arith.constant 0 : index
    %8 = vector.load %arg7[%c0_6, %c0_7] : memref<32x64xf32, #tpu.memory_space<vmem>>, vector<32x64xf32>
    tpu.vector_store %arg7[%c0_6, %c0_7], %7 {strides = array<i32>} : memref<32x64xf32, #tpu.memory_space<vmem>>, vector<32x64xf32>,
    %c0_i32_8 = arith.constant 0 : i32
    %9 = arith.cmpi eq, %arg2, %c0_i32_8 : i32
    %10 = arith.extui %9 : i1 to i32
    %c0_i32_9 = arith.constant 0 : i32
    %11 = arith.cmpi ne, %10, %c0_i32_9 : i32
    scf.if %11 {
      %c0_10 = arith.constant 0 : index
      %c0_11 = arith.constant 0 : index
      %12 = vector.load %arg7[%c0_10, %c0_11] : memref<32x64xf32, #tpu.memory_space<vmem>>, vector<32x64xf32>
      %c0_12 = arith.constant 0 : index
      %c0_13 = arith.constant 0 : index
      %13 = vector.load %arg5[%c0_12, %c0_13] : memref<1x64xf32, #tpu.memory_space<vmem>>, vector<1x64xf32>
      %14 = vector.broadcast %13 : vector<1x64xf32> to vector<32x64xf32>
      %15 = arith.addf %12, %14 : vector<32x64xf32>
      %cst_14 = arith.constant 5.000000e-01 : f32
      %16 = vector.broadcast %cst_14 : f32 to vector<32x64xf32>
      %17 = arith.mulf %16, %15 : vector<32x64xf32>
      %cst_15 = arith.constant 1.41421354 : f32
      %18 = vector.broadcast %cst_15 : f32 to vector<32x64xf32>
      %19 = arith.divf %15, %18 : vector<32x64xf32>
      %20 = math.erf %19 : vector<32x64xf32>
      %cst_16 = arith.constant 1.000000e+00 : f32
      %21 = vector.broadcast %cst_16 : f32 to vector<32x64xf32>
      %22 = arith.addf %21, %20 : vector<32x64xf32>
      %23 = arith.mulf %17, %22 : vector<32x64xf32>
      %c0_17 = arith.constant 0 : index
      %c0_18 = arith.constant 0 : index
      %24 = vector.load %arg6[%c0_17, %c0_18] : memref<32x64xf32, #tpu.memory_space<vmem>>, vector<32x64xf32>
      tpu.vector_store %arg6[%c0_17, %c0_18], %23 {strides = array<i32>} : memref<32x64xf32, #tpu.memory_space<vmem>>, vector<32x64xf32>,
    } else {
    }
    return
  }
  func.func @transform_0(%arg0: i32, %arg1: i32, %arg2: i32) -> (i32, i32) {
    %c0_i32 = arith.constant 0 : i32
    return %arg0, %arg2 : i32, i32
  }
  func.func @transform_1(%arg0: i32, %arg1: i32, %arg2: i32) -> (i32, i32) {
    %c0_i32 = arith.constant 0 : i32
    return %arg2, %arg1 : i32, i32
  }
  func.func @transform_2(%arg0: i32, %arg1: i32, %arg2: i32) -> (i32, i32) {
    %c0_i32 = arith.constant 0 : i32
    %c0_i32_0 = arith.constant 0 : i32
    return %c0_i32, %arg1 : i32, i32
  }
  func.func @transform_3(%arg0: i32, %arg1: i32, %arg2: i32) -> (i32, i32) {
    %c0_i32 = arith.constant 0 : i32
    return %arg0, %arg1 : i32, i32
  }
}

module attributes {stable_mosaic.version = 11 : i64} {
  func.func @_matmul_kernel(%arg0: i32, %arg1: i32, %arg2: i32, %arg3: memref<32x64xf32, #tpu.memory_space<vmem>>, %arg4: memref<64x128xf32, #tpu.memory_space<vmem>>, %arg5: memref<1x128xf32, #tpu.memory_space<vmem>>, %arg6: memref<32x128xf32, #tpu.memory_space<vmem>>, %arg7: memref<32x128xf32, #tpu.memory_space<vmem>>) attributes {dimension_semantics = [#tpu.dimension_semantics<parallel>, #tpu.dimension_semantics<parallel>, #tpu.dimension_semantics<arbitrary>], iteration_bounds = array<i64: 1, 1, 1>, scalar_prefetch = 0 : i64, scratch_operands = 1 : i64, tpu.core_type = #tpu.core_type<tc>, window_params = [{transform_indices = @transform_0, window_bounds = array<i64: 32, 64>}, {transform_indices = @transform_1, window_bounds = array<i64: 64, 128>}, {transform_indices = @transform_2, window_bounds = array<i64: 1, 128>}, {transform_indices = @transform_3, window_bounds = array<i64: 32, 128>}]} {
    %c0_i32 = arith.constant 0 : i32
    %0 = arith.cmpi eq, %arg2, %c0_i32 : i32
    %1 = arith.extui %0 : i1 to i32
    %c0_i32_0 = arith.constant 0 : i32
    %2 = arith.cmpi ne, %1, %c0_i32_0 : i32
    scf.if %2 {
      %cst_10 = arith.constant 0.000000e+00 : f32
      %12 = vector.broadcast %cst_10 : f32 to vector<32x128xf32>
      %c0_11 = arith.constant 0 : index
      %c0_12 = arith.constant 0 : index
      %13 = vector.load %arg7[%c0_11, %c0_12] : memref<32x128xf32, #tpu.memory_space<vmem>>, vector<32x128xf32>
      tpu.vector_store %arg7[%c0_11, %c0_12], %12 {strides = array<i32>} : memref<32x128xf32, #tpu.memory_space<vmem>>, vector<32x128xf32>,
    } else {
    }
    %c0 = arith.constant 0 : index
    %c0_1 = arith.constant 0 : index
    %3 = vector.load %arg7[%c0, %c0_1] : memref<32x128xf32, #tpu.memory_space<vmem>>, vector<32x128xf32>
    %c0_2 = arith.constant 0 : index
    %c0_3 = arith.constant 0 : index
    %4 = vector.load %arg3[%c0_2, %c0_3] : memref<32x64xf32, #tpu.memory_space<vmem>>, vector<32x64xf32>
    %c0_4 = arith.constant 0 : index
    %c0_5 = arith.constant 0 : index
    %5 = vector.load %arg4[%c0_4, %c0_5] : memref<64x128xf32, #tpu.memory_space<vmem>>, vector<64x128xf32>
    %cst = arith.constant dense<0.000000e+00> : vector<32x128xf32>
    %6 = tpu.matmul %4, %5, %cst {dimension_numbers = #tpu.dot_dimension_numbers<[1], [0], [0], [1], [0, 0, 1, 1], [], []>} : vector<32x64xf32>, vector<64x128xf32>, vector<32x128xf32> -> vector<32x128xf32>
    %7 = arith.addf %3, %6 : vector<32x128xf32>
    %c0_6 = arith.constant 0 : index
    %c0_7 = arith.constant 0 : index
    %8 = vector.load %arg7[%c0_6, %c0_7] : memref<32x128xf32, #tpu.memory_space<vmem>>, vector<32x128xf32>
    tpu.vector_store %arg7[%c0_6, %c0_7], %7 {strides = array<i32>} : memref<32x128xf32, #tpu.memory_space<vmem>>, vector<32x128xf32>,
    %c0_i32_8 = arith.constant 0 : i32
    %9 = arith.cmpi eq, %arg2, %c0_i32_8 : i32
    %10 = arith.extui %9 : i1 to i32
    %c0_i32_9 = arith.constant 0 : i32
    %11 = arith.cmpi ne, %10, %c0_i32_9 : i32
    scf.if %11 {
      %c0_10 = arith.constant 0 : index
      %c0_11 = arith.constant 0 : index
      %12 = vector.load %arg7[%c0_10, %c0_11] : memref<32x128xf32, #tpu.memory_space<vmem>>, vector<32x128xf32>
      %c0_12 = arith.constant 0 : index
      %c0_13 = arith.constant 0 : index
      %13 = vector.load %arg5[%c0_12, %c0_13] : memref<1x128xf32, #tpu.memory_space<vmem>>, vector<1x128xf32>
      %14 = vector.broadcast %13 : vector<1x128xf32> to vector<32x128xf32>
      %15 = arith.addf %12, %14 : vector<32x128xf32>
      %c0_14 = arith.constant 0 : index
      %c0_15 = arith.constant 0 : index
      %16 = vector.load %arg6[%c0_14, %c0_15] : memref<32x128xf32, #tpu.memory_space<vmem>>, vector<32x128xf32>
      tpu.vector_store %arg6[%c0_14, %c0_15], %15 {strides = array<i32>} : memref<32x128xf32, #tpu.memory_space<vmem>>, vector<32x128xf32>,
    } else {
    }
    return
  }
  func.func @transform_0(%arg0: i32, %arg1: i32, %arg2: i32) -> (i32, i32) {
    %c0_i32 = arith.constant 0 : i32
    return %arg0, %arg2 : i32, i32
  }
  func.func @transform_1(%arg0: i32, %arg1: i32, %arg2: i32) -> (i32, i32) {
    %c0_i32 = arith.constant 0 : i32
    return %arg2, %arg1 : i32, i32
  }
  func.func @transform_2(%arg0: i32, %arg1: i32, %arg2: i32) -> (i32, i32) {
    %c0_i32 = arith.constant 0 : i32
    %c0_i32_0 = arith.constant 0 : i32
    return %c0_i32, %arg1 : i32, i32
  }
  func.func @transform_3(%arg0: i32, %arg1: i32, %arg2: i32) -> (i32, i32) {
    %c0_i32 = arith.constant 0 : i32
    return %arg0, %arg1 : i32, i32
  }
}

</mosaic_0001>

<bundles_post_ra>
// kernel: tile.8
= control target key start
LH: loop header
LB: loop body
LE: loop exit
PB: predicated region body
PF: predicated region fallthrough
CT: control target
= control target key end

     0   :  { %s22_s0 = inlined_call_operand.vmem [shape: f32[16], index: 0, kind: input, shape index: {}]   ;;  %s23_s1 = inlined_call_operand.vmem [shape: f32[4,16], index: 1, kind: output, shape index: {}]  }
   0x1   :  { %v4_v0 = vld [vmem:[%s22_s0] ss:$0 sm:$0xff] }
   0x2   :  { %5 = vst [vmem:[%s23_s1] sm:$0xf] %v4_v0 }

// kernel: mul.12
= control target key start
LH: loop header
LB: loop body
LE: loop exit
PB: predicated region body
PF: predicated region fallthrough
CT: control target
= control target key end

     0   :  { %s34_s0 = inlined_call_operand.vmem [shape: f32[64,1], index: 0, kind: input, shape index: {}]   ;;  %s35_s1 = inlined_call_operand.vmem [shape: f32[64,1], index: 1, kind: input, shape index: {}]   ;;  %s36_s2 = inlined_call_operand.vmem [shape: f32[64,1], index: 2, kind: output, shape index: {}]  }
   0x1   :  { %v3_v0 = vld [vmem:[%s34_s0] sm:$0x1] }
   0x2   :  { %v4_v1 = vld [vmem:[%s35_s1] sm:$0x1] }
   0x3   :  { %v7_v2 = vmul.f32 %v4_v1, %v3_v0 }
   0x5   :  { %9 = vst [vmem:[%s36_s2] sm:$0x1] %v7_v2 }

// kernel: model_forward.13
= control target key start
LH: loop header
LB: loop body
LE: loop exit
PB: predicated region body
PF: predicated region fallthrough
CT: control target
= control target key end

     0   :  { %vm81_vm0 = vcmask 1043456   ;;  %vm56_vm1 = vcmask 31744   ;;  %v428_v3 = vmov 0   ;;  %vm30_vm2 = vcmask 261120   ;;  %s619_s1 = inlined_call_operand.vmem [shape: f32[4,32], index: 1, kind: input, shape index: {}]   ;;  %s620_s0 = inlined_call_operand.vmem [shape: f32[64,4], index: 0, kind: input, shape index: {}]   ;;  %s621_s3 = inlined_call_operand.vmem [shape: f32[64,1], index: 3, kind: input, shape index: {}]   ;;  %s622_s4 = inlined_call_operand.vmem [shape: f32[64,1], index: 4, kind: input, shape index: {}]   ;;  %s623_s5 = inlined_call_operand.vmem [shape: f32[1,32], index: 5, kind: input, shape index: {}]   ;;  %s624_s2 = inlined_call_operand.vmem [shape: f32[1,32], index: 2, kind: input, shape index: {}]   ;;  %s625_s6 = inlined_call_operand.vmem [shape: f32[1,32], index: 6, kind: input, shape index: {}]   ;;  %s626_s7 = inlined_call_operand.vmem [shape: f32[64,32], index: 7, kind: output, shape index: {}]  }
   0x1   :  { %v55_v0 = vld [vmem:[%s619_s1] sm:$0xf]  ;;  %427 = vset.pattern.permute.xlu1 %v428_v3  ;;  %426 = vset.pattern.permute.xlu0 %v428_v3  ;;  %v48_v4 = vld [vmem:[%s620_s0 + $0x8] sm:$0xff]  ;;  %v49_v6 = vld [vmem:[%s620_s0 + $0x10] sm:$0xff]  ;;  %v429_v26 = vmov 0.0  }
   0x2   :  { %v47_v1 = vld [vmem:[%s620_s0] sm:$0xff]  ;;  %408 = vmatprep.subr.msk.mxu0 %vm81_vm0, %v55_v0  ;;  %422 = vmatprep.subr.msk.mxu1 %vm81_vm0, %v55_v0  ;;  %v52_v5 = vld [vmem:[%s620_s0 + $0x28] sm:$0xff]  ;;  %v53_v7 = vld [vmem:[%s620_s0 + $0x30] sm:$0xff]  ;;  %32 = vst.msk [vmem:[#allocation2 + $0x8] sm:$0xff] %vm30_vm2, %v429_v26 }
   0x3   :  { %v51_v2 = vld [vmem:[%s620_s0 + $0x20] sm:$0xff]  ;;  %409 = vmatpush3.msk.msra.mxu0 %vm81_vm0, %v55_v0  ;;  %423 = vmatpush3.msk.msra.mxu1 %vm81_vm0, %v55_v0  ;;  %v235_v8 = vld [vmem:[%s621_s3 + $0x10] sm:$0xff]  ;;  %v50_v10 = vld [vmem:[%s620_s0 + $0x18] sm:$0xff]  ;;  %31 = vst.msk [vmem:[#allocation2] sm:$0xff] %vm30_vm2, %v429_v26 }
   0x4   :  { %410 = vmatprep.mubr.msk.f32.mxu0 %vm56_vm1, %v47_v1  ;;  %416 = vmatprep.mubr.msk.f32.mxu1 %vm56_vm1, %v51_v2  ;;  %v233_v9 = vld [vmem:[%s621_s3] sm:$0xff]  ;;  %v54_v11 = vld [vmem:[%s620_s0 + $0x38] sm:$0xff]  ;;  %v234_v13 = vld [vmem:[%s621_s3 + $0x8] sm:$0xff]  ;;  %33 = vst.msk [vmem:[#allocation2 + $0x10] sm:$0xff] %vm30_vm2, %v429_v26 }
   0x5   :  { %411 = vmatmul.mubr.msk.f32.vlgmr.msra.gmra.mrb[0].mxu0 %vm56_vm1, %v48_v4  ;;  %417 = vmatmul.mubr.msk.f32.vlgmr.msra.gmra.mrb[0].mxu1 %vm56_vm1, %v52_v5  ;;  %v236_v12 = vld [vmem:[%s621_s3 + $0x18] sm:$0xff]  ;;  %v238_v14 = vld [vmem:[%s621_s3 + $0x28] sm:$0xff]  ;;  %v237_v15 = vld [vmem:[%s621_s3 + $0x20] sm:$0xff]  ;;  %34 = vst.msk [vmem:[#allocation2 + $0x18] sm:$0xff] %vm30_vm2, %v429_v26 }
   0x6   :  { %413 = vmatprep.mubr.msk.f32.mxu0 %vm56_vm1, %v49_v6  ;;  %419 = vmatprep.mubr.msk.f32.mxu1 %vm56_vm1, %v53_v7  ;;  %v240_v16 = vld [vmem:[%s621_s3 + $0x38] sm:$0xff]  ;;  %v239_v17 = vld [vmem:[%s621_s3 + $0x30] sm:$0xff]  ;;  %v305_v18 = vld [vmem:[%s622_s4 + $0x8] sm:$0xff]  ;;  %35 = vst.msk [vmem:[#allocation2 + $0x20] sm:$0xff] %vm30_vm2, %v429_v26 }
   0x7   :  { %254 = vperm.xlu1 %427, %v235_v8   ;;  %244 = vperm.xlu0 %426, %v233_v9   ;;  %v304_v19 = vld [vmem:[%s622_s4] sm:$0xff]  ;;  %v307_v20 = vld [vmem:[%s622_s4 + $0x18] sm:$0xff]  ;;  %v306_v21 = vld [vmem:[%s622_s4 + $0x10] sm:$0xff]  ;;  %36 = vst.msk [vmem:[#allocation2 + $0x28] sm:$0xff] %vm30_vm2, %v429_v26 }
   0x8   :  { %v309_v22 = vld [vmem:[%s622_s4 + $0x28] sm:$0xff]  ;;  %v308_v23 = vld [vmem:[%s622_s4 + $0x20] sm:$0xff]  ;;  %v311_v24 = vld [vmem:[%s622_s4 + $0x38] sm:$0xff]  ;;  %37 = vst.msk [vmem:[#allocation2 + $0x30] sm:$0xff] %vm30_vm2, %v429_v26 }
   0x9   :  { %414 = vmatmul.mubr.msk.f32.gmra.mrb[2].mxu0 %vm56_vm1, %v50_v10  ;;  %420 = vmatmul.mubr.msk.f32.gmra.mrb[2].mxu1 %vm56_vm1, %v54_v11  ;;  %v310_v25 = vld [vmem:[%s622_s4 + $0x30] sm:$0xff]  ;;  %38 = vst.msk [vmem:[#allocation2 + $0x38] sm:$0xff] %vm30_vm2, %v429_v26  ;;  %v40_v37 = vld [vmem:[#allocation2 + $0x8] sm:$0xff]  ;;  %v397_v63 = vld [vmem:[%s623_s5] ss:$0 sm:$0xff] }
   0xa   :  { %v39_v39 = vld [vmem:[#allocation2] sm:$0xff] }
   0xb   :  { %259 = vperm.xlu1 %427, %v236_v12   ;;  %249 = vperm.xlu0 %426, %v234_v13   ;;  %v41_v53 = vld [vmem:[#allocation2 + $0x10] sm:$0xff]  ;;  %v396_v1 = vld [vmem:[%s624_s2] ss:$0 sm:$0xff] }
   0xc   :  { %v42_v50 = vld [vmem:[#allocation2 + $0x18] sm:$0xff]  ;;  %v398_v7 = vld [vmem:[%s625_s6] ss:$0 sm:$0xff] }
   0xd   :  { %v43_v40 = vld [vmem:[#allocation2 + $0x20] sm:$0xff] }
   0xe   :  { %v44_v38 = vld [vmem:[#allocation2 + $0x28] sm:$0xff] }
   0xf   :  { %269 = vperm.xlu1 %427, %v238_v14   ;;  %264 = vperm.xlu0 %426, %v237_v15   ;;  %v45_v54 = vld [vmem:[#allocation2 + $0x30] sm:$0xff] }
  0x10   :  { %v46_v51 = vld [vmem:[#allocation2 + $0x38] sm:$0xff] }
  0x13   :  { %279 = vperm.xlu1 %427, %v240_v16   ;;  %274 = vperm.xlu0 %426, %v239_v17  }
  0x17   :  { %320 = vperm.xlu1 %427, %v305_v18   ;;  %315 = vperm.xlu0 %426, %v304_v19  }
  0x1b   :  { %330 = vperm.xlu1 %427, %v307_v20   ;;  %325 = vperm.xlu0 %426, %v306_v21  }
  0x1f   :  { %340 = vperm.xlu1 %427, %v309_v22   ;;  %335 = vperm.xlu0 %426, %v308_v23  }
  0x23   :  { %350 = vperm.xlu1 %427, %v311_v24   ;;  %345 = vperm.xlu0 %426, %v310_v25  }
  0x86   :  { %v255_v27 = vpop.permute.xlu1 %254  ;;  %v245_v28 = vpop.permute.xlu0 %244 }
  0x87   :  { %v290_v3 = vmul.f32 %v397_v63, %v255_v27  ;;  %v288_v4 = vmul.f32 %v397_v63, %v245_v28 }
  0x8a   :  { %v260_v29 = vpop.permute.xlu1 %259  ;;  %v250_v30 = vpop.permute.xlu0 %249 }
  0x8b   :  { %v291_v5 = vmul.f32 %v397_v63, %v260_v29  ;;  %v289_v6 = vmul.f32 %v397_v63, %v250_v30 }
  0x8e   :  { %v270_v31 = vpop.permute.xlu1 %269  ;;  %v265_v32 = vpop.permute.xlu0 %264 }
  0x8f   :  { %v293_v10 = vmul.f32 %v397_v63, %v270_v31  ;;  %v292_v11 = vmul.f32 %v397_v63, %v265_v32 }
  0x92   :  { %v280_v33 = vpop.permute.xlu1 %279  ;;  %v275_v34 = vpop.permute.xlu0 %274 }
  0x93   :  { %v295_v16 = vmul.f32 %v397_v63, %v280_v33  ;;  %v294_v17 = vmul.f32 %v397_v63, %v275_v34 }
  0x96   :  { %v321_v35 = vpop.permute.xlu1 %320  ;;  %v561_v36 = vpop.permute.xlu0 %315 }
  0x97   :  { %v360_v20 = vmul.f32 %v398_v7, %v321_v35  ;;  %v359_v24 = vmul.f32 %v398_v7, %v561_v36 }
  0x9a   :  { %v563_v47 = vpop.permute.xlu1 %330  ;;  %v565_v52 = vpop.permute.xlu0 %325 }
  0x9e   :  { %v341_v0 = vpop.permute.xlu1 %340  ;;  %v336_v2 = vpop.permute.xlu0 %335 }
  0x9f   :  { %v364_v21 = vmul.f32 %v398_v7, %v341_v0  ;;  %v363_v25 = vmul.f32 %v398_v7, %v336_v2 }
  0xa2   :  { %v351_v26 = vpop.permute.xlu1 %350  ;;  %v346_v31 = vpop.permute.xlu0 %345 }
  0xa3   :  { %v366_v36 = vmul.f32 %v398_v7, %v351_v26 }
  0xd8   :  { %v412_v41 = vpop.f32.mrb[0].mxu0  ;;  %v418_v42 = vpop.f32.mrb[0].mxu1 }
  0xd9   :  { %v191_v43 = vadd.f32 %v412_v41, %v40_v37  ;;  %v195_v44 = vadd.f32 %v418_v42, %v44_v38  ;;  %v151_v45 = vpop.f32.mrb[1].mxu0  ;;  %v171_v46 = vpop.f32.mrb[1].mxu1 }
  0xda   :  { %v190_v48 = vadd.f32 %v151_v45, %v39_v39  ;;  %v194_v49 = vadd.f32 %v171_v46, %v43_v40  ;;  %v361_v46 = vmul.f32 %v398_v7, %v565_v52 }
  0xdb   :  { %200 = vst.msk [vmem:[#allocation2 + $0x8] sm:$0xff] %vm30_vm2, %v191_v43  ;;  %204 = vst.msk [vmem:[#allocation2 + $0x28] sm:$0xff] %vm30_vm2, %v195_v44  ;;  %v362_v43 = vmul.f32 %v398_v7, %v563_v47 }
  0xdc   :  { %199 = vst.msk [vmem:[#allocation2] sm:$0xff] %vm30_vm2, %v190_v48  ;;  %203 = vst.msk [vmem:[#allocation2 + $0x20] sm:$0xff] %vm30_vm2, %v194_v49  ;;  %v415_v55 = vpop.f32.mrb[2].mxu0  ;;  %v421_v56 = vpop.f32.mrb[2].mxu1  ;;  %v365_v48 = vmul.f32 %v398_v7, %v346_v31 }
  0xdd   :  { %v193_v57 = vadd.f32 %v415_v55, %v42_v50  ;;  %v197_v58 = vadd.f32 %v421_v56, %v46_v51  ;;  %v161_v59 = vpop.f32.mrb[3].mxu0  ;;  %v181_v60 = vpop.f32.mrb[3].mxu1 }
  0xde   :  { %v192_v61 = vadd.f32 %v161_v59, %v41_v53  ;;  %v196_v62 = vadd.f32 %v181_v60, %v45_v54 }
  0xdf   :  { %202 = vst.msk [vmem:[#allocation2 + $0x18] sm:$0xff] %vm30_vm2, %v193_v57  ;;  %206 = vst.msk [vmem:[#allocation2 + $0x38] sm:$0xff] %vm30_vm2, %v197_v58 }
  0xe0   :  { %201 = vst.msk [vmem:[#allocation2 + $0x10] sm:$0xff] %vm30_vm2, %v192_v61  ;;  %205 = vst.msk [vmem:[#allocation2 + $0x30] sm:$0xff] %vm30_vm2, %v196_v62 }
  0xe2   :  { %v211_v8 = vld [vmem:[#allocation2 + $0x8] sm:$0xff] }
  0xe3   :  { %v215_v9 = vld [vmem:[#allocation2 + $0x28] sm:$0xff]  ;;  %v226_v12 = vadd.f32 %v396_v1, %v211_v8  ;;  %v210_v14 = vld [vmem:[#allocation2] sm:$0xff] }
  0xe4   :  { %v230_v13 = vadd.f32 %v396_v1, %v215_v9  ;;  %v214_v15 = vld [vmem:[#allocation2 + $0x20] sm:$0xff]  ;;  %v225_v18 = vadd.f32 %v396_v1, %v210_v14 }
  0xe5   :  { %v229_v19 = vadd.f32 %v396_v1, %v214_v15  ;;  %v297_v22 = vadd.f32 %v289_v6, %v226_v12 }
  0xe6   :  { %v301_v23 = vadd.f32 %v293_v10, %v230_v13  ;;  %v296_v27 = vadd.f32 %v288_v4, %v225_v18  ;;  %v213_v29 = vld [vmem:[#allocation2 + $0x18] sm:$0xff] }
  0xe7   :  { %v300_v28 = vadd.f32 %v292_v11, %v229_v19  ;;  %v217_v30 = vld [vmem:[#allocation2 + $0x38] sm:$0xff]  ;;  %v368_v32 = vadd.f32 %v360_v20, %v297_v22  ;;  %v228_v38 = vadd.f32 %v396_v1, %v213_v29  ;;  %v212_v34 = vld [vmem:[#allocation2 + $0x10] sm:$0xff] }
  0xe8   :  { %v372_v37 = vadd.f32 %v364_v21, %v301_v23  ;;  %v232_v33 = vadd.f32 %v396_v1, %v217_v30  ;;  %v216_v39 = vld [vmem:[#allocation2 + $0x30] sm:$0xff]  ;;  %v367_v40 = vadd.f32 %v359_v24, %v296_v27  ;;  %v227_v41 = vadd.f32 %v396_v1, %v212_v34 }
  0xe9   :  { %v371_v35 = vadd.f32 %v363_v25, %v300_v28  ;;  %v231_v42 = vadd.f32 %v396_v1, %v216_v39  ;;  %376 = vst.msk [vmem:[%s626_s7 + $0x8] sm:$0xff] %vm30_vm2, %v368_v32  ;;  %v299_v44 = vadd.f32 %v291_v5, %v228_v38 }
  0xea   :  { %380 = vst.msk [vmem:[%s626_s7 + $0x28] sm:$0xff] %vm30_vm2, %v372_v37  ;;  %v303_v45 = vadd.f32 %v295_v16, %v232_v33  ;;  %375 = vst.msk [vmem:[%s626_s7] sm:$0xff] %vm30_vm2, %v367_v40  ;;  %v298_v47 = vadd.f32 %v290_v3, %v227_v41 }
  0xeb   :  { %379 = vst.msk [vmem:[%s626_s7 + $0x20] sm:$0xff] %vm30_vm2, %v371_v35  ;;  %v302_v49 = vadd.f32 %v294_v17, %v231_v42  ;;  %v370_v50 = vadd.f32 %v362_v43, %v299_v44 }
  0xec   :  { %v374_v51 = vadd.f32 %v366_v36, %v303_v45  ;;  %v369_v53 = vadd.f32 %v361_v46, %v298_v47 }
  0xed   :  { %v373_v54 = vadd.f32 %v365_v48, %v302_v49  ;;  %378 = vst.msk [vmem:[%s626_s7 + $0x18] sm:$0xff] %vm30_vm2, %v370_v50 }
  0xee   :  { %382 = vst.msk [vmem:[%s626_s7 + $0x38] sm:$0xff] %vm30_vm2, %v374_v51  ;;  %377 = vst.msk [vmem:[%s626_s7 + $0x10] sm:$0xff] %vm30_vm2, %v369_v53 }
  0xef   :  { %381 = vst.msk [vmem:[%s626_s7 + $0x30] sm:$0xff] %vm30_vm2, %v373_v54 }

// kernel: model_forward.14
= control target key start
LH: loop header
LB: loop body
LE: loop exit
PB: predicated region body
PF: predicated region fallthrough
CT: control target
= control target key end

     0   :  { %vm47_vm0 = vcmask 261120   ;;  %vm18_vm1 = vcmask 785408   ;;  %v286_v3 = vmov 0.0   ;;  %s402_s1 = inlined_call_operand.vmem [shape: f32[32,96], index: 1, kind: input, shape index: {}]   ;;  %s403_s0 = inlined_call_operand.vmem [shape: f32[64,32], index: 0, kind: input, shape index: {}]   ;;  %s404_s2 = inlined_call_operand.vmem [shape: f32[1,96], index: 2, kind: input, shape index: {}]   ;;  %s405_s3 = inlined_call_operand.vmem [shape: f32[64,96], index: 3, kind: output, shape index: {}]  }
   0x1   :  { %v43_v0 = vld [vmem:[%s402_s1] sm:$0xff]  ;;  %v44_v1 = vld [vmem:[%s402_s1 + $0x8] sm:$0xff]  ;;  %v45_v2 = vld [vmem:[%s402_s1 + $0x10] sm:$0xff]  ;;  %20 = vst.msk [vmem:[#allocation2 + $0x8] sm:$0xff] %vm18_vm1, %v286_v3 }
   0x2   :  { %19 = vst.msk [vmem:[#allocation2] sm:$0xff] %vm18_vm1, %v286_v3  ;;  %21 = vst.msk [vmem:[#allocation2 + $0x10] sm:$0xff] %vm18_vm1, %v286_v3  ;;  %v273_v4 = vpack.c.bf16 %v44_v1, %v43_v0  ;;  %v46_v5 = vld [vmem:[%s402_s1 + $0x18] sm:$0xff]  ;;  %v35_v6 = vld [vmem:[%s403_s0] sm:$0xff] }
   0x3   :  { %22 = vst.msk [vmem:[#allocation2 + $0x18] sm:$0xff] %vm18_vm1, %v286_v3  ;;  %23 = vst.msk [vmem:[#allocation2 + $0x20] sm:$0xff] %vm18_vm1, %v286_v3  ;;  %v39_v7 = vld [vmem:[%s403_s0 + $0x20] sm:$0xff]  ;;  %v277_v8 = vpack.c.bf16 %v46_v5, %v45_v2  ;;  %261 = vmatprep.mubr.msk.f32.mxu0 %vm47_vm0, %v35_v6  ;;  %v36_v9 = vld [vmem:[%s403_s0 + $0x8] sm:$0xff] }
   0x4   :  { %24 = vst.msk [vmem:[#allocation2 + $0x28] sm:$0xff] %vm18_vm1, %v286_v3  ;;  %25 = vst.msk [vmem:[#allocation2 + $0x30] sm:$0xff] %vm18_vm1, %v286_v3  ;;  %267 = vmatprep.mubr.msk.f32.mxu1 %vm47_vm0, %v39_v7  ;;  %274 = vmatprep.subr.bf16.mxu0 %v273_v4  ;;  %v40_v10 = vld [vmem:[%s403_s0 + $0x28] sm:$0xff]  ;;  %v37_v11 = vld [vmem:[%s403_s0 + $0x10] sm:$0xff] }
   0x5   :  { %26 = vst.msk [vmem:[#allocation2 + $0x38] sm:$0xff] %vm18_vm1, %v286_v3  ;;  %281 = vmatprep.subr.bf16.mxu1 %v273_v4  ;;  %276 = vmatpush3.bf16.msra.mxu0 %v273_v4  ;;  %v41_v12 = vld [vmem:[%s403_s0 + $0x30] sm:$0xff]  ;;  %v38_v13 = vld [vmem:[%s403_s0 + $0x18] sm:$0xff]  ;;  %v240_v39 = vld [vmem:[%s404_s2] ss:$0 sm:$0xff] }
   0x6   :  { %283 = vmatpush3.bf16.msra.mxu1 %v273_v4  ;;  %278 = vmatprep.subr.bf16.mxu0 %v277_v8  ;;  %v42_v14 = vld [vmem:[%s403_s0 + $0x38] sm:$0xff] }
   0x7   :  { %282 = vmatprep.subr.bf16.mxu1 %v277_v8 }
   0x8   :  { %v28_v15 = vld [vmem:[#allocation2 + $0x8] sm:$0xff] }
   0x9   :  { %280 = vmatpush3.bf16.msra.mxu0 %v277_v8  ;;  %v27_v17 = vld [vmem:[#allocation2] sm:$0xff]  ;;  %v29_v29 = vld [vmem:[#allocation2 + $0x10] sm:$0xff] }
   0xa   :  { %284 = vmatpush3.bf16.msra.mxu1 %v277_v8  ;;  %v31_v18 = vld [vmem:[#allocation2 + $0x20] sm:$0xff]  ;;  %v30_v27 = vld [vmem:[#allocation2 + $0x18] sm:$0xff] }
   0xb   :  { %v32_v16 = vld [vmem:[#allocation2 + $0x28] sm:$0xff]  ;;  %v33_v30 = vld [vmem:[#allocation2 + $0x30] sm:$0xff] }
   0xc   :  { %262 = vmatmul.mubr.msk.f32.vlgmr.msra.gmra.mrb[0].mxu0 %vm47_vm0, %v36_v9  ;;  %v34_v28 = vld [vmem:[#allocation2 + $0x38] sm:$0xff] }
   0xd   :  { %268 = vmatmul.mubr.msk.f32.vlgmr.msra.gmra.mrb[0].mxu1 %vm47_vm0, %v40_v10  ;;  %264 = vmatprep.mubr.msk.f32.mxu0 %vm47_vm0, %v37_v11 }
   0xe   :  { %270 = vmatprep.mubr.msk.f32.mxu1 %vm47_vm0, %v41_v12 }
  0x10   :  { %265 = vmatmul.mubr.msk.f32.gmra.mrb[2].mxu0 %vm47_vm0, %v38_v13 }
  0x11   :  { %271 = vmatmul.mubr.msk.f32.gmra.mrb[2].mxu1 %vm47_vm0, %v42_v14 }
  0xdf   :  { %v263_v19 = vpop.f32.mrb[0].mxu0 }
  0xe0   :  { %v269_v20 = vpop.f32.mrb[0].mxu1  ;;  %v178_v21 = vadd.f32 %v263_v19, %v28_v15  ;;  %v138_v23 = vpop.f32.mrb[1].mxu0 }
  0xe1   :  { %v182_v22 = vadd.f32 %v269_v20, %v32_v16  ;;  %v158_v24 = vpop.f32.mrb[1].mxu1  ;;  %v177_v25 = vadd.f32 %v138_v23, %v27_v17 }
  0xe2   :  { %v181_v26 = vadd.f32 %v158_v24, %v31_v18  ;;  %187 = vst.msk [vmem:[#allocation2 + $0x8] sm:$0xff] %vm18_vm1, %v178_v21 }
  0xe3   :  { %191 = vst.msk [vmem:[#allocation2 + $0x28] sm:$0xff] %vm18_vm1, %v182_v22  ;;  %186 = vst.msk [vmem:[#allocation2] sm:$0xff] %vm18_vm1, %v177_v25  ;;  %v266_v31 = vpop.f32.mrb[2].mxu0 }
  0xe4   :  { %190 = vst.msk [vmem:[#allocation2 + $0x20] sm:$0xff] %vm18_vm1, %v181_v26  ;;  %v272_v32 = vpop.f32.mrb[2].mxu1  ;;  %v180_v33 = vadd.f32 %v266_v31, %v30_v27  ;;  %v148_v35 = vpop.f32.mrb[3].mxu0 }
  0xe5   :  { %v184_v34 = vadd.f32 %v272_v32, %v34_v28  ;;  %v168_v36 = vpop.f32.mrb[3].mxu1  ;;  %v179_v37 = vadd.f32 %v148_v35, %v29_v29 }
  0xe6   :  { %v183_v38 = vadd.f32 %v168_v36, %v33_v30  ;;  %189 = vst.msk [vmem:[#allocation2 + $0x18] sm:$0xff] %vm18_vm1, %v180_v33 }
  0xe7   :  { %193 = vst.msk [vmem:[#allocation2 + $0x38] sm:$0xff] %vm18_vm1, %v184_v34  ;;  %188 = vst.msk [vmem:[#allocation2 + $0x10] sm:$0xff] %vm18_vm1, %v179_v37 }
  0xe8   :  { %192 = vst.msk [vmem:[#allocation2 + $0x30] sm:$0xff] %vm18_vm1, %v183_v38 }
  0xe9   :  { %v198_v40 = vld [vmem:[#allocation2 + $0x8] sm:$0xff] }
  0xea   :  { %v202_v41 = vld [vmem:[#allocation2 + $0x28] sm:$0xff]  ;;  %v213_v42 = vadd.f32 %v240_v39, %v198_v40  ;;  %v197_v44 = vld [vmem:[#allocation2] sm:$0xff] }
  0xeb   :  { %v217_v43 = vadd.f32 %v240_v39, %v202_v41  ;;  %v201_v45 = vld [vmem:[#allocation2 + $0x20] sm:$0xff]  ;;  %v212_v46 = vadd.f32 %v240_v39, %v197_v44 }
  0xec   :  { %v216_v47 = vadd.f32 %v240_v39, %v201_v45  ;;  %221 = vst.msk [vmem:[%s405_s3 + $0x8] sm:$0xff] %vm18_vm1, %v213_v42 }
  0xed   :  { %225 = vst.msk [vmem:[%s405_s3 + $0x28] sm:$0xff] %vm18_vm1, %v217_v43  ;;  %220 = vst.msk [vmem:[%s405_s3] sm:$0xff] %vm18_vm1, %v212_v46  ;;  %v200_v48 = vld [vmem:[#allocation2 + $0x18] sm:$0xff] }
  0xee   :  { %224 = vst.msk [vmem:[%s405_s3 + $0x20] sm:$0xff] %vm18_vm1, %v216_v47  ;;  %v204_v49 = vld [vmem:[#allocation2 + $0x38] sm:$0xff]  ;;  %v215_v50 = vadd.f32 %v240_v39, %v200_v48  ;;  %v199_v52 = vld [vmem:[#allocation2 + $0x10] sm:$0xff] }
  0xef   :  { %v219_v51 = vadd.f32 %v240_v39, %v204_v49  ;;  %v203_v53 = vld [vmem:[#allocation2 + $0x30] sm:$0xff]  ;;  %v214_v54 = vadd.f32 %v240_v39, %v199_v52 }
  0xf0   :  { %v218_v55 = vadd.f32 %v240_v39, %v203_v53  ;;  %223 = vst.msk [vmem:[%s405_s3 + $0x18] sm:$0xff] %vm18_vm1, %v215_v50 }
  0xf1   :  { %227 = vst.msk [vmem:[%s405_s3 + $0x38] sm:$0xff] %vm18_vm1, %v219_v51  ;;  %222 = vst.msk [vmem:[%s405_s3 + $0x10] sm:$0xff] %vm18_vm1, %v214_v54 }
  0xf2   :  { %226 = vst.msk [vmem:[%s405_s3 + $0x30] sm:$0xff] %vm18_vm1, %v218_v55 }

// kernel: model_forward.16
= control target key start
LH: loop header
LB: loop body
LE: loop exit
PB: predicated region body
PF: predicated region fallthrough
CT: control target
= control target key end

     0   :  { %vm27_vm0 = vcmask 261120   ;;  %v463_v3 = vmov 0.0   ;;  %s680_s1 = inlined_call_operand.vmem [shape: f32[32,32], index: 1, kind: input, shape index: {}]   ;;  %s681_s0 = inlined_call_operand.vmem [shape: f32[64,32], index: 0, kind: input, shape index: {}]   ;;  %s682_s2 = inlined_call_operand.vmem [shape: f32[1,32], index: 2, kind: input, shape index: {}]   ;;  %s683_s3 = inlined_call_operand.vmem [shape: f32[64,32], index: 3, kind: input, shape index: {}]   ;;  %s684_s4 = inlined_call_operand.vmem [shape: f32[1,32], index: 4, kind: input, shape index: {}]   ;;  %s685_s5 = inlined_call_operand.vmem [shape: f32[1,32], index: 5, kind: input, shape index: {}]   ;;  %s686_s6 = inlined_call_operand.vmem [shape: f32[64,32], index: 6, kind: output, shape index: {}]  }
   0x1   :  { %v52_v0 = vld [vmem:[%s680_s1] sm:$0xff]  ;;  %v53_v1 = vld [vmem:[%s680_s1 + $0x8] sm:$0xff]  ;;  %v54_v2 = vld [vmem:[%s680_s1 + $0x10] sm:$0xff]  ;;  %29 = vst.msk [vmem:[#allocation2 + $0x8] sm:$0xff] %vm27_vm0, %v463_v3 }
   0x2   :  { %28 = vst.msk [vmem:[#allocation2] sm:$0xff] %vm27_vm0, %v463_v3  ;;  %30 = vst.msk [vmem:[#allocation2 + $0x10] sm:$0xff] %vm27_vm0, %v463_v3  ;;  %v434_v4 = vpack.c.bf16 %v53_v1, %v52_v0  ;;  %v55_v5 = vld [vmem:[%s680_s1 + $0x18] sm:$0xff]  ;;  %v44_v6 = vld [vmem:[%s681_s0] sm:$0xff] }
   0x3   :  { %31 = vst.msk [vmem:[#allocation2 + $0x18] sm:$0xff] %vm27_vm0, %v463_v3  ;;  %32 = vst.msk [vmem:[#allocation2 + $0x20] sm:$0xff] %vm27_vm0, %v463_v3  ;;  %v48_v7 = vld [vmem:[%s681_s0 + $0x20] sm:$0xff]  ;;  %v438_v8 = vpack.c.bf16 %v55_v5, %v54_v2  ;;  %422 = vmatprep.mubr.msk.f32.mxu0 %vm27_vm0, %v44_v6  ;;  %v45_v9 = vld [vmem:[%s681_s0 + $0x8] sm:$0xff] }
   0x4   :  { %33 = vst.msk [vmem:[#allocation2 + $0x28] sm:$0xff] %vm27_vm0, %v463_v3  ;;  %34 = vst.msk [vmem:[#allocation2 + $0x30] sm:$0xff] %vm27_vm0, %v463_v3  ;;  %428 = vmatprep.mubr.msk.f32.mxu1 %vm27_vm0, %v48_v7  ;;  %435 = vmatprep.subr.bf16.mxu0 %v434_v4  ;;  %v49_v10 = vld [vmem:[%s681_s0 + $0x28] sm:$0xff]  ;;  %v46_v11 = vld [vmem:[%s681_s0 + $0x10] sm:$0xff] }
   0x5   :  { %35 = vst.msk [vmem:[#allocation2 + $0x38] sm:$0xff] %vm27_vm0, %v463_v3  ;;  %442 = vmatprep.subr.bf16.mxu1 %v434_v4  ;;  %437 = vmatpush3.bf16.msra.mxu0 %v434_v4  ;;  %v50_v12 = vld [vmem:[%s681_s0 + $0x30] sm:$0xff]  ;;  %v47_v13 = vld [vmem:[%s681_s0 + $0x18] sm:$0xff]  ;;  %v399_v39 = vld [vmem:[%s682_s2] ss:$0 sm:$0xff] }
   0x6   :  { %444 = vmatpush3.bf16.msra.mxu1 %v434_v4  ;;  %439 = vmatprep.subr.bf16.mxu0 %v438_v8  ;;  %v51_v14 = vld [vmem:[%s681_s0 + $0x38] sm:$0xff]  ;;  %v233_v40 = vld [vmem:[%s683_s3 + $0x28] sm:$0xff]  ;;  %v228_v49 = vld [vmem:[%s683_s3] sm:$0xff] }
   0x7   :  { %443 = vmatprep.subr.bf16.mxu1 %v438_v8  ;;  %v229_v43 = vld [vmem:[%s683_s3 + $0x8] sm:$0xff]  ;;  %v231_v53 = vld [vmem:[%s683_s3 + $0x18] sm:$0xff]  ;;  %v230_v61 = vld [vmem:[%s683_s3 + $0x10] sm:$0xff] }
   0x8   :  { %v37_v15 = vld [vmem:[#allocation2 + $0x8] sm:$0xff]  ;;  %v232_v63 = vld [vmem:[%s683_s3 + $0x20] sm:$0xff]  ;;  %v234_v5 = vld [vmem:[%s683_s3 + $0x30] sm:$0xff] }
   0x9   :  { %441 = vmatpush3.bf16.msra.mxu0 %v438_v8  ;;  %v36_v17 = vld [vmem:[#allocation2] sm:$0xff]  ;;  %v38_v29 = vld [vmem:[#allocation2 + $0x10] sm:$0xff]  ;;  %v235_v6 = vld [vmem:[%s683_s3 + $0x38] sm:$0xff] }
   0xa   :  { %445 = vmatpush3.bf16.msra.mxu1 %v438_v8  ;;  %v40_v18 = vld [vmem:[#allocation2 + $0x20] sm:$0xff]  ;;  %v39_v26 = vld [vmem:[#allocation2 + $0x18] sm:$0xff] }
   0xb   :  { %v41_v16 = vld [vmem:[#allocation2 + $0x28] sm:$0xff]  ;;  %v42_v30 = vld [vmem:[#allocation2 + $0x30] sm:$0xff] }
   0xc   :  { %423 = vmatmul.mubr.msk.f32.vlgmr.msra.gmra.mrb[0].mxu0 %vm27_vm0, %v45_v9  ;;  %v43_v28 = vld [vmem:[#allocation2 + $0x38] sm:$0xff] }
   0xd   :  { %429 = vmatmul.mubr.msk.f32.vlgmr.msra.gmra.mrb[0].mxu1 %vm27_vm0, %v49_v10  ;;  %425 = vmatprep.mubr.msk.f32.mxu0 %vm27_vm0, %v46_v11 }
   0xe   :  { %431 = vmatprep.mubr.msk.f32.mxu1 %vm27_vm0, %v50_v12 }
  0x10   :  { %426 = vmatmul.mubr.msk.f32.gmra.mrb[2].mxu0 %vm27_vm0, %v47_v13 }
  0x11   :  { %432 = vmatmul.mubr.msk.f32.gmra.mrb[2].mxu1 %vm27_vm0, %v51_v14 }
  0xdf   :  { %v424_v19 = vpop.f32.mrb[0].mxu0 }
  0xe0   :  { %v430_v20 = vpop.f32.mrb[0].mxu1  ;;  %v187_v21 = vadd.f32 %v424_v19, %v37_v15  ;;  %v147_v23 = vpop.f32.mrb[1].mxu0 }
  0xe1   :  { %v191_v22 = vadd.f32 %v430_v20, %v41_v16  ;;  %v167_v24 = vpop.f32.mrb[1].mxu1  ;;  %v186_v25 = vadd.f32 %v147_v23, %v36_v17 }
  0xe2   :  { %v190_v27 = vadd.f32 %v167_v24, %v40_v18  ;;  %195 = vst.msk [vmem:[#allocation2 + $0x8] sm:$0xff] %vm27_vm0, %v187_v21 }
  0xe3   :  { %199 = vst.msk [vmem:[#allocation2 + $0x28] sm:$0xff] %vm27_vm0, %v191_v22  ;;  %194 = vst.msk [vmem:[#allocation2] sm:$0xff] %vm27_vm0, %v186_v25  ;;  %v427_v31 = vpop.f32.mrb[2].mxu0 }
  0xe4   :  { %198 = vst.msk [vmem:[#allocation2 + $0x20] sm:$0xff] %vm27_vm0, %v190_v27  ;;  %v433_v32 = vpop.f32.mrb[2].mxu1  ;;  %v189_v33 = vadd.f32 %v427_v31, %v39_v26  ;;  %v157_v34 = vpop.f32.mrb[3].mxu0 }
  0xe5   :  { %v193_v35 = vadd.f32 %v433_v32, %v43_v28  ;;  %v177_v36 = vpop.f32.mrb[3].mxu1  ;;  %v188_v37 = vadd.f32 %v157_v34, %v38_v29 }
  0xe6   :  { %v192_v38 = vadd.f32 %v177_v36, %v42_v30  ;;  %197 = vst.msk [vmem:[#allocation2 + $0x18] sm:$0xff] %vm27_vm0, %v189_v33 }
  0xe7   :  { %201 = vst.msk [vmem:[#allocation2 + $0x38] sm:$0xff] %vm27_vm0, %v193_v35  ;;  %196 = vst.msk [vmem:[#allocation2 + $0x10] sm:$0xff] %vm27_vm0, %v188_v37 }
  0xe8   :  { %200 = vst.msk [vmem:[#allocation2 + $0x30] sm:$0xff] %vm27_vm0, %v192_v38 }
  0xe9   :  { %v206_v42 = vld [vmem:[#allocation2 + $0x8] sm:$0xff] }
  0xea   :  { %v210_v41 = vld [vmem:[#allocation2 + $0x28] sm:$0xff]  ;;  %v221_v45 = vadd.f32 %v399_v39, %v206_v42  ;;  %v205_v46 = vld [vmem:[#allocation2] sm:$0xff] }
  0xeb   :  { %v225_v44 = vadd.f32 %v399_v39, %v210_v41  ;;  %v209_v47 = vld [vmem:[#allocation2 + $0x20] sm:$0xff]  ;;  %v220_v48 = vadd.f32 %v399_v39, %v205_v46 }
  0xec   :  { %v237_v51 = vadd.f32 %v229_v43, %v221_v45  ;;  %v224_v54 = vadd.f32 %v399_v39, %v209_v47 }
  0xed   :  { %v241_v50 = vadd.f32 %v233_v40, %v225_v44  ;;  %v208_v52 = vld [vmem:[#allocation2 + $0x18] sm:$0xff]  ;;  %v236_v58 = vadd.f32 %v228_v49, %v220_v48 }
  0xee   :  { %v212_v55 = vld [vmem:[#allocation2 + $0x38] sm:$0xff]  ;;  %v247_v57 = vsel %vm27_vm0, %v237_v51, 0.0  ;;  %v223_v59 = vadd.f32 %v399_v39, %v208_v52  ;;  %v207_v60 = vld [vmem:[#allocation2 + $0x10] sm:$0xff]  ;;  %v240_v9 = vadd.f32 %v232_v63, %v224_v54 }
  0xef   :  { %v259_v56 = vsel %vm27_vm0, %v241_v50, 0.0  ;;  %v211_v62 = vld [vmem:[#allocation2 + $0x30] sm:$0xff]  ;;  %248 = vadd.xlane.f32.xlu0 %v247_v57  ;;  %v222_v0 = vadd.f32 %v399_v39, %v207_v60  ;;  %v227_v3 = vadd.f32 %v399_v39, %v212_v55  ;;  %v244_v7 = vsel %vm27_vm0, %v236_v58, 0.0 }
  0xf0   :  { %260 = vadd.xlane.f32.xlu1 %v259_v56  ;;  %v239_v1 = vadd.f32 %v231_v53, %v223_v59  ;;  %v226_v2 = vadd.f32 %v399_v39, %v211_v62  ;;  %v256_v13 = vsel %vm27_vm0, %v240_v9, 0.0 }
  0xf1   :  { %v238_v4 = vadd.f32 %v230_v61, %v222_v0  ;;  %v243_v12 = vadd.f32 %v235_v6, %v227_v3 }
  0xf2   :  { %v253_v8 = vsel %vm27_vm0, %v239_v1, 0.0  ;;  %v242_v11 = vadd.f32 %v234_v5, %v226_v2 }
  0xf3   :  { %245 = vadd.xlane.f32.xlu0 %v244_v7  ;;  %v250_v10 = vsel %vm27_vm0, %v238_v4, 0.0  ;;  %v265_v15 = vsel %vm27_vm0, %v243_v12, 0.0 }
  0xf4   :  { %254 = vadd.xlane.f32.xlu1 %v253_v8  ;;  %v262_v14 = vsel %vm27_vm0, %v242_v11, 0.0 }
  0xf7   :  { %257 = vadd.xlane.f32.xlu0 %v256_v13 }
  0xf8   :  { %251 = vadd.xlane.f32.xlu1 %v250_v10 }
  0xfb   :  { %263 = vadd.xlane.f32.xlu0 %v262_v14 }
  0xfc   :  { %266 = vadd.xlane.f32.xlu1 %v265_v15 }
 0x17c   :  { %v249_v17 = vpop.xlane.xlu0 %248 }
 0x17d   :  { %v261_v16 = vpop.xlane.xlu1 %260  ;;  %v270_v19 = vmul.f32 0.03125, %v249_v17  ;;  %v401_v17 = vld [vmem:[%s685_s5] ss:$0 sm:$0xff] }
 0x17e   :  { %v274_v18 = vmul.f32 0.03125, %v261_v16 }
 0x17f   :  { %v596_v21 = vsub.f32 %v237_v51, %v270_v19 }
 0x180   :  { %v594_v20 = vsub.f32 %v241_v50, %v274_v18  ;;  %v246_v22 = vpop.xlane.xlu0 %245 }
 0x181   :  { %v255_v23 = vpop.xlane.xlu1 %254  ;;  %v269_v24 = vmul.f32 0.03125, %v246_v22  ;;  %v286_v26 = vmul.f32 %v596_v21, %v596_v21 }
 0x182   :  { %v272_v25 = vmul.f32 0.03125, %v255_v23  ;;  %v290_v30 = vmul.f32 %v594_v20, %v594_v20 }
 0x183   :  { %v600_v27 = vsub.f32 %v236_v58, %v269_v24  ;;  %v296_v29 = vsel %vm27_vm0, %v286_v26, 0.0 }
 0x184   :  { %v602_v28 = vsub.f32 %v239_v1, %v272_v25  ;;  %v258_v31 = vpop.xlane.xlu0 %257  ;;  %297 = vadd.xlane.f32.xlu1 %v296_v29  ;;  %v308_v40 = vsel %vm27_vm0, %v290_v30, 0.0 }
 0x185   :  { %v252_v32 = vpop.xlane.xlu1 %251  ;;  %v273_v33 = vmul.f32 0.03125, %v258_v31  ;;  %v285_v35 = vmul.f32 %v600_v27, %v600_v27 }
 0x186   :  { %v271_v34 = vmul.f32 0.03125, %v252_v32  ;;  %v288_v36 = vmul.f32 %v602_v28, %v602_v28 }
 0x187   :  { %v611_v37 = vsub.f32 %v240_v9, %v273_v33  ;;  %v293_v39 = vsel %vm27_vm0, %v285_v35, 0.0 }
 0x188   :  { %v613_v38 = vsub.f32 %v238_v4, %v271_v34  ;;  %294 = vadd.xlane.f32.xlu0 %v293_v39  ;;  %v264_v41 = vpop.xlane.xlu0 %263  ;;  %309 = vadd.xlane.f32.xlu1 %v308_v40  ;;  %v302_v46 = vsel %vm27_vm0, %v288_v36, 0.0 }
 0x189   :  { %v267_v42 = vpop.xlane.xlu1 %266  ;;  %v275_v43 = vmul.f32 0.03125, %v264_v41  ;;  %v289_v45 = vmul.f32 %v611_v37, %v611_v37 }
 0x18a   :  { %v276_v44 = vmul.f32 0.03125, %v267_v42  ;;  %v287_v50 = vmul.f32 %v613_v38, %v613_v38 }
 0x18b   :  { %v620_v47 = vsub.f32 %v242_v11, %v275_v43  ;;  %v305_v49 = vsel %vm27_vm0, %v289_v45, 0.0 }
 0x18c   :  { %v622_v48 = vsub.f32 %v243_v12, %v276_v44  ;;  %306 = vadd.xlane.f32.xlu0 %v305_v49  ;;  %303 = vadd.xlane.f32.xlu1 %v302_v46  ;;  %v299_v52 = vsel %vm27_vm0, %v287_v50, 0.0  ;;  %v400_v12 = vld [vmem:[%s684_s4] ss:$0 sm:$0xff] }
 0x18d   :  { %v291_v54 = vmul.f32 %v620_v47, %v620_v47 }
 0x18e   :  { %v292_v51 = vmul.f32 %v622_v48, %v622_v48 }
 0x18f   :  { %v311_v55 = vsel %vm27_vm0, %v291_v54, 0.0 }
 0x190   :  { %v314_v53 = vsel %vm27_vm0, %v292_v51, 0.0  ;;  %300 = vadd.xlane.f32.xlu0 %v299_v52 }
 0x191   :  { %315 = vadd.xlane.f32.xlu1 %v314_v53 }
 0x194   :  { %312 = vadd.xlane.f32.xlu0 %v311_v55 }
 0x211   :  { %v298_v56 = vpop.xlane.xlu1 %297 }
 0x212   :  { %v318_v57 = vmul.f32 0.03125, %v298_v56 }
 0x214   :  { %v326_v58 = vadd.f32 1e-05, %v318_v57 }
 0x215   :  { %v295_v59 = vpop.xlane.xlu0 %294  ;;  %v310_v60 = vpop.xlane.xlu1 %309 }
 0x216   :  { %447 = vrsqrt.f32 %v326_v58  ;;  %v317_v61 = vmul.f32 0.03125, %v295_v59  ;;  %v322_v62 = vmul.f32 0.03125, %v310_v60 }
 0x218   :  { %v325_v63 = vadd.f32 1e-05, %v317_v61  ;;  %v330_v0 = vadd.f32 1e-05, %v322_v62 }
 0x219   :  { %v307_v1 = vpop.xlane.xlu0 %306  ;;  %v304_v2 = vpop.xlane.xlu1 %303 }
 0x21a   :  { %449 = vrsqrt.f32 %v325_v63  ;;  %v321_v3 = vmul.f32 0.03125, %v307_v1  ;;  %v320_v4 = vmul.f32 0.03125, %v304_v2 }
 0x21b   :  { %451 = vrsqrt.f32 %v330_v0 }
 0x21c   :  { %v329_v5 = vadd.f32 1e-05, %v321_v3  ;;  %v328_v6 = vadd.f32 1e-05, %v320_v4 }
 0x21d   :  { %v301_v7 = vpop.xlane.xlu0 %300 }
 0x21e   :  { %v316_v8 = vpop.xlane.xlu1 %315  ;;  %453 = vrsqrt.f32 %v329_v5  ;;  %v319_v9 = vmul.f32 0.03125, %v301_v7 }
 0x21f   :  { %v324_v10 = vmul.f32 0.03125, %v316_v8  ;;  %455 = vrsqrt.f32 %v328_v6 }
 0x220   :  { %v448_v11 = vpop.eup %447  ;;  %v327_v13 = vadd.f32 1e-05, %v319_v9 }
 0x221   :  { %v332_v14 = vadd.f32 1e-05, %v324_v10  ;;  %v342_v15 = vmul.f32 %v448_v11, %v596_v21  ;;  %v313_v16 = vpop.xlane.xlu0 %312 }
 0x222   :  { %457 = vrsqrt.f32 %v327_v13  ;;  %v323_v18 = vmul.f32 0.03125, %v313_v16 }
 0x223   :  { %v357_v19 = vmul.f32 %v400_v12, %v342_v15  ;;  %459 = vrsqrt.f32 %v332_v14 }
 0x224   :  { %v450_v22 = vpop.eup %449  ;;  %v331_v23 = vadd.f32 1e-05, %v323_v18 }
 0x225   :  { %v452_v24 = vpop.eup %451  ;;  %v372_v25 = vadd.f32 %v401_v17, %v357_v19  ;;  %v341_v26 = vmul.f32 %v450_v22, %v600_v27 }
 0x226   :  { %v346_v29 = vmul.f32 %v452_v24, %v594_v20  ;;  %461 = vrsqrt.f32 %v331_v23 }
 0x227   :  { %380 = vst.msk [vmem:[%s686_s6 + $0x8] sm:$0xff] %vm27_vm0, %v372_v25  ;;  %v356_v21 = vmul.f32 %v400_v12, %v341_v26 }
 0x228   :  { %v454_v30 = vpop.eup %453  ;;  %v361_v31 = vmul.f32 %v400_v12, %v346_v29 }
 0x229   :  { %v456_v32 = vpop.eup %455  ;;  %v371_v33 = vadd.f32 %v401_v17, %v356_v21  ;;  %v345_v34 = vmul.f32 %v454_v30, %v611_v37 }
 0x22a   :  { %v376_v35 = vadd.f32 %v401_v17, %v361_v31  ;;  %v344_v36 = vmul.f32 %v456_v32, %v602_v28 }
 0x22b   :  { %379 = vst.msk [vmem:[%s686_s6] sm:$0xff] %vm27_vm0, %v371_v33  ;;  %v360_v20 = vmul.f32 %v400_v12, %v345_v34 }
 0x22c   :  { %v458_v27 = vpop.eup %457  ;;  %384 = vst.msk [vmem:[%s686_s6 + $0x28] sm:$0xff] %vm27_vm0, %v376_v35  ;;  %v359_v39 = vmul.f32 %v400_v12, %v344_v36 }
 0x22d   :  { %v460_v40 = vpop.eup %459  ;;  %v375_v41 = vadd.f32 %v401_v17, %v360_v20  ;;  %v343_v37 = vmul.f32 %v458_v27, %v613_v38 }
 0x22e   :  { %v374_v42 = vadd.f32 %v401_v17, %v359_v39  ;;  %v348_v28 = vmul.f32 %v460_v40, %v622_v48 }
 0x22f   :  { %383 = vst.msk [vmem:[%s686_s6 + $0x20] sm:$0xff] %vm27_vm0, %v375_v41  ;;  %v358_v43 = vmul.f32 %v400_v12, %v343_v37 }
 0x230   :  { %v462_v44 = vpop.eup %461  ;;  %382 = vst.msk [vmem:[%s686_s6 + $0x18] sm:$0xff] %vm27_vm0, %v374_v42  ;;  %v363_v45 = vmul.f32 %v400_v12, %v348_v28 }
 0x231   :  { %v373_v46 = vadd.f32 %v401_v17, %v358_v43  ;;  %v347_v49 = vmul.f32 %v462_v44, %v620_v47 }
 0x232   :  { %v378_v38 = vadd.f32 %v401_v17, %v363_v45 }
 0x233   :  { %381 = vst.msk [vmem:[%s686_s6 + $0x10] sm:$0xff] %vm27_vm0, %v373_v46  ;;  %v362_v48 = vmul.f32 %v400_v12, %v347_v49 }
 0x234   :  { %386 = vst.msk [vmem:[%s686_s6 + $0x38] sm:$0xff] %vm27_vm0, %v378_v38 }
 0x235   :  { %v377_v50 = vadd.f32 %v401_v17, %v362_v48 }
 0x237   :  { %385 = vst.msk [vmem:[%s686_s6 + $0x30] sm:$0xff] %vm27_vm0, %v377_v50 }

// kernel: model_forward.15
= control target key start
LH: loop header
LB: loop body
LE: loop exit
PB: predicated region body
PF: predicated region fallthrough
CT: control target
= control target key end

     0   :  { %s1814_s12 = smov 0   ;;  %s1816_s13 = smov 0   ;;  %s2161_s0 = inlined_call_operand.vmem [shape: f32[64,32], index: 0, kind: input, shape index: {}]   ;;  %s2162_s1 = inlined_call_operand.vmem [shape: f32[64,32], index: 1, kind: input, shape index: {}]   ;;  %s2163_s2 = inlined_call_operand.vmem [shape: f32[64,32], index: 2, kind: input, shape index: {}]   ;;  %s2164_s3 = inlined_call_operand.vmem [shape: f32[64,32], index: 3, kind: output, shape index: {}]  }
   0x1   :  { %s1818_s14 = smov 0  }
   0x2 LB: > { %s32_s15 = sadd.s32 1, %s1779_s13  ;;  %p1485_p0 = scmp.ge.s32.totalorder %s1783_s14, 1  ;;  %s1783_s14 = sphi %s1818_s14, %s13_s14   ;;  %s1779_s13 = sphi %s1816_s13, %s2172_s13   ;;  %s1775_s12 = sphi %s1814_s12, %s2171_s12  }
   0x3   : > { %p34_p1 = scmp.ge.s32.totalorder %s32_s15, 4  ;;  %p193_p2 = scmp.lt.s32.totalorder %s1783_s14, 5 }
   0x5   : > { %s2174_s15 = smov (%p34_p1, %s32_s15), 0  ;;  %p194_p3 = pnand %p1485_p0, %p193_p2 }
   0x6   : > { %s1486_s16 = sshll.u32 (!%p194_p3), %s1775_s12, 1  ;;  %vm312_vm0 = vcmask (!%p194_p3), 64512   ;;  %vm267_vm2 = vcmask (!%p194_p3), 7168   ;;  %v1785_v6 = vmov (!%p194_p3), -1e+30   ;;  %v288_v7 = vlaneseq (!%p194_p3)  ;;  %s1788_s24 = smov (!%p194_p3), 120  }
   0x7   : > { %197 = sbr.rel (%p194_p3) target bundleno = 2418 (0x972), region = 32  ;;  %p233_p4 = scmp.lt.s32.totalorder (!%p194_p3), %s1486_s16, 7  ;;  %vm1840_vm1 = vmpackc.low (!%p194_p3), %vm312_vm0, %vm312_vm0  ;;  %268 = vst.msk [vmem:[#allocation2] sm:$0xff] (!%p194_p3), %vm267_vm2, %v1785_v6  ;;  %vm404_vm7 = vcmask (!%p194_p3), 130048   ;;  %v1786_v19 = vmov (!%p194_p3), 0   ;;  %v1787_v21 = vmov (!%p194_p3), 0.0  }
   0x8   : > { %269 = vst.msk [vmem:[#allocation2 + $0x8] sm:$0xff] (!%p194_p3), %vm267_vm2, %v1785_v6  ;;  %270 = vst.msk [vmem:[#allocation2 + $0x10] sm:$0xff] (!%p194_p3), %vm267_vm2, %v1785_v6  ;;  %v289_v8 = vshrl.u32 (!%p194_p3), %v288_v7, 7  ;;  %v296_v9 = vand.u32 (!%p194_p3), 127, %v288_v7  ;;  %1681 = vset.pattern.permute.xlu1 (!%p194_p3), %v1786_v19  ;;  %1687 = vset.pattern.permute.xlu0 (!%p194_p3), %v1786_v19  ;;  %s1789_s28 = smov (!%p194_p3), 112   ;;  %s1790_s29 = smov (!%p194_p3), 104  }
   0x9   : > { %271 = vst.msk [vmem:[#allocation2 + $0x18] sm:$0xff] (!%p194_p3), %vm267_vm2, %v1785_v6  ;;  %272 = vst.msk [vmem:[#allocation2 + $0x20] sm:$0xff] (!%p194_p3), %vm267_vm2, %v1785_v6  ;;  %vm284_vm9 = vcmask (!%p194_p3), 261120   ;;  %s1791_s30 = smov (!%p194_p3), 8   ;;  %s1792_s4 = smov (!%p194_p3), 16   ;;  %vm1309_vm10 = vcmask (!%p194_p3), 195584  }
   0xa   : > { %273 = vst.msk [vmem:[#allocation2 + $0x28] sm:$0xff] (!%p194_p3), %vm267_vm2, %v1785_v6  ;;  %274 = vst.msk [vmem:[#allocation2 + $0x30] sm:$0xff] (!%p194_p3), %vm267_vm2, %v1785_v6  ;;  %v290_v10 = vadd.s32 (!%p194_p3), 8, %v289_v8  ;;  %vm299_vm3 = vcmp.lt.s32.totalorder (!%p194_p3), %v296_v9, 8  ;;  %vm300_vm4 = vcmp.eq.s32.totalorder (!%p194_p3), %v296_v9, %v289_v8  ;;  %s1793_s5 = smov (!%p194_p3), 24  }
   0xb   : > { %275 = vst.msk [vmem:[#allocation2 + $0x38] sm:$0xff] (!%p194_p3), %vm267_vm2, %v1785_v6  ;;  %vm1868_vm6 = vmor (!%p194_p3), %vm299_vm3, %vm300_vm4 }
   0xc   : > { %vm301_vm5 = vcmp.eq.s32.totalorder (!%p194_p3), %v296_v9, %v290_v10  ;;  %276 = vst.msk [vmem:[#allocation3] sm:$0xff] (!%p194_p3), %vm267_vm2, %v1787_v21  ;;  %277 = vst.msk [vmem:[#allocation3 + $0x8] sm:$0xff] (!%p194_p3), %vm267_vm2, %v1787_v21 }
   0xd   : > { %vm1872_vm8 = vmor (!%p194_p3), %vm299_vm3, %vm301_vm5  ;;  %278 = vst.msk [vmem:[#allocation3 + $0x10] sm:$0xff] (!%p194_p3), %vm267_vm2, %v1787_v21 }
   0xe   : > { %s2176_s16 = smov (!%p233_p4, %s1486_s16), 7  ;;  %279 = vst.msk [vmem:[#allocation3 + $0x18] sm:$0xff] %vm267_vm2, %v1787_v21  ;;  %280 = vst.msk [vmem:[#allocation3 + $0x20] sm:$0xff] %vm267_vm2, %v1787_v21  ;;  %v1902_v22 = vld [vmem:[#allocation2] sm:$0xff] }
   0xf   : > { %s1832_s17 = sshll.u32 %s2176_s16, 3  ;;  %281 = vst.msk [vmem:[#allocation3 + $0x28] sm:$0xff] %vm267_vm2, %v1787_v21  ;;  %282 = vst.msk [vmem:[#allocation3 + $0x30] sm:$0xff] %vm267_vm2, %v1787_v21  ;;  %v1907_v25 = vld [vmem:[#allocation2 + $0x8] sm:$0xff]  ;;  %v1956_v56 = vld [vmem:[#allocation2 + $0x10] sm:$0xff] }
  0x10   : > { %s244_s20 = scalar_lea.vmem %s2162_s1, %s1832_s17  ;;  %s236_s23 = scalar_lea.vmem %s2161_s0, %s1832_s17  ;;  %283 = vst.msk [vmem:[#allocation3 + $0x38] sm:$0xff] %vm267_vm2, %v1787_v21  ;;  %v1954_v55 = vld [vmem:[#allocation2 + $0x18] sm:$0xff] }
  0x11   : > { %v306_v1 = vld [vmem:[%s244_s20] sm:$0xff]  ;;  %v307_v2 = vld [vmem:[%s244_s20 + $0x8] sm:$0xff]  ;;  %s252_s27 = scalar_lea.vmem %s2163_s2, %s1832_s17  ;;  %286 = vst.msk [vmem:[#allocation4 + $0x8] sm:$0xff] %vm284_vm9, %v1787_v21  ;;  %285 = vst.msk [vmem:[#allocation4] sm:$0xff] %vm284_vm9, %v1787_v21  ;;  %s260_s8 = scalar_lea.vmem %s2164_s3, %s1832_s17 }
  0x12   : > { %v1848_v3 = vld [vmem:[%s236_s23] sm:$0xff]  ;;  %v1608_v4 = vpack.c.bf16 %v307_v2, %v306_v1  ;;  %v1856_v5 = vld [vmem:[%s236_s23 + $0x8] sm:$0xff]  ;;  %v1882_v20 = vpack.i.bf16 %v307_v2, %v306_v1 }
  0x13   : > { %1556 = vmatprep.mubr.msk.f32.mxu0 %vm312_vm0, %v1848_v3  ;;  %v308_v30 = vld [vmem:[%s252_s27] sm:$0xff]  ;;  %v309_v31 = vld [vmem:[%s252_s27 + $0x8] sm:$0xff] }
  0x14   : > { %1610 = vmatprep.subr.msk.bf16.mxu0 %vm1840_vm1, %v1608_v4  ;;  %v1614_v32 = vpack.c.bf16 %v309_v31, %v308_v30  ;;  %v1974_v63 = vpack.i.bf16 %v309_v31, %v308_v30 }
  0x15   : > { %1613 = vmatpush3.bf16.xpose.msk.msra.mxu0 %vm1840_vm1, %v1608_v4 }
  0x16   : > { %1615 = vmatprep.subr.bf16.mxu1 %v1614_v32 }
  0x17   : > { %1617 = vmatpush3.bf16.msra.mxu1 %v1614_v32 }
  0x1c   : > { %1557 = vmatmul.mubr.msk.f32.vlgmr.msra.gmra.mrb[0].mxu0 %vm312_vm0, %v1856_v5 }
  0xef   : > { %v1558_v12 = vpop.f32.mrb[0].mxu0 }
  0xf0   : > { %v391_v14 = vpop.f32.mrb[1].mxu0  ;;  %v401_v17 = vsel %vm1872_vm8, %v1558_v12, -inf }
  0xf1   : > { %v400_v15 = vsel %vm1868_vm6, %v391_v14, -inf  ;;  %v408_v18 = vsel %vm404_vm7, %v401_v17, -inf }
  0xf2   : > { %v405_v16 = vsel %vm404_vm7, %v400_v15, -inf }
  0xf3   : > { %406 = vmax.xlane.f32.xlu0 %v405_v16 }
  0xf7   : > { %409 = vmax.xlane.f32.xlu0 %v408_v18 }
 0x10d   : > { %1683 = vrot.lane.b32.xlu0 %v1882_v20, %s1788_s24 }
 0x180   : > { %v407_v23 = vpop.xlane.xlu0 %406 }
 0x181   : > { %v1905_v24 = vmax.f32 %v1902_v22, %v407_v23 }
 0x183   : > { %v413_v26 = vsub.f32 %v1902_v22, %v1905_v24  ;;  %545 = vst.msk [vmem:[#allocation2] sm:$0xff] %vm267_vm2, %v1905_v24  ;;  %421 = vperm.xlu1 %1681, %v1905_v24  }
 0x184   : > { %v410_v27 = vpop.xlane.xlu0 %409 }
 0x185   : > { %v1915_v28 = vmax.f32 %v1907_v25, %v410_v27 }
 0x187   : > { %v414_v29 = vsub.f32 %v1907_v25, %v1915_v28  ;;  %546 = vst.msk [vmem:[#allocation2 + $0x8] sm:$0xff] %vm267_vm2, %v1915_v28  ;;  %426 = vperm.xlu1 %1681, %v1915_v28  }
 0x188   : > { %v1684_v33 = vpop.permute.xlu0 %1683 }
 0x189   : > { %v1686_v34 = vunpack.i.h.bf16 %v1684_v33  ;;  %v1685_v35 = vunpack.i.l.bf16 %v1684_v33 }
 0x18b   : > { %547 = vrot.lane.b32.xlu1 %v1848_v3, %s1788_s24  ;;  %v1618_v36 = vpack.c.bf16 %v1686_v34, %v1685_v35 }
 0x18d   : > { %1620 = vmatprep.subr.msk.bf16.mxu1 %vm1840_vm1, %v1618_v36 }
 0x18f   : > { %549 = vrot.lane.b32.xlu1 %v1856_v5, %s1788_s24 }
 0x202   : > { %v422_v37 = vpop.permute.xlu1 %421 }
 0x203   : > { %v429_v38 = vsub.f32 %v400_v15, %v422_v37 }
 0x205   : > { %v431_v39 = vmul.f32 1.442695, %v429_v38 }
 0x206   : > { %v427_v40 = vpop.permute.xlu1 %426 }
 0x207   : > { %1713 = vpow2.f32 %v431_v39  ;;  %v430_v41 = vsub.f32 %v401_v17, %v427_v40  ;;  %v2008_v39 = vld [vmem:[#allocation2 + $0x28] sm:$0xff]  ;;  %v2010_v40 = vld [vmem:[#allocation2 + $0x20] sm:$0xff] }
 0x209   : > { %v433_v42 = vmul.f32 1.442695, %v430_v41 }
 0x20a   : > { %v548_v44 = vpop.permute.xlu1 %547 }
 0x20b   : > { %1715 = vpow2.f32 %v433_v42 }
 0x20e   : > { %v550_v46 = vpop.permute.xlu1 %549 }
 0x211   : > { %v1932_v43 = vpop.eup %1713 }
 0x212   : > { %1563 = vmatprep.mubr.msk.f32.mxu1 %vm404_vm7, %v1932_v43 }
 0x215   : > { %v1936_v45 = vpop.eup %1715 }
 0x216   : > { %1564 = vmatmul.mubr.msk.f32.vlgmr.msra.gmra.mrb[0].mxu1 %vm404_vm7, %v1936_v45 }
 0x217   : > { %1623 = vmatpush3.bf16.xpose.msk.msra.mxu1 %vm1840_vm1, %v1618_v36  ;;  %1570 = vmatprep.mubr.msk.f32.mxu1 %vm312_vm0, %v548_v44 }
 0x21e   : > { %1571 = vmatmul.mubr.msk.f32.vlgmr.msra.gmra.mrb[2].mxu1 %vm312_vm0, %v550_v46 }
 0x2e9   : > { %v1944_v47 = vpop.f32.mrb[0].mxu1 }
 0x2ea   : > { %v1946_v48 = vpop.f32.mrb[1].mxu1 }
 0x2f1   : > { %v1572_v49 = vpop.f32.mrb[2].mxu1 }
 0x2f2   : > { %v639_v50 = vsel %vm1872_vm8, %v1572_v49, -inf  ;;  %v629_v51 = vpop.f32.mrb[3].mxu1 }
 0x2f3   : > { %v638_v52 = vsel %vm1868_vm6, %v629_v51, -inf  ;;  %v646_v53 = vsel %vm404_vm7, %v639_v50, -inf }
 0x2f4   : > { %647 = vmax.xlane.f32.xlu0 %v646_v53  ;;  %v643_v54 = vsel %vm404_vm7, %v638_v52, -inf }
 0x2f5   : > { %644 = vmax.xlane.f32.xlu1 %v643_v54 }
 0x381   : > { %v648_v57 = vpop.xlane.xlu0 %647 }
 0x382   : > { %v1959_v58 = vmax.f32 %v1954_v55, %v648_v57  ;;  %v645_v59 = vpop.xlane.xlu1 %644 }
 0x383   : > { %v1962_v60 = vmax.f32 %v1956_v56, %v645_v59 }
 0x384   : > { %v652_v61 = vsub.f32 %v1954_v55, %v1959_v58  ;;  %800 = vst.msk [vmem:[#allocation2 + $0x18] sm:$0xff] %vm267_vm2, %v1959_v58  ;;  %664 = vperm.xlu0 %1687, %v1959_v58   ;;  %v435_v55 = vld [vmem:[#allocation3] sm:$0xff] }
 0x385   : > { %v651_v62 = vsub.f32 %v1956_v56, %v1962_v60  ;;  %799 = vst.msk [vmem:[#allocation2 + $0x10] sm:$0xff] %vm267_vm2, %v1962_v60  ;;  %659 = vperm.xlu1 %1681, %v1962_v60  }
 0x389   : > { %1689 = vrot.lane.b32.xlu1 %v1974_v63, %s1788_s24 }
 0x38d   : > { %1694 = vrot.lane.b32.xlu1 %v1882_v20, %s1789_s28 }
 0x391   : > { %801 = vrot.lane.b32.xlu1 %v1848_v3, %s1789_s28 }
 0x395   : > { %803 = vrot.lane.b32.xlu1 %v1856_v5, %s1789_s28 }
 0x403   : > { %v665_v1 = vpop.permute.xlu0 %664 }
 0x404   : > { %v668_v2 = vsub.f32 %v639_v50, %v665_v1  ;;  %v660_v4 = vpop.permute.xlu1 %659 }
 0x405   : > { %v667_v6 = vsub.f32 %v638_v52, %v660_v4 }
 0x406   : > { %v671_v7 = vmul.f32 1.442695, %v668_v2 }
 0x407   : > { %v669_v8 = vmul.f32 1.442695, %v667_v6 }
 0x408   : > { %v1690_v9 = vpop.permute.xlu1 %1689 }
 0x409   : > { %1717 = vpow2.f32 %v669_v8  ;;  %v1692_v10 = vunpack.i.h.bf16 %v1690_v9  ;;  %v1691_v12 = vunpack.i.l.bf16 %v1690_v9 }
 0x40a   : > { %1719 = vpow2.f32 %v671_v7 }
 0x40b   : > { %v1624_v14 = vpack.c.bf16 %v1692_v10, %v1691_v12 }
 0x40c   : > { %v1695_v15 = vpop.permute.xlu1 %1694 }
 0x40d   : > { %1625 = vmatprep.subr.bf16.mxu0 %v1624_v14  ;;  %v1697_v16 = vunpack.i.h.bf16 %v1695_v15  ;;  %v1696_v17 = vunpack.i.l.bf16 %v1695_v15 }
 0x40e   : > { %1627 = vmatpush3.bf16.msra.mxu0 %v1624_v14 }
 0x40f   : > { %v1628_v18 = vpack.c.bf16 %v1697_v16, %v1696_v17 }
 0x410   : > { %v802_v23 = vpop.permute.xlu1 %801 }
 0x411   : > { %1630 = vmatprep.subr.msk.bf16.mxu0 %vm1840_vm1, %v1628_v18 }
 0x413   : > { %v1986_v19 = vpop.eup %1717 }
 0x414   : > { %v1988_v27 = vpop.eup %1719  ;;  %1577 = vmatprep.mubr.msk.f32.mxu0 %vm404_vm7, %v1986_v19  ;;  %v804_v30 = vpop.permute.xlu1 %803 }
 0x415   : > { %1578 = vmatmul.mubr.msk.f32.vlgmr.msra.gmra.mrb[2].mxu0 %vm404_vm7, %v1988_v27 }
 0x416   : > { %1584 = vmatprep.mubr.msk.f32.mxu0 %vm312_vm0, %v802_v23 }
 0x417   : > { %1633 = vmatpush3.bf16.xpose.msk.msra.mxu0 %vm1840_vm1, %v1628_v18 }
 0x41e   : > { %1585 = vmatmul.mubr.msk.f32.vlgmr.msra.gmra.mrb[4].mxu0 %vm312_vm0, %v804_v30 }
 0x4e8   : > { %v1998_v31 = vpop.f32.mrb[2].mxu0 }
 0x4e9   : > { %v2000_v32 = vpop.f32.mrb[3].mxu0 }
 0x4f1   : > { %v1586_v33 = vpop.f32.mrb[4].mxu0 }
 0x4f2   : > { %v893_v34 = vsel %vm1872_vm8, %v1586_v33, -inf  ;;  %v883_v35 = vpop.f32.mrb[5].mxu0  ;;  %v2054_v33 = vld [vmem:[#allocation2 + $0x38] sm:$0xff] }
 0x4f3   : > { %v892_v36 = vsel %vm1868_vm6, %v883_v35, -inf  ;;  %v900_v37 = vsel %vm404_vm7, %v893_v34, -inf }
 0x4f4   : > { %901 = vmax.xlane.f32.xlu0 %v900_v37  ;;  %v897_v38 = vsel %vm404_vm7, %v892_v36, -inf }
 0x4f5   : > { %898 = vmax.xlane.f32.xlu1 %v897_v38 }
 0x581   : > { %v902_v41 = vpop.xlane.xlu0 %901 }
 0x582   : > { %v2013_v42 = vmax.f32 %v2008_v39, %v902_v41  ;;  %v899_v44 = vpop.xlane.xlu1 %898  ;;  %v439_v41 = vsel %vm404_vm7, %v1932_v43, 0.0 }
 0x583   : > { %v2016_v46 = vmax.f32 %v2010_v40, %v899_v44  ;;  %v442_v44 = vsel %vm404_vm7, %v1936_v45, 0.0 }
 0x584   : > { %v906_v49 = vsub.f32 %v2008_v39, %v2013_v42  ;;  %1052 = vst.msk [vmem:[#allocation2 + $0x28] sm:$0xff] %vm267_vm2, %v2013_v42  ;;  %918 = vperm.xlu0 %1687, %v2013_v42  }
 0x585   : > { %v905_v50 = vsub.f32 %v2010_v40, %v2016_v46  ;;  %1051 = vst.msk [vmem:[#allocation2 + $0x20] sm:$0xff] %vm267_vm2, %v2016_v46  ;;  %913 = vperm.xlu1 %1681, %v2016_v46  }
 0x586   : > { %v909_v28 = vmul.f32 1.442695, %v906_v49 }
 0x587   : > { %v907_v24 = vmul.f32 1.442695, %v905_v50 }
 0x589   : > { %1699 = vrot.lane.b32.xlu1 %v1974_v63, %s1789_s28 }
 0x58d   : > { %1704 = vrot.lane.b32.xlu1 %v1882_v20, %s1790_s29 }
 0x591   : > { %1053 = vrot.lane.b32.xlu1 %v1848_v3, %s1790_s29 }
 0x595   : > { %1055 = vrot.lane.b32.xlu1 %v1856_v5, %s1790_s29 }
 0x603   : > { %v919_v51 = vpop.permute.xlu0 %918 }
 0x604   : > { %v922_v52 = vsub.f32 %v893_v34, %v919_v51  ;;  %v914_v53 = vpop.permute.xlu1 %913  ;;  %v2056_v34 = vld [vmem:[#allocation2 + $0x30] sm:$0xff]  ;;  %v678_v51 = vsel %vm404_vm7, %v1986_v19, 0.0 }
 0x605   : > { %v921_v54 = vsub.f32 %v892_v36, %v914_v53 }
 0x606   : > { %v925_v57 = vmul.f32 1.442695, %v922_v52  ;;  %v681_v52 = vsel %vm404_vm7, %v1988_v27, 0.0 }
 0x607   : > { %v923_v59 = vmul.f32 1.442695, %v921_v54 }
 0x608   : > { %v1700_v1 = vpop.permute.xlu1 %1699 }
 0x609   : > { %1721 = vpow2.f32 %v923_v59  ;;  %v1702_v2 = vunpack.i.h.bf16 %v1700_v1  ;;  %v1701_v4 = vunpack.i.l.bf16 %v1700_v1 }
 0x60a   : > { %1723 = vpow2.f32 %v925_v57 }
 0x60b   : > { %v1634_v6 = vpack.c.bf16 %v1702_v2, %v1701_v4 }
 0x60c   : > { %v1705_v7 = vpop.permute.xlu1 %1704 }
 0x60d   : > { %1635 = vmatprep.subr.bf16.mxu1 %v1634_v6  ;;  %v1707_v20 = vunpack.i.h.bf16 %v1705_v7  ;;  %v1706_v8 = vunpack.i.l.bf16 %v1705_v7 }
 0x60e   : > { %1637 = vmatpush3.bf16.msra.mxu1 %v1634_v6 }
 0x60f   : > { %v1638_v3 = vpack.c.bf16 %v1707_v20, %v1706_v8 }
 0x610   : > { %v1054_v9 = vpop.permute.xlu1 %1053 }
 0x611   : > { %1640 = vmatprep.subr.msk.bf16.mxu1 %vm1840_vm1, %v1638_v3 }
 0x613   : > { %v1722_v5 = vpop.eup %1721 }
 0x614   : > { %v1724_v10 = vpop.eup %1723  ;;  %1591 = vmatprep.mubr.msk.f32.mxu1 %vm404_vm7, %v1722_v5  ;;  %v1056_v12 = vpop.permute.xlu1 %1055  ;;  %v932_v53 = vsel %vm404_vm7, %v1722_v5, 0.0  ;;  %v415_v5 = vmul.f32 1.442695, %v413_v26 }
 0x615   : > { %1592 = vmatmul.mubr.msk.f32.vlgmr.msra.gmra.mrb[4].mxu1 %vm404_vm7, %v1724_v10 }
 0x616   : > { %1598 = vmatprep.mubr.msk.f32.mxu1 %vm312_vm0, %v1054_v9  ;;  %v653_v9 = vmul.f32 1.442695, %v651_v62 }
 0x617   : > { %1643 = vmatpush3.bf16.xpose.msk.msra.mxu1 %vm1840_vm1, %v1638_v3  ;;  %v417_v3 = vmul.f32 1.442695, %v414_v29 }
 0x61e   : > { %1599 = vmatmul.mubr.msk.f32.vlgmr.msra.gmra.mrb[6].mxu1 %vm312_vm0, %v1056_v12 }
 0x6e8   : > { %v2044_v14 = vpop.f32.mrb[4].mxu1 }
 0x6e9   : > { %v2046_v15 = vpop.f32.mrb[5].mxu1 }
 0x6f1   : > { %v1600_v16 = vpop.f32.mrb[6].mxu1 }
 0x6f2   : > { %v1145_v17 = vsel %vm1872_vm8, %v1600_v16, -inf  ;;  %v1135_v18 = vpop.f32.mrb[7].mxu1  ;;  %v675_v16 = vld [vmem:[#allocation3 + $0x18] sm:$0xff] }
 0x6f3   : > { %v1144_v23 = vsel %vm1868_vm6, %v1135_v18, -inf  ;;  %v1152_v30 = vsel %vm404_vm7, %v1145_v17, -inf }
 0x6f4   : > { %1153 = vmax.xlane.f32.xlu0 %v1152_v30  ;;  %v1149_v0 = vsel %vm404_vm7, %v1144_v23, -inf  ;;  %v928_v30 = vld [vmem:[#allocation3 + $0x20] sm:$0xff] }
 0x6f5   : > { %1150 = vmax.xlane.f32.xlu1 %v1149_v0 }
 0x781   : > { %v1154_v35 = vpop.xlane.xlu0 %1153 }
 0x782   : > { %v2059_v36 = vmax.f32 %v2054_v33, %v1154_v35  ;;  %v1151_v13 = vpop.xlane.xlu1 %1150 }
 0x783   : > { %v2062_v37 = vmax.f32 %v2056_v34, %v1151_v13  ;;  %v929_v13 = vld [vmem:[#allocation3 + $0x28] sm:$0xff] }
 0x784   : > { %v1158_v11 = vsub.f32 %v2054_v33, %v2059_v36  ;;  %1304 = vst.msk [vmem:[#allocation2 + $0x38] sm:$0xff] %vm267_vm2, %v2059_v36  ;;  %1170 = vperm.xlu1 %1681, %v2059_v36  }
 0x785   : > { %v1157_v38 = vsub.f32 %v2056_v34, %v2062_v37  ;;  %1303 = vst.msk [vmem:[#allocation2 + $0x30] sm:$0xff] %vm267_vm2, %v2062_v37  ;;  %1165 = vperm.xlu0 %1687, %v2062_v37  }
 0x786   : > { %v1161_v49 = vmul.f32 1.442695, %v1158_v11 }
 0x787   : > { %v1159_v62 = vmul.f32 1.442695, %v1157_v38 }
 0x788   : > { %1709 = vrot.lane.b32.xlu1 %v1974_v63, %s1790_s29  ;;  %v935_v63 = vsel %vm404_vm7, %v1724_v10, 0.0  ;;  %v655_v10 = vmul.f32 1.442695, %v652_v61  ;;  %v436_v61 = vld [vmem:[#allocation3 + $0x8] sm:$0xff] }
 0x7a4   : > { %440 = vadd.xlane.f32.xlu0 %v439_v41 }
 0x7ac   : > { %443 = vadd.xlane.f32.xlu1 %v442_v44 }
 0x7b0   : > { %679 = vadd.xlane.f32.xlu1 %v678_v51 }
 0x7b4   : > { %682 = vadd.xlane.f32.xlu1 %v681_v52 }
 0x7b8   : > { %933 = vadd.xlane.f32.xlu1 %v932_v53 }
 0x7bc   : > { %936 = vadd.xlane.f32.xlu1 %v935_v63 }
 0x803   : > { %v1171_v43 = vpop.permute.xlu1 %1170 }
 0x804   : > { %v1174_v54 = vsub.f32 %v1145_v17, %v1171_v43  ;;  %v1166_v57 = vpop.permute.xlu0 %1165 }
 0x805   : > { %v1173_v59 = vsub.f32 %v1144_v23, %v1166_v57 }
 0x806   : > { %v1177_v45 = vmul.f32 1.442695, %v1174_v54 }
 0x807   : > { %v1175_v1 = vmul.f32 1.442695, %v1173_v59  ;;  %v1710_v2 = vpop.permute.xlu1 %1709 }
 0x808   : > { %1725 = vpow2.f32 %v1177_v45  ;;  %v1712_v19 = vunpack.i.h.bf16 %v1710_v2  ;;  %v1711_v4 = vunpack.i.l.bf16 %v1710_v2  ;;  %v1181_v45 = vld [vmem:[#allocation3 + $0x38] sm:$0xff] }
 0x809   : > { %1727 = vpow2.f32 %v1175_v1  ;;  %v1180_v1 = vld [vmem:[#allocation3 + $0x30] sm:$0xff] }
 0x80a   : > { %v1644_v6 = vpack.c.bf16 %v1712_v19, %v1711_v4  ;;  %1729 = vpow2.f32 %v417_v3 }
 0x80b   : > { %1731 = vpow2.f32 %v415_v5 }
 0x80c   : > { %1645 = vmatprep.subr.bf16.mxu0 %v1644_v6  ;;  %1733 = vpow2.f32 %v653_v9 }
 0x80d   : > { %1647 = vmatpush3.bf16.msra.mxu0 %v1644_v6  ;;  %1735 = vpow2.f32 %v655_v10 }
 0x80e   : > { %1737 = vpow2.f32 %v907_v24 }
 0x80f   : > { %1739 = vpow2.f32 %v909_v28 }
 0x810   : > { %1741 = vpow2.f32 %v1159_v62 }
 0x812   : > { %v1726_v27 = vpop.eup %1725 }
 0x813   : > { %v1728_v7 = vpop.eup %1727  ;;  %v1187_v20 = vsel %vm404_vm7, %v1726_v27, 0.0 }
 0x814   : > { %1605 = vmatprep.mubr.msk.f32.mxu0 %vm404_vm7, %v1728_v7  ;;  %1188 = vadd.xlane.f32.xlu0 %v1187_v20  ;;  %v1184_v8 = vsel %vm404_vm7, %v1728_v7, 0.0  ;;  %v1730_v22 = vpop.eup %1729 }
 0x815   : > { %1185 = vadd.xlane.f32.xlu1 %v1184_v8  ;;  %1606 = vmatmul.mubr.msk.f32.vlgmr.msra.gmra.mrb[6].mxu0 %vm404_vm7, %v1726_v27  ;;  %v1732_v25 = vpop.eup %1731  ;;  %v438_v39 = vmul.f32 %v1730_v22, %v436_v61 }
 0x816   : > { %v1734_v26 = vpop.eup %1733  ;;  %v437_v21 = vmul.f32 %v1732_v25, %v435_v55 }
 0x817   : > { %v1736_v29 = vpop.eup %1735 }
 0x818   : > { %v1738_v60 = vpop.eup %1737  ;;  %v677_v18 = vmul.f32 %v1736_v29, %v675_v16 }
 0x819   : > { %v1740_v40 = vpop.eup %1739  ;;  %v930_v34 = vmul.f32 %v1738_v60, %v928_v30 }
 0x81a   : > { %v1742_v35 = vpop.eup %1741  ;;  %v931_v38 = vmul.f32 %v1740_v40, %v929_v13 }
 0x81b   : > { %v1182_v4 = vmul.f32 %v1742_v35, %v1180_v1 }
 0x826   : > { %538 = vperm.xlu1 %1681, %v1730_v22  }
 0x82a   : > { %533 = vperm.xlu0 %1687, %v1732_v25   ;;  %779 = vperm.xlu1 %1681, %v1734_v26  }
 0x82e   : > { %793 = vrot.lane.b32.xlu0 %v1998_v31, %s1791_s30  ;;  %784 = vperm.xlu1 %1681, %v1736_v29   ;;  %v674_v31 = vld [vmem:[#allocation3 + $0x10] sm:$0xff] }
 0x82f   : > { %v676_v50 = vmul.f32 %v1734_v26, %v674_v31  ;;  %v310_v31 = vld [vmem:[#allocation4] sm:$0xff] }
 0x831   : > { %v441_v56 = vpop.xlane.xlu0 %440 }
 0x832   : > { %v445_v58 = vadd.f32 %v441_v56, %v437_v21  ;;  %791 = vrot.lane.b32.xlu1 %v2000_v32, %s1791_s30 }
 0x834   : > { %448 = vst.msk [vmem:[#allocation3] sm:$0xff] %vm267_vm2, %v445_v58 }
 0x836   : > { %1031 = vperm.xlu1 %1681, %v1738_v60  }
 0x839   : > { %v444_v42 = vpop.xlane.xlu1 %443 }
 0x83a   : > { %v446_v46 = vadd.f32 %v444_v42, %v438_v39  ;;  %1036 = vperm.xlu1 %1681, %v1740_v40   ;;  %v311_v40 = vld [vmem:[#allocation4 + $0x8] sm:$0xff] }
 0x83b   : > { %v1318_v32 = vld [vmem:[#allocation3] sm:$0xff] }
 0x83c   : > { %449 = vst.msk [vmem:[#allocation3 + $0x8] sm:$0xff] %vm267_vm2, %v446_v46  ;;  %1743 = vrcp.f32 %v1318_v32 }
 0x83d   : > { %v680_v12 = vpop.xlane.xlu1 %679  ;;  %1745 = vpow2.f32 %v1161_v49 }
 0x83e   : > { %v684_v17 = vadd.f32 %v680_v12, %v676_v50  ;;  %1043 = vrot.lane.b32.xlu1 %v2046_v15, %s1792_s4 }
 0x840   : > { %686 = vst.msk [vmem:[#allocation3 + $0x10] sm:$0xff] %vm267_vm2, %v684_v17 }
 0x841   : > { %v683_v23 = vpop.xlane.xlu1 %682 }
 0x842   : > { %v685_v0 = vadd.f32 %v683_v23, %v677_v18  ;;  %1045 = vrot.lane.b32.xlu1 %v2044_v14, %s1792_s4 }
 0x843   : > { %v1319_v33 = vld [vmem:[#allocation3 + $0x8] sm:$0xff] }
 0x844   : > { %687 = vst.msk [vmem:[#allocation3 + $0x18] sm:$0xff] %vm267_vm2, %v685_v0  ;;  %1747 = vrcp.f32 %v1319_v33 }
 0x845   : > { %v934_v36 = vpop.xlane.xlu1 %933 }
 0x846   : > { %v1744_v37 = vpop.eup %1743  ;;  %v938_v11 = vadd.f32 %v934_v36, %v930_v34  ;;  %1283 = vperm.xlu1 %1681, %v1742_v35  }
 0x847   : > { %1324 = vperm.xlu0 %1687, %v1744_v37   ;;  %v1332_v15 = vld [vmem:[#allocation3 + $0x10] sm:$0xff]  ;;  %v1746_v41 = vpop.eup %1745 }
 0x848   : > { %940 = vst.msk [vmem:[#allocation3 + $0x20] sm:$0xff] %vm267_vm2, %v938_v11  ;;  %1749 = vrcp.f32 %v1332_v15  ;;  %v1183_v2 = vmul.f32 %v1746_v41, %v1181_v45 }
 0x849   : > { %v937_v44 = vpop.xlane.xlu1 %936 }
 0x84a   : > { %v939_v14 = vadd.f32 %v937_v44, %v931_v38  ;;  %1288 = vperm.xlu1 %1681, %v1746_v41  }
 0x84b   : > { %v1333_v51 = vld [vmem:[#allocation3 + $0x18] sm:$0xff] }
 0x84c   : > { %941 = vst.msk [vmem:[#allocation3 + $0x28] sm:$0xff] %vm267_vm2, %v939_v14  ;;  %1751 = vrcp.f32 %v1333_v51 }
 0x84e   : > { %v1748_v52 = vpop.eup %1747 }
 0x84f   : > { %1329 = vperm.xlu0 %1687, %v1748_v52   ;;  %v1346_v53 = vld [vmem:[#allocation3 + $0x20] sm:$0xff] }
 0x850   : > { %1753 = vrcp.f32 %v1346_v53 }
 0x852   : > { %v1750_v63 = vpop.eup %1749 }
 0x853   : > { %1338 = vperm.xlu1 %1681, %v1750_v63   ;;  %v1347_v43 = vld [vmem:[#allocation3 + $0x28] sm:$0xff] }
 0x854   : > { %1755 = vrcp.f32 %v1347_v43 }
 0x856   : > { %v1752_v54 = vpop.eup %1751 }
 0x857   : > { %1343 = vperm.xlu1 %1681, %v1752_v54  }
 0x85a   : > { %v1754_v57 = vpop.eup %1753 }
 0x85b   : > { %1352 = vperm.xlu0 %1687, %v1754_v57  }
 0x85e   : > { %v1756_v59 = vpop.eup %1755 }
 0x85f   : > { %1357 = vperm.xlu1 %1681, %v1756_v59  }
 0x8a1   : > { %v1189_v19 = vpop.xlane.xlu0 %1188 }
 0x8a2   : > { %v1191_v6 = vadd.f32 %v1189_v19, %v1183_v2  ;;  %v1186_v27 = vpop.xlane.xlu1 %1185 }
 0x8a3   : > { %v1190_v7 = vadd.f32 %v1186_v27, %v1182_v4 }
 0x8a4   : > { %1193 = vst.msk [vmem:[#allocation3 + $0x38] sm:$0xff] %vm267_vm2, %v1191_v6 }
 0x8a5   : > { %1192 = vst.msk [vmem:[#allocation3 + $0x30] sm:$0xff] %vm267_vm2, %v1190_v7 }
 0x8a6   : > { %v539_v22 = vpop.permute.xlu1 %538 }
 0x8a7   : > { %v542_v32 = vmul.f32 %v539_v22, %v311_v40 }
 0x8a9   : > { %v534_v58 = vpop.permute.xlu0 %533  ;;  %v544_v34 = vadd.f32 %v1944_v47, %v542_v32 }
 0x8aa   : > { %v780_v24 = vpop.permute.xlu1 %779  ;;  %v541_v50 = vmul.f32 %v534_v58, %v310_v31 }
 0x8ab   : > { %v1361_v20 = vld [vmem:[#allocation3 + $0x38] sm:$0xff]  ;;  %v787_v12 = vmul.f32 %v780_v24, %v310_v31 }
 0x8ac   : > { %v1360_v8 = vld [vmem:[#allocation3 + $0x30] sm:$0xff]  ;;  %1757 = vrcp.f32 %v1361_v20  ;;  %v543_v13 = vadd.f32 %v541_v50, %v1946_v48 }
 0x8ad   : > { %1759 = vrcp.f32 %v1360_v8  ;;  %v794_v61 = vpop.permute.xlu0 %793 }
 0x8ae   : > { %v785_v25 = vpop.permute.xlu1 %784 }
 0x8af   : > { %v788_v46 = vmul.f32 %v785_v25, %v311_v40 }
 0x8b1   : > { %v798_v18 = vadd.f32 %v794_v61, %v788_v46 }
 0x8b2   : > { %v792_v26 = vpop.permute.xlu1 %791 }
 0x8b3   : > { %v797_v0 = vadd.f32 %v792_v26, %v787_v12  ;;  %v1306_v15 = vsel %vm312_vm0, %v544_v34, %v798_v18 }
 0x8b5   : > { %v1305_v44 = vsel %vm312_vm0, %v543_v13, %v797_v0 }
 0x8b6   : > { %v1758_v9 = vpop.eup %1757  ;;  %v1032_v28 = vpop.permute.xlu1 %1031 }
 0x8b7   : > { %v1760_v10 = vpop.eup %1759  ;;  %v1039_v23 = vmul.f32 %v1032_v28, %v310_v31 }
 0x8ba   : > { %v1037_v29 = vpop.permute.xlu1 %1036 }
 0x8bb   : > { %v1040_v16 = vmul.f32 %v1037_v29, %v311_v40 }
 0x8be   : > { %v1044_v55 = vpop.permute.xlu1 %1043 }
 0x8bf   : > { %v1049_v35 = vadd.f32 %v1044_v55, %v1039_v23 }
 0x8c1   : > { %v1307_v52 = vsel %vm404_vm7, %v1305_v44, %v1049_v35 }
 0x8c2   : > { %v1046_v21 = vpop.permute.xlu1 %1045 }
 0x8c3   : > { %v1050_v33 = vadd.f32 %v1046_v21, %v1040_v16 }
 0x8c5   : > { %v1308_v14 = vsel %vm404_vm7, %v1306_v15, %v1050_v33 }
 0x8c6   : > { %v1284_v56 = vpop.permute.xlu1 %1283  ;;  %v1325_v39 = vpop.permute.xlu0 %1324 }
 0x8c7   : > { %v1291_v37 = vmul.f32 %v1284_v56, %v310_v31 }
 0x8ca   : > { %v1289_v60 = vpop.permute.xlu1 %1288 }
 0x8cb   : > { %v1292_v36 = vmul.f32 %v1289_v60, %v311_v40 }
 0x8ce   : > { %v1330_v49 = vpop.permute.xlu0 %1329 }
 0x8d2   : > { %v1339_v62 = vpop.permute.xlu1 %1338 }
 0x8d3   : > { %v1376_v63 = vsel %vm312_vm0, %v1325_v39, %v1339_v62 }
 0x8d6   : > { %v1344_v42 = vpop.permute.xlu1 %1343 }
 0x8d7   : > { %v1377_v53 = vsel %vm312_vm0, %v1330_v49, %v1344_v42 }
 0x8da   : > { %v1353_v30 = vpop.permute.xlu0 %1352 }
 0x8db   : > { %v1378_v57 = vsel %vm404_vm7, %v1376_v63, %v1353_v30 }
 0x8de   : > { %v1358_v17 = vpop.permute.xlu1 %1357 }
 0x8df   : > { %v1379_v43 = vsel %vm404_vm7, %v1377_v53, %v1358_v17 }
 0x8e8   : > { %v1607_v3 = vpop.f32.mrb[6].mxu0 }
 0x8e9   : > { %v1272_v5 = vpop.f32.mrb[7].mxu0  ;;  %1297 = vrot.lane.b32.xlu1 %v1607_v3, %s1793_s5 }
 0x8ea   : > { %1295 = vrot.lane.b32.xlu0 %v1272_v5, %s1793_s5 }
 0x8ed   : > { %1371 = vperm.xlu1 %1681, %v1758_v9  }
 0x8ee   : > { %1366 = vperm.xlu0 %1687, %v1760_v10  }
 0x95b   : > { %v1298_v11 = vpop.permute.xlu1 %1297 }
 0x95c   : > { %v1302_v38 = vadd.f32 %v1298_v11, %v1292_v36  ;;  %v1296_v41 = vpop.permute.xlu0 %1295 }
 0x95d   : > { %v1301_v51 = vadd.f32 %v1296_v41, %v1291_v37 }
 0x95e   : > { %v1311_v47 = vsel %vm1309_vm10, %v1308_v14, %v1302_v38 }
 0x95f   : > { %1314 = vst.msk [vmem:[#allocation4 + $0x8] sm:$0xff] %vm284_vm9, %v1311_v47  ;;  %v1310_v48 = vsel %vm1309_vm10, %v1307_v52, %v1301_v51 }
 0x960   : > { %1313 = vst.msk [vmem:[#allocation4] sm:$0xff] %vm284_vm9, %v1310_v48 }
 0x966   : > { %v1375_v19 = vld [vmem:[#allocation4 + $0x8] sm:$0xff] }
 0x967   : > { %v1374_v1 = vld [vmem:[#allocation4] sm:$0xff] }
 0x96c   : > { %v1372_v54 = vpop.permute.xlu1 %1371 }
 0x96d   : > { %v1381_v59 = vsel %vm1309_vm10, %v1379_v43, %v1372_v54  ;;  %v1367_v45 = vpop.permute.xlu0 %1366 }
 0x96e   : > { %v1380_v2 = vsel %vm1309_vm10, %v1378_v57, %v1367_v45  ;;  %v1383_v6 = vmul.f32 %v1381_v59, %v1375_v19 }
 0x96f   : > { %v1382_v4 = vmul.f32 %v1380_v2, %v1374_v1 }
 0x970   : > { %1385 = vst.msk [vmem:[%s260_s8 + $0x8] sm:$0xff] %vm284_vm9, %v1383_v6 }
 0x971   : > { %1384 = vst.msk [vmem:[%s260_s8] sm:$0xff] %vm284_vm9, %v1382_v4 }
 0x972 PF: > { %s13_s14 = sadd.s32 1, %s1783_s14   ;;  %s2171_s12 = smov %s1779_s13 }
 0x973   : > { %p10_p5 = scmp.ge.s32.totalorder %s13_s14, 6   ;;  %s2172_s13 = smov %s2174_s15 }
 0x975   :  { %12 = sbr.rel (!%p10_p5) target bundleno = 2 (0x2), region = 82 }

// kernel: model_forward.17
= control target key start
LH: loop header
LB: loop body
LE: loop exit
PB: predicated region body
PF: predicated region fallthrough
CT: control target
= control target key end

     0   :  { %vm47_vm0 = vcmask 261120   ;;  %vm18_vm1 = vcmask 523264   ;;  %v343_v3 = vmov 0.0   ;;  %s459_s1 = inlined_call_operand.vmem [shape: f32[32,64], index: 1, kind: input, shape index: {}]   ;;  %s460_s0 = inlined_call_operand.vmem [shape: f32[64,32], index: 0, kind: input, shape index: {}]   ;;  %s461_s2 = inlined_call_operand.vmem [shape: f32[1,64], index: 2, kind: input, shape index: {}]   ;;  %s462_s3 = inlined_call_operand.vmem [shape: f32[64,64], index: 3, kind: output, shape index: {}]  }
   0x1   :  { %v43_v0 = vld [vmem:[%s459_s1] sm:$0xff]  ;;  %v44_v1 = vld [vmem:[%s459_s1 + $0x8] sm:$0xff]  ;;  %v45_v2 = vld [vmem:[%s459_s1 + $0x10] sm:$0xff]  ;;  %20 = vst.msk [vmem:[#allocation2 + $0x8] sm:$0xff] %vm18_vm1, %v343_v3 }
   0x2   :  { %19 = vst.msk [vmem:[#allocation2] sm:$0xff] %vm18_vm1, %v343_v3  ;;  %21 = vst.msk [vmem:[#allocation2 + $0x10] sm:$0xff] %vm18_vm1, %v343_v3  ;;  %v314_v4 = vpack.c.bf16 %v44_v1, %v43_v0  ;;  %v46_v5 = vld [vmem:[%s459_s1 + $0x18] sm:$0xff]  ;;  %v35_v6 = vld [vmem:[%s460_s0] sm:$0xff] }
   0x3   :  { %22 = vst.msk [vmem:[#allocation2 + $0x18] sm:$0xff] %vm18_vm1, %v343_v3  ;;  %23 = vst.msk [vmem:[#allocation2 + $0x20] sm:$0xff] %vm18_vm1, %v343_v3  ;;  %v39_v7 = vld [vmem:[%s460_s0 + $0x20] sm:$0xff]  ;;  %v318_v8 = vpack.c.bf16 %v46_v5, %v45_v2  ;;  %302 = vmatprep.mubr.msk.f32.mxu0 %vm47_vm0, %v35_v6  ;;  %v36_v9 = vld [vmem:[%s460_s0 + $0x8] sm:$0xff] }
   0x4   :  { %24 = vst.msk [vmem:[#allocation2 + $0x28] sm:$0xff] %vm18_vm1, %v343_v3  ;;  %25 = vst.msk [vmem:[#allocation2 + $0x30] sm:$0xff] %vm18_vm1, %v343_v3  ;;  %308 = vmatprep.mubr.msk.f32.mxu1 %vm47_vm0, %v39_v7  ;;  %315 = vmatprep.subr.bf16.mxu0 %v314_v4  ;;  %v40_v10 = vld [vmem:[%s460_s0 + $0x28] sm:$0xff]  ;;  %v37_v11 = vld [vmem:[%s460_s0 + $0x10] sm:$0xff] }
   0x5   :  { %26 = vst.msk [vmem:[#allocation2 + $0x38] sm:$0xff] %vm18_vm1, %v343_v3  ;;  %322 = vmatprep.subr.bf16.mxu1 %v314_v4  ;;  %317 = vmatpush3.bf16.msra.mxu0 %v314_v4  ;;  %v41_v12 = vld [vmem:[%s460_s0 + $0x30] sm:$0xff]  ;;  %v38_v13 = vld [vmem:[%s460_s0 + $0x18] sm:$0xff]  ;;  %v281_v39 = vld [vmem:[%s461_s2] ss:$0 sm:$0xff] }
   0x6   :  { %324 = vmatpush3.bf16.msra.mxu1 %v314_v4  ;;  %319 = vmatprep.subr.bf16.mxu0 %v318_v8  ;;  %v42_v14 = vld [vmem:[%s460_s0 + $0x38] sm:$0xff] }
   0x7   :  { %323 = vmatprep.subr.bf16.mxu1 %v318_v8 }
   0x8   :  { %v28_v15 = vld [vmem:[#allocation2 + $0x8] sm:$0xff] }
   0x9   :  { %321 = vmatpush3.bf16.msra.mxu0 %v318_v8  ;;  %v27_v17 = vld [vmem:[#allocation2] sm:$0xff]  ;;  %v29_v29 = vld [vmem:[#allocation2 + $0x10] sm:$0xff] }
   0xa   :  { %325 = vmatpush3.bf16.msra.mxu1 %v318_v8  ;;  %v31_v18 = vld [vmem:[#allocation2 + $0x20] sm:$0xff]  ;;  %v30_v27 = vld [vmem:[#allocation2 + $0x18] sm:$0xff] }
   0xb   :  { %v32_v16 = vld [vmem:[#allocation2 + $0x28] sm:$0xff]  ;;  %v33_v30 = vld [vmem:[#allocation2 + $0x30] sm:$0xff] }
   0xc   :  { %303 = vmatmul.mubr.msk.f32.vlgmr.msra.gmra.mrb[0].mxu0 %vm47_vm0, %v36_v9  ;;  %v34_v28 = vld [vmem:[#allocation2 + $0x38] sm:$0xff] }
   0xd   :  { %309 = vmatmul.mubr.msk.f32.vlgmr.msra.gmra.mrb[0].mxu1 %vm47_vm0, %v40_v10  ;;  %305 = vmatprep.mubr.msk.f32.mxu0 %vm47_vm0, %v37_v11 }
   0xe   :  { %311 = vmatprep.mubr.msk.f32.mxu1 %vm47_vm0, %v41_v12 }
  0x10   :  { %306 = vmatmul.mubr.msk.f32.gmra.mrb[2].mxu0 %vm47_vm0, %v38_v13 }
  0x11   :  { %312 = vmatmul.mubr.msk.f32.gmra.mrb[2].mxu1 %vm47_vm0, %v42_v14 }
  0xdf   :  { %v304_v19 = vpop.f32.mrb[0].mxu0 }
  0xe0   :  { %v310_v20 = vpop.f32.mrb[0].mxu1  ;;  %v178_v21 = vadd.f32 %v304_v19, %v28_v15  ;;  %v138_v23 = vpop.f32.mrb[1].mxu0 }
  0xe1   :  { %v182_v22 = vadd.f32 %v310_v20, %v32_v16  ;;  %v158_v24 = vpop.f32.mrb[1].mxu1  ;;  %v177_v25 = vadd.f32 %v138_v23, %v27_v17 }
  0xe2   :  { %v181_v26 = vadd.f32 %v158_v24, %v31_v18  ;;  %187 = vst.msk [vmem:[#allocation2 + $0x8] sm:$0xff] %vm18_vm1, %v178_v21 }
  0xe3   :  { %191 = vst.msk [vmem:[#allocation2 + $0x28] sm:$0xff] %vm18_vm1, %v182_v22  ;;  %186 = vst.msk [vmem:[#allocation2] sm:$0xff] %vm18_vm1, %v177_v25  ;;  %v307_v31 = vpop.f32.mrb[2].mxu0 }
  0xe4   :  { %190 = vst.msk [vmem:[#allocation2 + $0x20] sm:$0xff] %vm18_vm1, %v181_v26  ;;  %v313_v32 = vpop.f32.mrb[2].mxu1  ;;  %v180_v33 = vadd.f32 %v307_v31, %v30_v27  ;;  %v148_v35 = vpop.f32.mrb[3].mxu0 }
  0xe5   :  { %v184_v34 = vadd.f32 %v313_v32, %v34_v28  ;;  %v168_v36 = vpop.f32.mrb[3].mxu1  ;;  %v179_v37 = vadd.f32 %v148_v35, %v29_v29 }
  0xe6   :  { %v183_v38 = vadd.f32 %v168_v36, %v33_v30  ;;  %189 = vst.msk [vmem:[#allocation2 + $0x18] sm:$0xff] %vm18_vm1, %v180_v33 }
  0xe7   :  { %193 = vst.msk [vmem:[#allocation2 + $0x38] sm:$0xff] %vm18_vm1, %v184_v34  ;;  %188 = vst.msk [vmem:[#allocation2 + $0x10] sm:$0xff] %vm18_vm1, %v179_v37 }
  0xe8   :  { %192 = vst.msk [vmem:[#allocation2 + $0x30] sm:$0xff] %vm18_vm1, %v183_v38 }
  0xe9   :  { %v198_v40 = vld [vmem:[#allocation2 + $0x8] sm:$0xff] }
  0xea   :  { %v202_v41 = vld [vmem:[#allocation2 + $0x28] sm:$0xff]  ;;  %v213_v42 = vadd.f32 %v281_v39, %v198_v40  ;;  %v197_v44 = vld [vmem:[#allocation2] sm:$0xff] }
  0xeb   :  { %v217_v43 = vadd.f32 %v281_v39, %v202_v41  ;;  %v201_v45 = vld [vmem:[#allocation2 + $0x20] sm:$0xff]  ;;  %v212_v46 = vadd.f32 %v281_v39, %v197_v44 }
  0xec   :  { %v216_v47 = vadd.f32 %v281_v39, %v201_v45  ;;  %v230_v48 = vmul.f32 0.70710677, %v213_v42  ;;  %v221_v2 = vmul.f32 0.5, %v213_v42 }
  0xed   :  { %v234_v49 = vmul.f32 0.70710677, %v217_v43  ;;  %v229_v50 = vmul.f32 0.70710677, %v212_v46  ;;  %v200_v52 = vld [vmem:[#allocation2 + $0x18] sm:$0xff]  ;;  %v225_v5 = vmul.f32 0.5, %v217_v43 }
  0xee   :  { %v233_v51 = vmul.f32 0.70710677, %v216_v47  ;;  %327 = verf.f32 %v230_v48  ;;  %v204_v53 = vld [vmem:[#allocation2 + $0x38] sm:$0xff]  ;;  %v199_v54 = vld [vmem:[#allocation2 + $0x10] sm:$0xff]  ;;  %v215_v55 = vadd.f32 %v281_v39, %v200_v52  ;;  %v220_v9 = vmul.f32 0.5, %v212_v46 }
  0xef   :  { %329 = verf.f32 %v234_v49  ;;  %v219_v56 = vadd.f32 %v281_v39, %v204_v53  ;;  %v214_v57 = vadd.f32 %v281_v39, %v199_v54  ;;  %v203_v58 = vld [vmem:[#allocation2 + $0x30] sm:$0xff]  ;;  %v224_v12 = vmul.f32 0.5, %v216_v47 }
  0xf0   :  { %331 = verf.f32 %v229_v50  ;;  %v218_v59 = vadd.f32 %v281_v39, %v203_v58  ;;  %v232_v60 = vmul.f32 0.70710677, %v215_v55  ;;  %v223_v18 = vmul.f32 0.5, %v215_v55 }
  0xf1   :  { %333 = verf.f32 %v233_v51  ;;  %v236_v61 = vmul.f32 0.70710677, %v219_v56  ;;  %v231_v62 = vmul.f32 0.70710677, %v214_v57  ;;  %v227_v21 = vmul.f32 0.5, %v219_v56 }
  0xf2   :  { %335 = verf.f32 %v232_v60  ;;  %v235_v63 = vmul.f32 0.70710677, %v218_v59  ;;  %v222_v25 = vmul.f32 0.5, %v214_v57  ;;  %v226_v28 = vmul.f32 0.5, %v218_v59 }
  0xf3   :  { %337 = verf.f32 %v236_v61 }
  0xf4   :  { %339 = verf.f32 %v231_v62 }
  0xf5   :  { %341 = verf.f32 %v235_v63 }
  0xf8   :  { %v328_v0 = vpop.eup %327 }
  0xf9   :  { %v330_v1 = vpop.eup %329  ;;  %v246_v3 = vadd.f32 1.0, %v328_v0 }
  0xfa   :  { %v332_v4 = vpop.eup %331  ;;  %v250_v6 = vadd.f32 1.0, %v330_v1 }
  0xfb   :  { %v334_v7 = vpop.eup %333  ;;  %v254_v8 = vmul.f32 %v246_v3, %v221_v2  ;;  %v245_v10 = vadd.f32 1.0, %v332_v4 }
  0xfc   :  { %v258_v11 = vmul.f32 %v250_v6, %v225_v5  ;;  %v249_v13 = vadd.f32 1.0, %v334_v7  ;;  %v336_v14 = vpop.eup %335 }
  0xfd   :  { %262 = vst.msk [vmem:[%s462_s3 + $0x8] sm:$0xff] %vm18_vm1, %v254_v8  ;;  %v253_v15 = vmul.f32 %v245_v10, %v220_v9  ;;  %v338_v16 = vpop.eup %337  ;;  %v248_v19 = vadd.f32 1.0, %v336_v14 }
  0xfe   :  { %266 = vst.msk [vmem:[%s462_s3 + $0x28] sm:$0xff] %vm18_vm1, %v258_v11  ;;  %v257_v17 = vmul.f32 %v249_v13, %v224_v12  ;;  %v340_v20 = vpop.eup %339  ;;  %v252_v22 = vadd.f32 1.0, %v338_v16 }
  0xff   :  { %261 = vst.msk [vmem:[%s462_s3] sm:$0xff] %vm18_vm1, %v253_v15  ;;  %v342_v23 = vpop.eup %341  ;;  %v256_v24 = vmul.f32 %v248_v19, %v223_v18  ;;  %v247_v26 = vadd.f32 1.0, %v340_v20 }
 0x100   :  { %265 = vst.msk [vmem:[%s462_s3 + $0x20] sm:$0xff] %vm18_vm1, %v257_v17  ;;  %v260_v27 = vmul.f32 %v252_v22, %v227_v21  ;;  %v251_v29 = vadd.f32 1.0, %v342_v23 }
 0x101   :  { %264 = vst.msk [vmem:[%s462_s3 + $0x18] sm:$0xff] %vm18_vm1, %v256_v24  ;;  %v255_v30 = vmul.f32 %v247_v26, %v222_v25 }
 0x102   :  { %268 = vst.msk [vmem:[%s462_s3 + $0x38] sm:$0xff] %vm18_vm1, %v260_v27  ;;  %v259_v31 = vmul.f32 %v251_v29, %v226_v28 }
 0x103   :  { %263 = vst.msk [vmem:[%s462_s3 + $0x10] sm:$0xff] %vm18_vm1, %v255_v30 }
 0x104   :  { %267 = vst.msk [vmem:[%s462_s3 + $0x30] sm:$0xff] %vm18_vm1, %v259_v31 }

// kernel: model_forward.24
= control target key start
LH: loop header
LB: loop body
LE: loop exit
PB: predicated region body
PF: predicated region fallthrough
CT: control target
= control target key end

     0   :  { %vm35_vm0 = vcmask 261120   ;;  %vm18_vm1 = vcmask 523264   ;;  %v237_v3 = vmov 0.0   ;;  %s313_s1 = inlined_call_operand.vmem [shape: f32[32,64], index: 1, kind: input, shape index: {}]   ;;  %s314_s0 = inlined_call_operand.vmem [shape: f32[32,32], index: 0, kind: input, shape index: {}]   ;;  %s315_s2 = inlined_call_operand.vmem [shape: f32[1,64], index: 2, kind: input, shape index: {}]   ;;  %s316_s3 = inlined_call_operand.vmem [shape: f32[32,64], index: 3, kind: output, shape index: {}]  }
   0x1   :  { %v31_v0 = vld [vmem:[%s313_s1] sm:$0xff]  ;;  %v32_v1 = vld [vmem:[%s313_s1 + $0x8] sm:$0xff]  ;;  %v33_v2 = vld [vmem:[%s313_s1 + $0x10] sm:$0xff]  ;;  %20 = vst.msk [vmem:[#allocation2 + $0x8] sm:$0xff] %vm18_vm1, %v237_v3 }
   0x2   :  { %19 = vst.msk [vmem:[#allocation2] sm:$0xff] %vm18_vm1, %v237_v3  ;;  %21 = vst.msk [vmem:[#allocation2 + $0x10] sm:$0xff] %vm18_vm1, %v237_v3  ;;  %v216_v4 = vpack.c.bf16 %v32_v1, %v31_v0  ;;  %v34_v5 = vld [vmem:[%s313_s1 + $0x18] sm:$0xff]  ;;  %v27_v6 = vld [vmem:[%s314_s0] sm:$0xff] }
   0x3   :  { %22 = vst.msk [vmem:[#allocation2 + $0x18] sm:$0xff] %vm18_vm1, %v237_v3  ;;  %v29_v7 = vld [vmem:[%s314_s0 + $0x10] sm:$0xff]  ;;  %v220_v8 = vpack.c.bf16 %v34_v5, %v33_v2  ;;  %210 = vmatprep.mubr.msk.f32.mxu0 %vm35_vm0, %v27_v6  ;;  %v28_v9 = vld [vmem:[%s314_s0 + $0x8] sm:$0xff]  ;;  %v30_v10 = vld [vmem:[%s314_s0 + $0x18] sm:$0xff] }
   0x4   :  { %213 = vmatprep.mubr.msk.f32.mxu1 %vm35_vm0, %v29_v7  ;;  %217 = vmatprep.subr.bf16.mxu0 %v216_v4  ;;  %v193_v23 = vld [vmem:[%s315_s2] ss:$0 sm:$0xff] }
   0x5   :  { %224 = vmatprep.subr.bf16.mxu1 %v216_v4  ;;  %219 = vmatpush3.bf16.msra.mxu0 %v216_v4 }
   0x6   :  { %226 = vmatpush3.bf16.msra.mxu1 %v216_v4  ;;  %221 = vmatprep.subr.bf16.mxu0 %v220_v8 }
   0x7   :  { %225 = vmatprep.subr.bf16.mxu1 %v220_v8 }
   0x8   :  { %v24_v11 = vld [vmem:[#allocation2 + $0x8] sm:$0xff] }
   0x9   :  { %223 = vmatpush3.bf16.msra.mxu0 %v220_v8  ;;  %v23_v13 = vld [vmem:[#allocation2] sm:$0xff]  ;;  %v25_v14 = vld [vmem:[#allocation2 + $0x10] sm:$0xff] }
   0xa   :  { %227 = vmatpush3.bf16.msra.mxu1 %v220_v8  ;;  %v26_v12 = vld [vmem:[#allocation2 + $0x18] sm:$0xff] }
   0xc   :  { %211 = vmatmul.mubr.msk.f32.vlgmr.msra.gmra.mrb[0].mxu0 %vm35_vm0, %v28_v9 }
   0xd   :  { %214 = vmatmul.mubr.msk.f32.vlgmr.msra.gmra.mrb[0].mxu1 %vm35_vm0, %v30_v10 }
  0xdf   :  { %v212_v15 = vpop.f32.mrb[0].mxu0 }
  0xe0   :  { %v215_v16 = vpop.f32.mrb[0].mxu1  ;;  %v134_v17 = vadd.f32 %v212_v15, %v24_v11  ;;  %v114_v19 = vpop.f32.mrb[1].mxu0 }
  0xe1   :  { %v136_v18 = vadd.f32 %v215_v16, %v26_v12  ;;  %v124_v20 = vpop.f32.mrb[1].mxu1  ;;  %v133_v21 = vadd.f32 %v114_v19, %v23_v13 }
  0xe2   :  { %v135_v22 = vadd.f32 %v124_v20, %v25_v14  ;;  %139 = vst.msk [vmem:[#allocation2 + $0x8] sm:$0xff] %vm18_vm1, %v134_v17 }
  0xe3   :  { %141 = vst.msk [vmem:[#allocation2 + $0x18] sm:$0xff] %vm18_vm1, %v136_v18  ;;  %138 = vst.msk [vmem:[#allocation2] sm:$0xff] %vm18_vm1, %v133_v21 }
  0xe4   :  { %140 = vst.msk [vmem:[#allocation2 + $0x10] sm:$0xff] %vm18_vm1, %v135_v22 }
  0xe9   :  { %v146_v24 = vld [vmem:[#allocation2 + $0x8] sm:$0xff] }
  0xea   :  { %v148_v25 = vld [vmem:[#allocation2 + $0x18] sm:$0xff]  ;;  %v157_v26 = vadd.f32 %v193_v23, %v146_v24  ;;  %v145_v28 = vld [vmem:[#allocation2] sm:$0xff] }
  0xeb   :  { %v159_v27 = vadd.f32 %v193_v23, %v148_v25  ;;  %v147_v29 = vld [vmem:[#allocation2 + $0x10] sm:$0xff]  ;;  %v156_v30 = vadd.f32 %v193_v23, %v145_v28 }
  0xec   :  { %v158_v31 = vadd.f32 %v193_v23, %v147_v29  ;;  %v166_v32 = vmul.f32 0.70710677, %v157_v26  ;;  %v161_v38 = vmul.f32 0.5, %v157_v26 }
  0xed   :  { %v168_v33 = vmul.f32 0.70710677, %v159_v27  ;;  %v165_v34 = vmul.f32 0.70710677, %v156_v30  ;;  %v163_v41 = vmul.f32 0.5, %v159_v27  ;;  %v160_v45 = vmul.f32 0.5, %v156_v30 }
  0xee   :  { %v167_v35 = vmul.f32 0.70710677, %v158_v31  ;;  %229 = verf.f32 %v166_v32  ;;  %v162_v48 = vmul.f32 0.5, %v158_v31 }
  0xef   :  { %231 = verf.f32 %v168_v33 }
  0xf0   :  { %233 = verf.f32 %v165_v34 }
  0xf1   :  { %235 = verf.f32 %v167_v35 }
  0xf8   :  { %v230_v36 = vpop.eup %229 }
  0xf9   :  { %v232_v37 = vpop.eup %231  ;;  %v174_v39 = vadd.f32 1.0, %v230_v36 }
  0xfa   :  { %v234_v40 = vpop.eup %233  ;;  %v176_v42 = vadd.f32 1.0, %v232_v37 }
  0xfb   :  { %v236_v43 = vpop.eup %235  ;;  %v178_v44 = vmul.f32 %v174_v39, %v161_v38  ;;  %v173_v46 = vadd.f32 1.0, %v234_v40 }
  0xfc   :  { %v180_v47 = vmul.f32 %v176_v42, %v163_v41  ;;  %v175_v49 = vadd.f32 1.0, %v236_v43 }
  0xfd   :  { %182 = vst.msk [vmem:[%s316_s3 + $0x8] sm:$0xff] %vm18_vm1, %v178_v44  ;;  %v177_v50 = vmul.f32 %v173_v46, %v160_v45 }
  0xfe   :  { %184 = vst.msk [vmem:[%s316_s3 + $0x18] sm:$0xff] %vm18_vm1, %v180_v47  ;;  %v179_v51 = vmul.f32 %v175_v49, %v162_v48 }
  0xff   :  { %181 = vst.msk [vmem:[%s316_s3] sm:$0xff] %vm18_vm1, %v177_v50 }
 0x100   :  { %183 = vst.msk [vmem:[%s316_s3 + $0x10] sm:$0xff] %vm18_vm1, %v179_v51 }

// kernel: model_forward.18
= control target key start
LH: loop header
LB: loop body
LE: loop exit
PB: predicated region body
PF: predicated region fallthrough
CT: control target
= control target key end

     0   :  { %vm27_vm0 = vcmask 261120   ;;  %v492_v3 = vmov 0.0   ;;  %vm60_vm1 = vcmask 523264   ;;  %s721_s1 = inlined_call_operand.vmem [shape: f32[64,32], index: 1, kind: input, shape index: {}]   ;;  %s722_s0 = inlined_call_operand.vmem [shape: f32[64,64], index: 0, kind: input, shape index: {}]   ;;  %s723_s2 = inlined_call_operand.vmem [shape: f32[1,32], index: 2, kind: input, shape index: {}]   ;;  %s724_s3 = inlined_call_operand.vmem [shape: f32[64,32], index: 3, kind: input, shape index: {}]   ;;  %s725_s4 = inlined_call_operand.vmem [shape: f32[1,32], index: 4, kind: input, shape index: {}]   ;;  %s726_s5 = inlined_call_operand.vmem [shape: f32[1,32], index: 5, kind: input, shape index: {}]   ;;  %s727_s6 = inlined_call_operand.vmem [shape: f32[64,32], index: 6, kind: output, shape index: {}]  }
   0x1   :  { %v52_v0 = vld [vmem:[%s721_s1] sm:$0xff]  ;;  %v53_v1 = vld [vmem:[%s721_s1 + $0x8] sm:$0xff]  ;;  %v54_v2 = vld [vmem:[%s721_s1 + $0x10] sm:$0xff]  ;;  %29 = vst.msk [vmem:[#allocation2 + $0x8] sm:$0xff] %vm27_vm0, %v492_v3 }
   0x2   :  { %28 = vst.msk [vmem:[#allocation2] sm:$0xff] %vm27_vm0, %v492_v3  ;;  %30 = vst.msk [vmem:[#allocation2 + $0x10] sm:$0xff] %vm27_vm0, %v492_v3  ;;  %v451_v4 = vpack.c.bf16 %v53_v1, %v52_v0  ;;  %v55_v5 = vld [vmem:[%s721_s1 + $0x18] sm:$0xff]  ;;  %v56_v7 = vld [vmem:[%s721_s1 + $0x20] sm:$0xff] }
   0x3   :  { %31 = vst.msk [vmem:[#allocation2 + $0x18] sm:$0xff] %vm27_vm0, %v492_v3  ;;  %32 = vst.msk [vmem:[#allocation2 + $0x20] sm:$0xff] %vm27_vm0, %v492_v3  ;;  %v455_v6 = vpack.c.bf16 %v55_v5, %v54_v2  ;;  %v57_v8 = vld [vmem:[%s721_s1 + $0x28] sm:$0xff]  ;;  %v44_v9 = vld [vmem:[%s722_s0] sm:$0xff] }
   0x4   :  { %33 = vst.msk [vmem:[#allocation2 + $0x28] sm:$0xff] %vm27_vm0, %v492_v3  ;;  %34 = vst.msk [vmem:[#allocation2 + $0x30] sm:$0xff] %vm27_vm0, %v492_v3  ;;  %452 = vmatprep.subr.bf16.mxu0 %v451_v4  ;;  %467 = vmatprep.subr.bf16.mxu1 %v451_v4  ;;  %v48_v10 = vld [vmem:[%s722_s0 + $0x20] sm:$0xff]  ;;  %v459_v11 = vpack.c.bf16 %v57_v8, %v56_v7  ;;  %v58_v12 = vld [vmem:[%s721_s1 + $0x30] sm:$0xff] }
   0x5   :  { %35 = vst.msk [vmem:[#allocation2 + $0x38] sm:$0xff] %vm27_vm0, %v492_v3  ;;  %454 = vmatpush3.bf16.msra.mxu0 %v451_v4  ;;  %471 = vmatpush3.bf16.msra.mxu1 %v451_v4  ;;  %v59_v13 = vld [vmem:[%s721_s1 + $0x38] sm:$0xff]  ;;  %v45_v15 = vld [vmem:[%s722_s0 + $0x8] sm:$0xff]  ;;  %v46_v17 = vld [vmem:[%s722_s0 + $0x10] sm:$0xff] }
   0x6   :  { %456 = vmatprep.subr.bf16.mxu0 %v455_v6  ;;  %468 = vmatprep.subr.bf16.mxu1 %v455_v6  ;;  %v463_v14 = vpack.c.bf16 %v59_v13, %v58_v12  ;;  %v49_v16 = vld [vmem:[%s722_s0 + $0x28] sm:$0xff]  ;;  %v50_v18 = vld [vmem:[%s722_s0 + $0x30] sm:$0xff]  ;;  %v47_v19 = vld [vmem:[%s722_s0 + $0x18] sm:$0xff] }
   0x7   :  { %439 = vmatprep.mubr.msk.f32.mxu0 %vm60_vm1, %v44_v9  ;;  %445 = vmatprep.mubr.msk.f32.mxu1 %vm60_vm1, %v48_v10  ;;  %v51_v20 = vld [vmem:[%s722_s0 + $0x38] sm:$0xff]  ;;  %v404_v45 = vld [vmem:[%s723_s2] ss:$0 sm:$0xff]  ;;  %v238_v46 = vld [vmem:[%s724_s3 + $0x28] sm:$0xff] }
   0x8   :  { %v37_v21 = vld [vmem:[#allocation2 + $0x8] sm:$0xff]  ;;  %v233_v55 = vld [vmem:[%s724_s3] sm:$0xff]  ;;  %v236_v59 = vld [vmem:[%s724_s3 + $0x18] sm:$0xff] }
   0x9   :  { %458 = vmatpush3.bf16.msra.mxu0 %v455_v6  ;;  %472 = vmatpush3.bf16.msra.mxu1 %v455_v6  ;;  %v36_v23 = vld [vmem:[#allocation2] sm:$0xff]  ;;  %v38_v35 = vld [vmem:[#allocation2 + $0x10] sm:$0xff]  ;;  %v234_v49 = vld [vmem:[%s724_s3 + $0x8] sm:$0xff] }
   0xa   :  { %460 = vmatprep.subr.bf16.mxu0 %v459_v11  ;;  %469 = vmatprep.subr.bf16.mxu1 %v459_v11  ;;  %v40_v24 = vld [vmem:[#allocation2 + $0x20] sm:$0xff]  ;;  %v39_v32 = vld [vmem:[#allocation2 + $0x18] sm:$0xff]  ;;  %v235_v3 = vld [vmem:[%s724_s3 + $0x10] sm:$0xff] }
   0xb   :  { %v41_v22 = vld [vmem:[#allocation2 + $0x28] sm:$0xff]  ;;  %v42_v36 = vld [vmem:[#allocation2 + $0x30] sm:$0xff]  ;;  %v237_v5 = vld [vmem:[%s724_s3 + $0x20] sm:$0xff] }
   0xc   :  { %v43_v34 = vld [vmem:[#allocation2 + $0x38] sm:$0xff] }
   0xd   :  { %462 = vmatpush3.bf16.msra.mxu0 %v459_v11  ;;  %473 = vmatpush3.bf16.msra.mxu1 %v459_v11  ;;  %v239_v11 = vld [vmem:[%s724_s3 + $0x30] sm:$0xff]  ;;  %v240_v12 = vld [vmem:[%s724_s3 + $0x38] sm:$0xff] }
   0xe   :  { %464 = vmatprep.subr.bf16.mxu0 %v463_v14  ;;  %470 = vmatprep.subr.bf16.mxu1 %v463_v14 }
  0x11   :  { %466 = vmatpush3.bf16.msra.mxu0 %v463_v14  ;;  %474 = vmatpush3.bf16.msra.mxu1 %v463_v14 }
  0x14   :  { %440 = vmatmul.mubr.msk.f32.vlgmr.msra.gmra.mrb[0].mxu0 %vm60_vm1, %v45_v15  ;;  %446 = vmatmul.mubr.msk.f32.vlgmr.msra.gmra.mrb[0].mxu1 %vm60_vm1, %v49_v16 }
  0x15   :  { %442 = vmatprep.mubr.msk.f32.mxu0 %vm60_vm1, %v46_v17  ;;  %448 = vmatprep.mubr.msk.f32.mxu1 %vm60_vm1, %v50_v18 }
  0x18   :  { %443 = vmatmul.mubr.msk.f32.gmra.mrb[2].mxu0 %vm60_vm1, %v47_v19  ;;  %449 = vmatmul.mubr.msk.f32.gmra.mrb[2].mxu1 %vm60_vm1, %v51_v20 }
  0xe7   :  { %v441_v25 = vpop.f32.mrb[0].mxu0  ;;  %v447_v26 = vpop.f32.mrb[0].mxu1 }
  0xe8   :  { %v191_v27 = vadd.f32 %v441_v25, %v37_v21  ;;  %v195_v28 = vadd.f32 %v447_v26, %v41_v22  ;;  %v151_v29 = vpop.f32.mrb[1].mxu0  ;;  %v171_v30 = vpop.f32.mrb[1].mxu1 }
  0xe9   :  { %v190_v31 = vadd.f32 %v151_v29, %v36_v23  ;;  %v194_v33 = vadd.f32 %v171_v30, %v40_v24 }
  0xea   :  { %200 = vst.msk [vmem:[#allocation2 + $0x8] sm:$0xff] %vm27_vm0, %v191_v27  ;;  %204 = vst.msk [vmem:[#allocation2 + $0x28] sm:$0xff] %vm27_vm0, %v195_v28 }
  0xeb   :  { %199 = vst.msk [vmem:[#allocation2] sm:$0xff] %vm27_vm0, %v190_v31  ;;  %v444_v37 = vpop.f32.mrb[2].mxu0  ;;  %203 = vst.msk [vmem:[#allocation2 + $0x20] sm:$0xff] %vm27_vm0, %v194_v33  ;;  %v450_v38 = vpop.f32.mrb[2].mxu1 }
  0xec   :  { %v193_v39 = vadd.f32 %v444_v37, %v39_v32  ;;  %v161_v40 = vpop.f32.mrb[3].mxu0  ;;  %v197_v41 = vadd.f32 %v450_v38, %v43_v34  ;;  %v181_v42 = vpop.f32.mrb[3].mxu1 }
  0xed   :  { %v192_v43 = vadd.f32 %v161_v40, %v38_v35  ;;  %v196_v44 = vadd.f32 %v181_v42, %v42_v36 }
  0xee   :  { %202 = vst.msk [vmem:[#allocation2 + $0x18] sm:$0xff] %vm27_vm0, %v193_v39  ;;  %206 = vst.msk [vmem:[#allocation2 + $0x38] sm:$0xff] %vm27_vm0, %v197_v41 }
  0xef   :  { %201 = vst.msk [vmem:[#allocation2 + $0x10] sm:$0xff] %vm27_vm0, %v192_v43  ;;  %205 = vst.msk [vmem:[#allocation2 + $0x30] sm:$0xff] %vm27_vm0, %v196_v44 }
  0xf1   :  { %v215_v47 = vld [vmem:[#allocation2 + $0x28] sm:$0xff] }
  0xf2   :  { %v211_v48 = vld [vmem:[#allocation2 + $0x8] sm:$0xff]  ;;  %v230_v50 = vadd.f32 %v404_v45, %v215_v47  ;;  %v210_v52 = vld [vmem:[#allocation2] sm:$0xff] }
  0xf3   :  { %v226_v51 = vadd.f32 %v404_v45, %v211_v48  ;;  %v214_v53 = vld [vmem:[#allocation2 + $0x20] sm:$0xff]  ;;  %v225_v54 = vadd.f32 %v404_v45, %v210_v52 }
  0xf4   :  { %v246_v56 = vadd.f32 %v238_v46, %v230_v50  ;;  %v229_v60 = vadd.f32 %v404_v45, %v214_v53 }
  0xf5   :  { %v242_v57 = vadd.f32 %v234_v49, %v226_v51  ;;  %v213_v58 = vld [vmem:[#allocation2 + $0x18] sm:$0xff]  ;;  %v241_v0 = vadd.f32 %v233_v55, %v225_v54 }
  0xf6   :  { %v217_v61 = vld [vmem:[#allocation2 + $0x38] sm:$0xff]  ;;  %v264_v62 = vsel %vm27_vm0, %v246_v56, 0.0  ;;  %v228_v1 = vadd.f32 %v404_v45, %v213_v58  ;;  %v212_v2 = vld [vmem:[#allocation2 + $0x10] sm:$0xff]  ;;  %v245_v15 = vadd.f32 %v237_v5, %v229_v60 }
  0xf7   :  { %v252_v63 = vsel %vm27_vm0, %v242_v57, 0.0  ;;  %v216_v4 = vld [vmem:[#allocation2 + $0x30] sm:$0xff]  ;;  %265 = vadd.xlane.f32.xlu1 %v264_v62  ;;  %v227_v6 = vadd.f32 %v404_v45, %v212_v2  ;;  %v232_v9 = vadd.f32 %v404_v45, %v217_v61  ;;  %v249_v13 = vsel %vm27_vm0, %v241_v0, 0.0 }
  0xf8   :  { %253 = vadd.xlane.f32.xlu0 %v252_v63  ;;  %v244_v7 = vadd.f32 %v236_v59, %v228_v1  ;;  %v231_v8 = vadd.f32 %v404_v45, %v216_v4  ;;  %v261_v19 = vsel %vm27_vm0, %v245_v15, 0.0 }
  0xf9   :  { %v243_v10 = vadd.f32 %v235_v3, %v227_v6  ;;  %v248_v18 = vadd.f32 %v240_v12, %v232_v9 }
  0xfa   :  { %v258_v14 = vsel %vm27_vm0, %v244_v7, 0.0  ;;  %v247_v17 = vadd.f32 %v239_v11, %v231_v8 }
  0xfb   :  { %259 = vadd.xlane.f32.xlu1 %v258_v14  ;;  %v255_v16 = vsel %vm27_vm0, %v243_v10, 0.0  ;;  %v270_v21 = vsel %vm27_vm0, %v248_v18, 0.0 }
  0xfc   :  { %250 = vadd.xlane.f32.xlu0 %v249_v13  ;;  %v267_v20 = vsel %vm27_vm0, %v247_v17, 0.0 }
  0xff   :  { %256 = vadd.xlane.f32.xlu1 %v255_v16 }
 0x100   :  { %262 = vadd.xlane.f32.xlu0 %v261_v19 }
 0x103   :  { %271 = vadd.xlane.f32.xlu1 %v270_v21 }
 0x104   :  { %268 = vadd.xlane.f32.xlu0 %v267_v20 }
 0x184   :  { %v266_v22 = vpop.xlane.xlu1 %265 }
 0x185   :  { %v254_v23 = vpop.xlane.xlu0 %253  ;;  %v279_v24 = vmul.f32 0.03125, %v266_v22 }
 0x186   :  { %v275_v25 = vmul.f32 0.03125, %v254_v23  ;;  %v406_v23 = vld [vmem:[%s726_s5] ss:$0 sm:$0xff] }
 0x187   :  { %v635_v26 = vsub.f32 %v246_v56, %v279_v24 }
 0x188   :  { %v637_v27 = vsub.f32 %v242_v57, %v275_v25  ;;  %v260_v29 = vpop.xlane.xlu1 %259 }
 0x189   :  { %v251_v28 = vpop.xlane.xlu0 %250  ;;  %v277_v31 = vmul.f32 0.03125, %v260_v29  ;;  %v295_v36 = vmul.f32 %v635_v26, %v635_v26 }
 0x18a   :  { %v274_v30 = vmul.f32 0.03125, %v251_v28  ;;  %v291_v32 = vmul.f32 %v637_v27, %v637_v27 }
 0x18b   :  { %v643_v34 = vsub.f32 %v244_v7, %v277_v31  ;;  %v313_v46 = vsel %vm27_vm0, %v295_v36, 0.0 }
 0x18c   :  { %v641_v33 = vsub.f32 %v241_v0, %v274_v30  ;;  %v301_v35 = vsel %vm27_vm0, %v291_v32, 0.0  ;;  %v257_v38 = vpop.xlane.xlu1 %256 }
 0x18d   :  { %v263_v37 = vpop.xlane.xlu0 %262  ;;  %302 = vadd.xlane.f32.xlu1 %v301_v35  ;;  %v276_v40 = vmul.f32 0.03125, %v257_v38  ;;  %v293_v42 = vmul.f32 %v643_v34, %v643_v34 }
 0x18e   :  { %v278_v39 = vmul.f32 0.03125, %v263_v37  ;;  %v290_v41 = vmul.f32 %v641_v33, %v641_v33 }
 0x18f   :  { %v654_v44 = vsub.f32 %v243_v10, %v276_v40  ;;  %v307_v52 = vsel %vm27_vm0, %v293_v42, 0.0 }
 0x190   :  { %v652_v43 = vsub.f32 %v245_v15, %v278_v39  ;;  %v298_v45 = vsel %vm27_vm0, %v290_v41, 0.0  ;;  %v272_v48 = vpop.xlane.xlu1 %271 }
 0x191   :  { %299 = vadd.xlane.f32.xlu0 %v298_v45  ;;  %v269_v47 = vpop.xlane.xlu0 %268  ;;  %314 = vadd.xlane.f32.xlu1 %v313_v46  ;;  %v281_v50 = vmul.f32 0.03125, %v272_v48  ;;  %v292_v56 = vmul.f32 %v654_v44, %v654_v44 }
 0x192   :  { %v280_v49 = vmul.f32 0.03125, %v269_v47  ;;  %v294_v51 = vmul.f32 %v652_v43, %v652_v43 }
 0x193   :  { %v663_v54 = vsub.f32 %v248_v18, %v281_v50  ;;  %v304_v58 = vsel %vm27_vm0, %v292_v56, 0.0  ;;  %v405_v18 = vld [vmem:[%s725_s4] ss:$0 sm:$0xff] }
 0x194   :  { %v661_v53 = vsub.f32 %v247_v17, %v280_v49  ;;  %v310_v55 = vsel %vm27_vm0, %v294_v51, 0.0 }
 0x195   :  { %311 = vadd.xlane.f32.xlu0 %v310_v55  ;;  %308 = vadd.xlane.f32.xlu1 %v307_v52  ;;  %v297_v57 = vmul.f32 %v663_v54, %v663_v54 }
 0x196   :  { %v296_v60 = vmul.f32 %v661_v53, %v661_v53 }
 0x197   :  { %v319_v59 = vsel %vm27_vm0, %v297_v57, 0.0 }
 0x198   :  { %v316_v61 = vsel %vm27_vm0, %v296_v60, 0.0 }
 0x199   :  { %305 = vadd.xlane.f32.xlu0 %v304_v58  ;;  %320 = vadd.xlane.f32.xlu1 %v319_v59 }
 0x19d   :  { %317 = vadd.xlane.f32.xlu0 %v316_v61 }
 0x21a   :  { %v303_v62 = vpop.xlane.xlu1 %302 }
 0x21b   :  { %v323_v63 = vmul.f32 0.03125, %v303_v62 }
 0x21d   :  { %v331_v0 = vadd.f32 1e-05, %v323_v63 }
 0x21e   :  { %v300_v1 = vpop.xlane.xlu0 %299  ;;  %v315_v2 = vpop.xlane.xlu1 %314 }
 0x21f   :  { %476 = vrsqrt.f32 %v331_v0  ;;  %v322_v3 = vmul.f32 0.03125, %v300_v1  ;;  %v327_v4 = vmul.f32 0.03125, %v315_v2 }
 0x221   :  { %v330_v5 = vadd.f32 1e-05, %v322_v3  ;;  %v335_v6 = vadd.f32 1e-05, %v327_v4 }
 0x222   :  { %v312_v7 = vpop.xlane.xlu0 %311  ;;  %v309_v8 = vpop.xlane.xlu1 %308 }
 0x223   :  { %478 = vrsqrt.f32 %v330_v5  ;;  %v326_v9 = vmul.f32 0.03125, %v312_v7  ;;  %v325_v10 = vmul.f32 0.03125, %v309_v8 }
 0x224   :  { %480 = vrsqrt.f32 %v335_v6 }
 0x225   :  { %v334_v11 = vadd.f32 1e-05, %v326_v9  ;;  %v333_v12 = vadd.f32 1e-05, %v325_v10 }
 0x226   :  { %v306_v13 = vpop.xlane.xlu0 %305  ;;  %v321_v14 = vpop.xlane.xlu1 %320 }
 0x227   :  { %482 = vrsqrt.f32 %v334_v11  ;;  %v324_v15 = vmul.f32 0.03125, %v306_v13  ;;  %v329_v16 = vmul.f32 0.03125, %v321_v14 }
 0x228   :  { %484 = vrsqrt.f32 %v333_v12 }
 0x229   :  { %v477_v17 = vpop.eup %476  ;;  %v332_v19 = vadd.f32 1e-05, %v324_v15  ;;  %v337_v20 = vadd.f32 1e-05, %v329_v16 }
 0x22a   :  { %v347_v21 = vmul.f32 %v477_v17, %v637_v27  ;;  %v318_v22 = vpop.xlane.xlu0 %317 }
 0x22b   :  { %486 = vrsqrt.f32 %v332_v19  ;;  %v328_v24 = vmul.f32 0.03125, %v318_v22 }
 0x22c   :  { %v362_v25 = vmul.f32 %v405_v18, %v347_v21  ;;  %488 = vrsqrt.f32 %v337_v20 }
 0x22d   :  { %v479_v28 = vpop.eup %478  ;;  %v336_v29 = vadd.f32 1e-05, %v328_v24 }
 0x22e   :  { %v481_v30 = vpop.eup %480  ;;  %v377_v31 = vadd.f32 %v406_v23, %v362_v25  ;;  %v346_v32 = vmul.f32 %v479_v28, %v641_v33 }
 0x22f   :  { %v351_v35 = vmul.f32 %v481_v30, %v635_v26  ;;  %490 = vrsqrt.f32 %v336_v29 }
 0x230   :  { %385 = vst.msk [vmem:[%s727_s6 + $0x8] sm:$0xff] %vm27_vm0, %v377_v31  ;;  %v361_v27 = vmul.f32 %v405_v18, %v346_v32 }
 0x231   :  { %v483_v36 = vpop.eup %482  ;;  %v366_v37 = vmul.f32 %v405_v18, %v351_v35 }
 0x232   :  { %v485_v38 = vpop.eup %484  ;;  %v376_v39 = vadd.f32 %v406_v23, %v361_v27  ;;  %v350_v40 = vmul.f32 %v483_v36, %v652_v43 }
 0x233   :  { %v381_v41 = vadd.f32 %v406_v23, %v366_v37  ;;  %v349_v42 = vmul.f32 %v485_v38, %v643_v34 }
 0x234   :  { %384 = vst.msk [vmem:[%s727_s6] sm:$0xff] %vm27_vm0, %v376_v39  ;;  %v365_v26 = vmul.f32 %v405_v18, %v350_v40 }
 0x235   :  { %v487_v33 = vpop.eup %486  ;;  %389 = vst.msk [vmem:[%s727_s6 + $0x28] sm:$0xff] %vm27_vm0, %v381_v41  ;;  %v364_v45 = vmul.f32 %v405_v18, %v349_v42 }
 0x236   :  { %v489_v46 = vpop.eup %488  ;;  %v380_v47 = vadd.f32 %v406_v23, %v365_v26  ;;  %v348_v43 = vmul.f32 %v487_v33, %v654_v44 }
 0x237   :  { %v379_v48 = vadd.f32 %v406_v23, %v364_v45  ;;  %v353_v34 = vmul.f32 %v489_v46, %v663_v54 }
 0x238   :  { %388 = vst.msk [vmem:[%s727_s6 + $0x20] sm:$0xff] %vm27_vm0, %v380_v47  ;;  %v363_v49 = vmul.f32 %v405_v18, %v348_v43 }
 0x239   :  { %v491_v50 = vpop.eup %490  ;;  %387 = vst.msk [vmem:[%s727_s6 + $0x18] sm:$0xff] %vm27_vm0, %v379_v48  ;;  %v368_v51 = vmul.f32 %v405_v18, %v353_v34 }
 0x23a   :  { %v378_v52 = vadd.f32 %v406_v23, %v363_v49  ;;  %v352_v55 = vmul.f32 %v491_v50, %v661_v53 }
 0x23b   :  { %v383_v44 = vadd.f32 %v406_v23, %v368_v51 }
 0x23c   :  { %386 = vst.msk [vmem:[%s727_s6 + $0x10] sm:$0xff] %vm27_vm0, %v378_v52  ;;  %v367_v54 = vmul.f32 %v405_v18, %v352_v55 }
 0x23d   :  { %391 = vst.msk [vmem:[%s727_s6 + $0x38] sm:$0xff] %vm27_vm0, %v383_v44 }
 0x23e   :  { %v382_v56 = vadd.f32 %v406_v23, %v367_v54 }
 0x240   :  { %390 = vst.msk [vmem:[%s727_s6 + $0x30] sm:$0xff] %vm27_vm0, %v382_v56 }

// kernel: model_forward.25
= control target key start
LH: loop header
LB: loop body
LE: loop exit
PB: predicated region body
PF: predicated region fallthrough
CT: control target
= control target key end

     0   :  { %vm38_vm0 = vcmask 523264   ;;  %s308_s1 = inlined_call_operand.vmem [shape: f32[64,128], index: 1, kind: input, shape index: {}]   ;;  %s309_s0 = inlined_call_operand.vmem [shape: f32[32,64], index: 0, kind: input, shape index: {}]   ;;  %s310_s2 = inlined_call_operand.vmem [shape: f32[1,128], index: 2, kind: input, shape index: {}]   ;;  %s311_s3 = inlined_call_operand.vmem [shape: f32[32,128], index: 3, kind: output, shape index: {}]  }
   0x1   :  { %v30_v0 = vld [vmem:[%s308_s1] sm:$0xff]  ;;  %v31_v1 = vld [vmem:[%s308_s1 + $0x8] sm:$0xff]  ;;  %v32_v2 = vld [vmem:[%s308_s1 + $0x10] sm:$0xff] }
   0x2   :  { %v209_v3 = vpack.c.bf16 %v31_v1, %v30_v0  ;;  %v33_v4 = vld [vmem:[%s308_s1 + $0x18] sm:$0xff]  ;;  %v34_v6 = vld [vmem:[%s308_s1 + $0x20] sm:$0xff]  ;;  %v35_v7 = vld [vmem:[%s308_s1 + $0x28] sm:$0xff] }
   0x3   :  { %v213_v5 = vpack.c.bf16 %v33_v4, %v32_v2  ;;  %v26_v8 = vld [vmem:[%s309_s0] sm:$0xff]  ;;  %v28_v9 = vld [vmem:[%s309_s0 + $0x10] sm:$0xff]  ;;  %v217_v10 = vpack.c.bf16 %v35_v7, %v34_v6  ;;  %v37_v12 = vld [vmem:[%s308_s1 + $0x38] sm:$0xff] }
   0x4   :  { %210 = vmatprep.subr.bf16.mxu0 %v209_v3  ;;  %225 = vmatprep.subr.bf16.mxu1 %v209_v3  ;;  %v36_v11 = vld [vmem:[%s308_s1 + $0x30] sm:$0xff]  ;;  %v27_v14 = vld [vmem:[%s309_s0 + $0x8] sm:$0xff]  ;;  %v29_v15 = vld [vmem:[%s309_s0 + $0x18] sm:$0xff] }
   0x5   :  { %212 = vmatpush3.bf16.msra.mxu0 %v209_v3  ;;  %229 = vmatpush3.bf16.msra.mxu1 %v209_v3  ;;  %v221_v13 = vpack.c.bf16 %v37_v12, %v36_v11  ;;  %v174_v16 = vld [vmem:[%s310_s2] ss:$0 sm:$0xff] }
   0x6   :  { %214 = vmatprep.subr.bf16.mxu0 %v213_v5  ;;  %226 = vmatprep.subr.bf16.mxu1 %v213_v5 }
   0x7   :  { %203 = vmatprep.mubr.msk.f32.mxu0 %vm38_vm0, %v26_v8  ;;  %206 = vmatprep.mubr.msk.f32.mxu1 %vm38_vm0, %v28_v9 }
   0x9   :  { %216 = vmatpush3.bf16.msra.mxu0 %v213_v5  ;;  %230 = vmatpush3.bf16.msra.mxu1 %v213_v5 }
   0xa   :  { %218 = vmatprep.subr.bf16.mxu0 %v217_v10  ;;  %227 = vmatprep.subr.bf16.mxu1 %v217_v10 }
   0xd   :  { %220 = vmatpush3.bf16.msra.mxu0 %v217_v10  ;;  %231 = vmatpush3.bf16.msra.mxu1 %v217_v10 }
   0xe   :  { %222 = vmatprep.subr.bf16.mxu0 %v221_v13  ;;  %228 = vmatprep.subr.bf16.mxu1 %v221_v13 }
  0x11   :  { %224 = vmatpush3.bf16.msra.mxu0 %v221_v13  ;;  %232 = vmatpush3.bf16.msra.mxu1 %v221_v13 }
  0x14   :  { %204 = vmatmul.mubr.msk.f32.vlgmr.msra.gmra.mrb[0].mxu0 %vm38_vm0, %v27_v14  ;;  %207 = vmatmul.mubr.msk.f32.vlgmr.msra.gmra.mrb[0].mxu1 %vm38_vm0, %v29_v15 }
  0xe7   :  { %v205_v17 = vpop.f32.mrb[0].mxu0  ;;  %v208_v18 = vpop.f32.mrb[0].mxu1 }
  0xe8   :  { %v159_v19 = vadd.f32 %v205_v17, %v174_v16  ;;  %v161_v20 = vadd.f32 %v208_v18, %v174_v16  ;;  %v117_v21 = vpop.f32.mrb[1].mxu0  ;;  %v127_v22 = vpop.f32.mrb[1].mxu1 }
  0xe9   :  { %v158_v23 = vadd.f32 %v174_v16, %v117_v21  ;;  %v160_v24 = vadd.f32 %v174_v16, %v127_v22 }
  0xea   :  { %163 = vst [vmem:[%s311_s3 + $0x8] sm:$0xff] %v159_v19  ;;  %165 = vst [vmem:[%s311_s3 + $0x18] sm:$0xff] %v161_v20 }
  0xeb   :  { %162 = vst [vmem:[%s311_s3] sm:$0xff] %v158_v23  ;;  %164 = vst [vmem:[%s311_s3 + $0x10] sm:$0xff] %v160_v24 }

</bundles_post_ra>
